<compile_context>
chip_gen: v7x
topology: tpu7x:2x2x1
jax: 0.10.0
libtpu: 0.0.40
codegen_flags: <defaults>
</compile_context>

<pallas_src>
import functools

import jax
import jax.numpy as jnp
from jax.experimental import pallas as pl
from jax.experimental.pallas import tpu as pltpu

EPS = 1e-5  # PyTorch BatchNorm2d default eps


# ---------------------------- Pallas kernels ----------------------------

def _mm_kernel(x_ref, w_ref, b_ref, o_ref, acc_ref, *, relu):
    # out = act((x @ w) + bias)   -- K-tiled, f32 accumulator, bf16 MXU inputs.
    @pl.when(pl.program_id(2) == 0)
    def _():
        acc_ref[...] = jnp.zeros_like(acc_ref)

    acc_ref[...] += jnp.dot(x_ref[...], w_ref[...],
                            preferred_element_type=jnp.float32)

    @pl.when(pl.program_id(2) == pl.num_programs(2) - 1)
    def _():
        y = acc_ref[...] + b_ref[...]
        if relu:
            y = jnp.maximum(y, 0.0)
        o_ref[...] = y.astype(o_ref.dtype)


def _mm_res_kernel(x_ref, w_ref, b_ref, r_ref, o_ref, acc_ref, *, relu):
    # out = act((x @ w) + bias + residual)
    @pl.when(pl.program_id(2) == 0)
    def _():
        acc_ref[...] = jnp.zeros_like(acc_ref)

    acc_ref[...] += jnp.dot(x_ref[...], w_ref[...],
                            preferred_element_type=jnp.float32)

    @pl.when(pl.program_id(2) == pl.num_programs(2) - 1)
    def _():
        y = acc_ref[...] + b_ref[...] + r_ref[...].astype(jnp.float32)
        if relu:
            y = jnp.maximum(y, 0.0)
        o_ref[...] = y.astype(o_ref.dtype)


def _maxpool_kernel(x0_ref, x1_ref, x2_ref, o_ref):
    # Inputs: three W-shifted views of the -inf padded image, each (1, H+2, W, C).
    # W-direction max was turned into elementwise max of the three views (wrapper
    # provides the shifts); H-direction max uses slices along a leading (non-tiled)
    # axis, which is cheap vreg selection.  Output: dense 3x3 max, (1, H, W, C).
    mw = jnp.maximum(jnp.maximum(x0_ref[...], x1_ref[...]), x2_ref[...])
    mh = jnp.maximum(jnp.maximum(mw[:, :-2], mw[:, 1:-1]), mw[:, 2:])
    o_ref[...] = mh


def _head_kernel(x_ref, w_ref, b_ref, o_ref):
    # x_ref: (HW, N, C) -> global average pool, linear, log_softmax(dim=1).
    # (HW*N*C fits comfortably in VMEM even at full WRN-50-2 size: 49*N*2048.)
    feat = jnp.mean(x_ref[...].astype(jnp.float32), axis=0)          # (N, C)
    logits = jnp.dot(feat, w_ref[...], preferred_element_type=jnp.float32)
    logits = logits + b_ref[...]                                     # (N, L)
    m = jnp.max(logits, axis=-1, keepdims=True)
    z = logits - m
    lse = jnp.log(jnp.sum(jnp.exp(z), axis=-1, keepdims=True))
    o_ref[...] = (z - lse).astype(o_ref.dtype)


# ---------------------------- Pallas wrappers ----------------------------

def _round_up(x, m):
    return (x + m - 1) // m * m


def matmul_bias_act(x2d, w2d, bias, *, relu, residual=None,
                    out_dtype=jnp.bfloat16):
    """Fused (x @ w) + bias [+ residual] [ReLU], tiled over (M, N, K)."""
    M, K = x2d.shape
    K2, N = w2d.shape
    assert K == K2

    # ---- tile selection: lane-dense (>=128) N/K, VMEM-safe on v5e/v6e/v7x ----
    Kp = _round_up(K, 128)
    tk = 128
    for c in (256, 512, 1024):
        if Kp % c == 0:
            tk = c
    Np = _round_up(N, 128)
    tn = 128
    for c in (256, 512):
        if Np % c == 0:
            tn = c
    tm = 512 if M >= 512 else _round_up(M, 16)
    Mp = _round_up(M, tm)

    # ---- zero-pad operands to tile multiples (pad rows/cols sliced off below) ----
    xb = jnp.pad(x2d.astype(jnp.bfloat16), ((0, Mp - M), (0, Kp - K)))
    wb = jnp.pad(w2d.astype(jnp.bfloat16), ((0, Kp - K), (0, Np - N)))
    bb = jnp.pad(bias.astype(jnp.float32), ((0, Np - N),)).reshape(1, Np)

    grid = (Mp // tm, Np // tn, Kp // tk)      # K (reduction) last, 'arbitrary'
    in_specs = [
        pl.BlockSpec((tm, tk), lambda i, j, k: (i, k)),
        pl.BlockSpec((tk, tn), lambda i, j, k: (k, j)),
        pl.BlockSpec((1, tn), lambda i, j, k: (0, j)),
    ]
    args = [xb, wb, bb]
    if residual is None:
        kernel = functools.partial(_mm_kernel, relu=relu)
    else:
        rb = jnp.pad(residual.astype(jnp.bfloat16), ((0, Mp - M), (0, Np - N)))
        in_specs.append(pl.BlockSpec((tm, tn), lambda i, j, k: (i, j)))
        args.append(rb)
        kernel = functools.partial(_mm_res_kernel, relu=relu)

    out = pl.pallas_call(
        kernel,
        out_shape=jax.ShapeDtypeStruct((Mp, Np), out_dtype),
        grid=grid,
        in_specs=in_specs,
        out_specs=pl.BlockSpec((tm, tn), lambda i, j, k: (i, j)),
        scratch_shapes=[pltpu.VMEM((tm, tn), jnp.float32)],
        compiler_params=pltpu.CompilerParams(
            dimension_semantics=("parallel", "parallel", "arbitrary"),
            vmem_limit_bytes=48 * 1024 * 1024,
        ),
    )(*args)
    return out[:M, :N]


def im2col(x, kh, kw, stride, pad):
    """x: (N,H,W,C) bf16 -> (N,Ho,Wo, kh*kw*C) with (kh,kw,c) ordering."""
    # TODO(synk): patches are still materialized in HBM (in bf16 to halve traffic);
    # full in-kernel window fusion (tap accumulation with index_map windows) is a
    # further bandwidth optimization not implemented here.
    n, h, w, c = x.shape
    xp = jnp.pad(x, ((0, 0), (pad, pad), (pad, pad), (0, 0)))
    ho = (h + 2 * pad - kh) // stride + 1
    wo = (w + 2 * pad - kw) // stride + 1
    cols = []
    for i in range(kh):
        for j in range(kw):
            cols.append(xp[:, i:i + stride * (ho - 1) + 1:stride,
                           j:j + stride * (wo - 1) + 1:stride, :])
    patches = jnp.stack(cols, axis=3)                         # (N,Ho,Wo,kh*kw,C)
    return patches.reshape(n, ho, wo, kh * kw * c), ho, wo


def conv_bn(x, params, stride, pad, relu, residual=None):
    """Conv (no bias) + folded eval-mode BN (+residual) (+ReLU), via Pallas matmul."""
    w, bias = params                                          # w: (KH,KW,I,O) bf16
    kh, kw, cin, cout = w.shape
    n = x.shape[0]
    if kh == 1 and kw == 1 and pad == 0:
        xs = x[:, ::stride, ::stride, :]
        _, ho, wo, _ = xs.shape
        x2d = xs.reshape(n * ho * wo, cin)
    else:
        patches, ho, wo = im2col(x, kh, kw, stride, pad)
        x2d = patches.reshape(n * ho * wo, kh * kw * cin)
    w2d = w.reshape(kh * kw * cin, cout)
    res2d = None if residual is None else residual.reshape(n * ho * wo, cout)
    out = matmul_bias_act(x2d, w2d, bias, relu=relu, residual=res2d)
    return out.reshape(n, ho, wo, cout)


def maxpool_3x3_s2_p1(x):
    """F.max_pool2d(x, 3, 2, 1) -- implicit -inf padding, NHWC."""
    n, h, w, c = x.shape
    xp = jnp.pad(x, ((0, 0), (1, 1), (1, 1), (0, 0)),
                 constant_values=float("-inf"))
    # Three W-shifted views (the W taps); the kernel does the cheap elementwise max
    # and the H taps.  No 9x window stack is materialized in HBM.
    shifts = [xp[:, :, j:j + w, :] for j in range(3)]
    dense = pl.pallas_call(
        _maxpool_kernel,
        out_shape=jax.ShapeDtypeStruct((n, h, w, c), x.dtype),
        grid=(n,),
        in_specs=[pl.BlockSpec((1, h + 2, w, c), lambda i: (i, 0, 0, 0))] * 3,
        out_specs=pl.BlockSpec((1, h, w, c), lambda i: (i, 0, 0, 0)),
        compiler_params=pltpu.CompilerParams(dimension_semantics=("parallel",)),
    )(*shifts)
    return dense[:, ::2, ::2, :]            # stride-2 window subsampling


def head(x, w_lin, b_lin):
    """Global avg-pool (mean over H,W) + linear + log_softmax, single kernel."""
    n, h, w, c = x.shape
    feats = jnp.transpose(x.reshape(n, h * w, c), (1, 0, 2))  # (HW, N, C)
    nl = w_lin.shape[1]
    return pl.pallas_call(
        _head_kernel,
        out_shape=jax.ShapeDtypeStruct((n, nl), jnp.float32),
        in_specs=[pl.BlockSpec(memory_space=pltpu.MemorySpace.VMEM)] * 3,
        out_specs=pl.BlockSpec(memory_space=pltpu.MemorySpace.VMEM),
    )(feats, w_lin.astype(jnp.float32), b_lin.reshape(1, nl).astype(jnp.float32))


# ---------------------------- parameter init ----------------------------

def init_conv_bn(key, kh, kw, cin, cout):
    k1, k2, k3, k4, k5 = jax.random.split(key, 5)
    fan_in = kh * kw * cin
    w = jax.random.normal(k1, (kh, kw, cin, cout), jnp.float32) * (2.0 / fan_in) ** 0.5
    gamma = 1.0 + 0.1 * jax.random.normal(k2, (cout,), jnp.float32)
    beta = 0.1 * jax.random.normal(k3, (cout,), jnp.float32)
    running_mean = 0.1 * jax.random.normal(k4, (cout,), jnp.float32)
    running_var = jax.random.uniform(k5, (cout,), jnp.float32, 0.5, 1.5)
    scale = gamma / jnp.sqrt(running_var + EPS)               # folded eval-mode BN
    bias = beta - running_mean * scale
    w_folded = (w * scale[None, None, None, :]).astype(jnp.bfloat16)
    return (w_folded, bias)


def init_block(key, cin, cmid, cout, stride):
    ks = jax.random.split(key, 4)
    has_sc = (stride != 1) or (cin != cout)
    return {
        "conv1": init_conv_bn(ks[0], 1, 1, cin, cmid),
        "conv2": init_conv_bn(ks[1], 3, 3, cmid, cmid),
        "conv3": init_conv_bn(ks[2], 1, 1, cmid, cout),
        "shortcut": init_conv_bn(ks[3], 1, 1, cin, cout) if has_sc else None,
        "stride": stride,
    }


def init_wideresnet(key, *, base=4, blocks=(2, 2, 2, 2), nlabels=10):
    # Scaled-down WRN-50-2: inner width = base*2*2^g, outer width = base*4*2^g.
    kstem, kgroups, klin = jax.random.split(key, 3)
    params = {"stem": init_conv_bn(kstem, 7, 7, 3, base)}
    groups = []
    cin = base
    gkeys = jax.random.split(kgroups, 4)
    strides = (1, 2, 2, 2)
    for g in range(4):
        cmid = base * 2 * (2 ** g)
        cout = base * 4 * (2 ** g)
        blist = []
        bkeys = jax.random.split(gkeys[g], blocks[g])
        for bidx in range(blocks[g]):
            s = strides[g] if bidx == 0 else 1
            blist.append(init_block(bkeys[bidx], cin, cmid, cout, s))
            cin = cout
        groups.append(blist)
    params["groups"] = groups
    k1, k2 = jax.random.split(klin)
    w_lin = jax.random.normal(k1, (cin, nlabels), jnp.float32) * (1.0 / cin) ** 0.5
    b_lin = 0.01 * jax.random.normal(k2, (nlabels,), jnp.float32)
    params["linear"] = (w_lin, b_lin)
    return params


# ---------------------------- forward pass ----------------------------

def block_forward(x, p):
    s = p["stride"]
    h = conv_bn(x, p["conv1"], stride=1, pad=0, relu=True)
    h = conv_bn(h, p["conv2"], stride=s, pad=1, relu=True)
    if p["shortcut"] is not None:
        sc = conv_bn(x, p["shortcut"], stride=s, pad=0, relu=False)
    else:
        sc = x
    # conv3 + bn3 + shortcut-add + ReLU fused into one Pallas matmul kernel.
    return conv_bn(h, p["conv3"], stride=1, pad=0, relu=True, residual=sc)


def wideresnet_forward(x_nchw, params):
    x = jnp.transpose(x_nchw, (0, 2, 3, 1)).astype(jnp.bfloat16)  # NCHW -> NHWC bf16
    x = conv_bn(x, params["stem"], stride=2, pad=3, relu=True)    # conv1+bn1+relu
    x = maxpool_3x3_s2_p1(x)                                      # max_pool2d(3,2,1)
    for g in range(4):
        for bp in params["groups"][g]:
            x = block_forward(x, bp)
    w_lin, b_lin = params["linear"]
    return head(x, w_lin, b_lin)                                  # log_softmax(linear(gap(x)))


if __name__ == "__main__":
    key = jax.random.PRNGKey(0)
    kx, kp = jax.random.split(key)
    # Small input consistent with the module's NCHW conv stem (RGB image).
    x = jax.random.normal(kx, (2, 3, 32, 32), jnp.float32)
    params = init_wideresnet(kp, base=4, blocks=(2, 2, 2, 2), nlabels=10)

    fwd = jax.jit(lambda inp: wideresnet_forward(inp, params))
    out = fwd(x)
    out = jax.block_until_ready(out)
    assert out.shape == (2, 10)
    assert bool(jnp.all(jnp.isfinite(out)))
    print("KERNEL_OK")
</pallas_src>

<mosaic_0001>
module attributes {stable_mosaic.version = 11 : i64} {
  func.func @_mm_kernel(%arg0: i32, %arg1: i32, %arg2: i32, %arg3: memref<512x256xbf16, #tpu.memory_space<vmem>>, %arg4: memref<256x128xbf16, #tpu.memory_space<vmem>>, %arg5: memref<1x128xf32, #tpu.memory_space<vmem>>, %arg6: memref<512x128xbf16, #tpu.memory_space<vmem>>, %arg7: memref<512x128xf32, #tpu.memory_space<vmem>>) attributes {dimension_semantics = [#tpu.dimension_semantics<parallel>, #tpu.dimension_semantics<parallel>, #tpu.dimension_semantics<arbitrary>], iteration_bounds = array<i64: 1, 1, 1>, scalar_prefetch = 0 : i64, scratch_operands = 1 : i64, tpu.core_type = #tpu.core_type<tc>, window_params = [{transform_indices = @transform_0, window_bounds = array<i64: 512, 256>}, {transform_indices = @transform_1, window_bounds = array<i64: 256, 128>}, {transform_indices = @transform_2, window_bounds = array<i64: 1, 128>}, {transform_indices = @transform_3, window_bounds = array<i64: 512, 128>}]} {
    %c0_i32 = arith.constant 0 : i32
    %0 = arith.cmpi eq, %arg2, %c0_i32 : i32
    %1 = arith.extui %0 : i1 to i32
    %c0_i32_0 = arith.constant 0 : i32
    %2 = arith.cmpi ne, %1, %c0_i32_0 : i32
    scf.if %2 {
      %cst_10 = arith.constant 0.000000e+00 : f32
      %12 = vector.broadcast %cst_10 : f32 to vector<512x128xf32>
      %c0_11 = arith.constant 0 : index
      %c0_12 = arith.constant 0 : index
      %13 = vector.load %arg7[%c0_11, %c0_12] : memref<512x128xf32, #tpu.memory_space<vmem>>, vector<512x128xf32>
      tpu.vector_store %arg7[%c0_11, %c0_12], %12 {strides = array<i32>} : memref<512x128xf32, #tpu.memory_space<vmem>>, vector<512x128xf32>,
    } else {
    }
    %c0 = arith.constant 0 : index
    %c0_1 = arith.constant 0 : index
    %3 = vector.load %arg7[%c0, %c0_1] : memref<512x128xf32, #tpu.memory_space<vmem>>, vector<512x128xf32>
    %c0_2 = arith.constant 0 : index
    %c0_3 = arith.constant 0 : index
    %4 = vector.load %arg3[%c0_2, %c0_3] : memref<512x256xbf16, #tpu.memory_space<vmem>>, vector<512x256xbf16>
    %c0_4 = arith.constant 0 : index
    %c0_5 = arith.constant 0 : index
    %5 = vector.load %arg4[%c0_4, %c0_5] : memref<256x128xbf16, #tpu.memory_space<vmem>>, vector<256x128xbf16>
    %cst = arith.constant dense<0.000000e+00> : vector<512x128xf32>
    %6 = tpu.matmul %4, %5, %cst {dimension_numbers = #tpu.dot_dimension_numbers<[1], [0], [0], [1], [0, 0, 1, 1], [], []>} : vector<512x256xbf16>, vector<256x128xbf16>, vector<512x128xf32> -> vector<512x128xf32>
    %7 = arith.addf %3, %6 : vector<512x128xf32>
    %c0_6 = arith.constant 0 : index
    %c0_7 = arith.constant 0 : index
    %8 = vector.load %arg7[%c0_6, %c0_7] : memref<512x128xf32, #tpu.memory_space<vmem>>, vector<512x128xf32>
    tpu.vector_store %arg7[%c0_6, %c0_7], %7 {strides = array<i32>} : memref<512x128xf32, #tpu.memory_space<vmem>>, vector<512x128xf32>,
    %c0_i32_8 = arith.constant 0 : i32
    %9 = arith.cmpi eq, %arg2, %c0_i32_8 : i32
    %10 = arith.extui %9 : i1 to i32
    %c0_i32_9 = arith.constant 0 : i32
    %11 = arith.cmpi ne, %10, %c0_i32_9 : i32
    scf.if %11 {
      %c0_10 = arith.constant 0 : index
      %c0_11 = arith.constant 0 : index
      %12 = vector.load %arg7[%c0_10, %c0_11] : memref<512x128xf32, #tpu.memory_space<vmem>>, vector<512x128xf32>
      %c0_12 = arith.constant 0 : index
      %c0_13 = arith.constant 0 : index
      %13 = vector.load %arg5[%c0_12, %c0_13] : memref<1x128xf32, #tpu.memory_space<vmem>>, vector<1x128xf32>
      %14 = vector.broadcast %13 : vector<1x128xf32> to vector<512x128xf32>
      %15 = arith.addf %12, %14 : vector<512x128xf32>
      %cst_14 = arith.constant 0.000000e+00 : f32
      %16 = vector.broadcast %cst_14 : f32 to vector<512x128xf32>
      %17 = arith.maximumf %15, %16 : vector<512x128xf32>
      %18 = arith.truncf %17 : vector<512x128xf32> to vector<512x128xbf16>
      %c0_15 = arith.constant 0 : index
      %c0_16 = arith.constant 0 : index
      %19 = vector.load %arg6[%c0_15, %c0_16] : memref<512x128xbf16, #tpu.memory_space<vmem>>, vector<512x128xbf16>
      tpu.vector_store %arg6[%c0_15, %c0_16], %18 {strides = array<i32>} : memref<512x128xbf16, #tpu.memory_space<vmem>>, vector<512x128xbf16>,
    } else {
    }
    return
  }
  func.func @transform_0(%arg0: i32, %arg1: i32, %arg2: i32) -> (i32, i32) {
    %c0_i32 = arith.constant 0 : i32
    return %arg0, %arg2 : i32, i32
  }
  func.func @transform_1(%arg0: i32, %arg1: i32, %arg2: i32) -> (i32, i32) {
    %c0_i32 = arith.constant 0 : i32
    return %arg2, %arg1 : i32, i32
  }
  func.func @transform_2(%arg0: i32, %arg1: i32, %arg2: i32) -> (i32, i32) {
    %c0_i32 = arith.constant 0 : i32
    %c0_i32_0 = arith.constant 0 : i32
    return %c0_i32, %arg1 : i32, i32
  }
  func.func @transform_3(%arg0: i32, %arg1: i32, %arg2: i32) -> (i32, i32) {
    %c0_i32 = arith.constant 0 : i32
    return %arg0, %arg1 : i32, i32
  }
}

module attributes {stable_mosaic.version = 11 : i64} {
  func.func @_maxpool_kernel(%arg0: i32, %arg1: memref<1x18x16x4xbf16, #tpu.memory_space<vmem>>, %arg2: memref<1x18x16x4xbf16, #tpu.memory_space<vmem>>, %arg3: memref<1x18x16x4xbf16, #tpu.memory_space<vmem>>, %arg4: memref<1x16x16x4xbf16, #tpu.memory_space<vmem>>) attributes {dimension_semantics = [#tpu.dimension_semantics<parallel>], iteration_bounds = array<i64: 2>, scalar_prefetch = 0 : i64, scratch_operands = 0 : i64, tpu.core_type = #tpu.core_type<tc>, window_params = [{transform_indices = @transform_0, window_bounds = array<i64: 1, 18, 16, 4>}, {transform_indices = @transform_1, window_bounds = array<i64: 1, 18, 16, 4>}, {transform_indices = @transform_2, window_bounds = array<i64: 1, 18, 16, 4>}, {transform_indices = @transform_3, window_bounds = array<i64: 1, 16, 16, 4>}]} {
    %c0 = arith.constant 0 : index
    %c0_0 = arith.constant 0 : index
    %c0_1 = arith.constant 0 : index
    %c0_2 = arith.constant 0 : index
    %0 = vector.load %arg1[%c0, %c0_0, %c0_1, %c0_2] : memref<1x18x16x4xbf16, #tpu.memory_space<vmem>>, vector<1x18x16x4xbf16>
    %c0_3 = arith.constant 0 : index
    %c0_4 = arith.constant 0 : index
    %c0_5 = arith.constant 0 : index
    %c0_6 = arith.constant 0 : index
    %1 = vector.load %arg2[%c0_3, %c0_4, %c0_5, %c0_6] : memref<1x18x16x4xbf16, #tpu.memory_space<vmem>>, vector<1x18x16x4xbf16>
    %2 = arith.maximumf %0, %1 : vector<1x18x16x4xbf16>
    %c0_7 = arith.constant 0 : index
    %c0_8 = arith.constant 0 : index
    %c0_9 = arith.constant 0 : index
    %c0_10 = arith.constant 0 : index
    %3 = vector.load %arg3[%c0_7, %c0_8, %c0_9, %c0_10] : memref<1x18x16x4xbf16, #tpu.memory_space<vmem>>, vector<1x18x16x4xbf16>
    %4 = arith.maximumf %2, %3 : vector<1x18x16x4xbf16>
    %5 = vector.extract_strided_slice %4 {offsets = [0, 0, 0, 0], sizes = [1, 16, 16, 4], strides = [1, 1, 1, 1]} : vector<1x18x16x4xbf16> to vector<1x16x16x4xbf16>
    %6 = vector.extract_strided_slice %4 {offsets = [0, 1, 0, 0], sizes = [1, 16, 16, 4], strides = [1, 1, 1, 1]} : vector<1x18x16x4xbf16> to vector<1x16x16x4xbf16>
    %7 = arith.maximumf %5, %6 : vector<1x16x16x4xbf16>
    %8 = vector.extract_strided_slice %4 {offsets = [0, 2, 0, 0], sizes = [1, 16, 16, 4], strides = [1, 1, 1, 1]} : vector<1x18x16x4xbf16> to vector<1x16x16x4xbf16>
    %9 = arith.maximumf %7, %8 : vector<1x16x16x4xbf16>
    %c0_11 = arith.constant 0 : index
    %c0_12 = arith.constant 0 : index
    %c0_13 = arith.constant 0 : index
    %c0_14 = arith.constant 0 : index
    %10 = vector.load %arg4[%c0_11, %c0_12, %c0_13, %c0_14] : memref<1x16x16x4xbf16, #tpu.memory_space<vmem>>, vector<1x16x16x4xbf16>
    tpu.vector_store %arg4[%c0_11, %c0_12, %c0_13, %c0_14], %9 {strides = array<i32>} : memref<1x16x16x4xbf16, #tpu.memory_space<vmem>>, vector<1x16x16x4xbf16>,
    return
  }
  func.func @transform_0(%arg0: i32) -> (i32, i32, i32, i32) {
    %c0_i32 = arith.constant 0 : i32
    %c0_i32_0 = arith.constant 0 : i32
    %c0_i32_1 = arith.constant 0 : i32
    %c0_i32_2 = arith.constant 0 : i32
    return %arg0, %c0_i32, %c0_i32_0, %c0_i32_1 : i32, i32, i32, i32
  }
  func.func @transform_1(%arg0: i32) -> (i32, i32, i32, i32) {
    %c0_i32 = arith.constant 0 : i32
    %c0_i32_0 = arith.constant 0 : i32
    %c0_i32_1 = arith.constant 0 : i32
    %c0_i32_2 = arith.constant 0 : i32
    return %arg0, %c0_i32, %c0_i32_0, %c0_i32_1 : i32, i32, i32, i32
  }
  func.func @transform_2(%arg0: i32) -> (i32, i32, i32, i32) {
    %c0_i32 = arith.constant 0 : i32
    %c0_i32_0 = arith.constant 0 : i32
    %c0_i32_1 = arith.constant 0 : i32
    %c0_i32_2 = arith.constant 0 : i32
    return %arg0, %c0_i32, %c0_i32_0, %c0_i32_1 : i32, i32, i32, i32
  }
  func.func @transform_3(%arg0: i32) -> (i32, i32, i32, i32) {
    %c0_i32 = arith.constant 0 : i32
    %c0_i32_0 = arith.constant 0 : i32
    %c0_i32_1 = arith.constant 0 : i32
    %c0_i32_2 = arith.constant 0 : i32
    return %arg0, %c0_i32, %c0_i32_0, %c0_i32_1 : i32, i32, i32, i32
  }
}

module attributes {stable_mosaic.version = 11 : i64} {
  func.func @_mm_kernel(%arg0: i32, %arg1: i32, %arg2: i32, %arg3: memref<128x128xbf16, #tpu.memory_space<vmem>>, %arg4: memref<128x128xbf16, #tpu.memory_space<vmem>>, %arg5: memref<1x128xf32, #tpu.memory_space<vmem>>, %arg6: memref<128x128xbf16, #tpu.memory_space<vmem>>, %arg7: memref<128x128xf32, #tpu.memory_space<vmem>>) attributes {dimension_semantics = [#tpu.dimension_semantics<parallel>, #tpu.dimension_semantics<parallel>, #tpu.dimension_semantics<arbitrary>], iteration_bounds = array<i64: 1, 1, 1>, scalar_prefetch = 0 : i64, scratch_operands = 1 : i64, tpu.core_type = #tpu.core_type<tc>, window_params = [{transform_indices = @transform_0, window_bounds = array<i64: 128, 128>}, {transform_indices = @transform_1, window_bounds = array<i64: 128, 128>}, {transform_indices = @transform_2, window_bounds = array<i64: 1, 128>}, {transform_indices = @transform_3, window_bounds = array<i64: 128, 128>}]} {
    %c0_i32 = arith.constant 0 : i32
    %0 = arith.cmpi eq, %arg2, %c0_i32 : i32
    %1 = arith.extui %0 : i1 to i32
    %c0_i32_0 = arith.constant 0 : i32
    %2 = arith.cmpi ne, %1, %c0_i32_0 : i32
    scf.if %2 {
      %cst_10 = arith.constant 0.000000e+00 : f32
      %12 = vector.broadcast %cst_10 : f32 to vector<128x128xf32>
      %c0_11 = arith.constant 0 : index
      %c0_12 = arith.constant 0 : index
      %13 = vector.load %arg7[%c0_11, %c0_12] : memref<128x128xf32, #tpu.memory_space<vmem>>, vector<128x128xf32>
      tpu.vector_store %arg7[%c0_11, %c0_12], %12 {strides = array<i32>} : memref<128x128xf32, #tpu.memory_space<vmem>>, vector<128x128xf32>,
    } else {
    }
    %c0 = arith.constant 0 : index
    %c0_1 = arith.constant 0 : index
    %3 = vector.load %arg7[%c0, %c0_1] : memref<128x128xf32, #tpu.memory_space<vmem>>, vector<128x128xf32>
    %c0_2 = arith.constant 0 : index
    %c0_3 = arith.constant 0 : index
    %4 = vector.load %arg3[%c0_2, %c0_3] : memref<128x128xbf16, #tpu.memory_space<vmem>>, vector<128x128xbf16>
    %c0_4 = arith.constant 0 : index
    %c0_5 = arith.constant 0 : index
    %5 = vector.load %arg4[%c0_4, %c0_5] : memref<128x128xbf16, #tpu.memory_space<vmem>>, vector<128x128xbf16>
    %cst = arith.constant dense<0.000000e+00> : vector<128x128xf32>
    %6 = tpu.matmul %4, %5, %cst {dimension_numbers = #tpu.dot_dimension_numbers<[1], [0], [0], [1], [0, 0, 1, 1], [], []>} : vector<128x128xbf16>, vector<128x128xbf16>, vector<128x128xf32> -> vector<128x128xf32>
    %7 = arith.addf %3, %6 : vector<128x128xf32>
    %c0_6 = arith.constant 0 : index
    %c0_7 = arith.constant 0 : index
    %8 = vector.load %arg7[%c0_6, %c0_7] : memref<128x128xf32, #tpu.memory_space<vmem>>, vector<128x128xf32>
    tpu.vector_store %arg7[%c0_6, %c0_7], %7 {strides = array<i32>} : memref<128x128xf32, #tpu.memory_space<vmem>>, vector<128x128xf32>,
    %c0_i32_8 = arith.constant 0 : i32
    %9 = arith.cmpi eq, %arg2, %c0_i32_8 : i32
    %10 = arith.extui %9 : i1 to i32
    %c0_i32_9 = arith.constant 0 : i32
    %11 = arith.cmpi ne, %10, %c0_i32_9 : i32
    scf.if %11 {
      %c0_10 = arith.constant 0 : index
      %c0_11 = arith.constant 0 : index
      %12 = vector.load %arg7[%c0_10, %c0_11] : memref<128x128xf32, #tpu.memory_space<vmem>>, vector<128x128xf32>
      %c0_12 = arith.constant 0 : index
      %c0_13 = arith.constant 0 : index
      %13 = vector.load %arg5[%c0_12, %c0_13] : memref<1x128xf32, #tpu.memory_space<vmem>>, vector<1x128xf32>
      %14 = vector.broadcast %13 : vector<1x128xf32> to vector<128x128xf32>
      %15 = arith.addf %12, %14 : vector<128x128xf32>
      %cst_14 = arith.constant 0.000000e+00 : f32
      %16 = vector.broadcast %cst_14 : f32 to vector<128x128xf32>
      %17 = arith.maximumf %15, %16 : vector<128x128xf32>
      %18 = arith.truncf %17 : vector<128x128xf32> to vector<128x128xbf16>
      %c0_15 = arith.constant 0 : index
      %c0_16 = arith.constant 0 : index
      %19 = vector.load %arg6[%c0_15, %c0_16] : memref<128x128xbf16, #tpu.memory_space<vmem>>, vector<128x128xbf16>
      tpu.vector_store %arg6[%c0_15, %c0_16], %18 {strides = array<i32>} : memref<128x128xbf16, #tpu.memory_space<vmem>>, vector<128x128xbf16>,
    } else {
    }
    return
  }
  func.func @transform_0(%arg0: i32, %arg1: i32, %arg2: i32) -> (i32, i32) {
    %c0_i32 = arith.constant 0 : i32
    return %arg0, %arg2 : i32, i32
  }
  func.func @transform_1(%arg0: i32, %arg1: i32, %arg2: i32) -> (i32, i32) {
    %c0_i32 = arith.constant 0 : i32
    return %arg2, %arg1 : i32, i32
  }
  func.func @transform_2(%arg0: i32, %arg1: i32, %arg2: i32) -> (i32, i32) {
    %c0_i32 = arith.constant 0 : i32
    %c0_i32_0 = arith.constant 0 : i32
    return %c0_i32, %arg1 : i32, i32
  }
  func.func @transform_3(%arg0: i32, %arg1: i32, %arg2: i32) -> (i32, i32) {
    %c0_i32 = arith.constant 0 : i32
    return %arg0, %arg1 : i32, i32
  }
}

module attributes {stable_mosaic.version = 11 : i64} {
  func.func @_mm_kernel(%arg0: i32, %arg1: i32, %arg2: i32, %arg3: memref<128x128xbf16, #tpu.memory_space<vmem>>, %arg4: memref<128x128xbf16, #tpu.memory_space<vmem>>, %arg5: memref<1x128xf32, #tpu.memory_space<vmem>>, %arg6: memref<128x128xbf16, #tpu.memory_space<vmem>>, %arg7: memref<128x128xf32, #tpu.memory_space<vmem>>) attributes {dimension_semantics = [#tpu.dimension_semantics<parallel>, #tpu.dimension_semantics<parallel>, #tpu.dimension_semantics<arbitrary>], iteration_bounds = array<i64: 1, 1, 1>, scalar_prefetch = 0 : i64, scratch_operands = 1 : i64, tpu.core_type = #tpu.core_type<tc>, window_params = [{transform_indices = @transform_0, window_bounds = array<i64: 128, 128>}, {transform_indices = @transform_1, window_bounds = array<i64: 128, 128>}, {transform_indices = @transform_2, window_bounds = array<i64: 1, 128>}, {transform_indices = @transform_3, window_bounds = array<i64: 128, 128>}]} {
    %c0_i32 = arith.constant 0 : i32
    %0 = arith.cmpi eq, %arg2, %c0_i32 : i32
    %1 = arith.extui %0 : i1 to i32
    %c0_i32_0 = arith.constant 0 : i32
    %2 = arith.cmpi ne, %1, %c0_i32_0 : i32
    scf.if %2 {
      %cst_10 = arith.constant 0.000000e+00 : f32
      %12 = vector.broadcast %cst_10 : f32 to vector<128x128xf32>
      %c0_11 = arith.constant 0 : index
      %c0_12 = arith.constant 0 : index
      %13 = vector.load %arg7[%c0_11, %c0_12] : memref<128x128xf32, #tpu.memory_space<vmem>>, vector<128x128xf32>
      tpu.vector_store %arg7[%c0_11, %c0_12], %12 {strides = array<i32>} : memref<128x128xf32, #tpu.memory_space<vmem>>, vector<128x128xf32>,
    } else {
    }
    %c0 = arith.constant 0 : index
    %c0_1 = arith.constant 0 : index
    %3 = vector.load %arg7[%c0, %c0_1] : memref<128x128xf32, #tpu.memory_space<vmem>>, vector<128x128xf32>
    %c0_2 = arith.constant 0 : index
    %c0_3 = arith.constant 0 : index
    %4 = vector.load %arg3[%c0_2, %c0_3] : memref<128x128xbf16, #tpu.memory_space<vmem>>, vector<128x128xbf16>
    %c0_4 = arith.constant 0 : index
    %c0_5 = arith.constant 0 : index
    %5 = vector.load %arg4[%c0_4, %c0_5] : memref<128x128xbf16, #tpu.memory_space<vmem>>, vector<128x128xbf16>
    %cst = arith.constant dense<0.000000e+00> : vector<128x128xf32>
    %6 = tpu.matmul %4, %5, %cst {dimension_numbers = #tpu.dot_dimension_numbers<[1], [0], [0], [1], [0, 0, 1, 1], [], []>} : vector<128x128xbf16>, vector<128x128xbf16>, vector<128x128xf32> -> vector<128x128xf32>
    %7 = arith.addf %3, %6 : vector<128x128xf32>
    %c0_6 = arith.constant 0 : index
    %c0_7 = arith.constant 0 : index
    %8 = vector.load %arg7[%c0_6, %c0_7] : memref<128x128xf32, #tpu.memory_space<vmem>>, vector<128x128xf32>
    tpu.vector_store %arg7[%c0_6, %c0_7], %7 {strides = array<i32>} : memref<128x128xf32, #tpu.memory_space<vmem>>, vector<128x128xf32>,
    %c0_i32_8 = arith.constant 0 : i32
    %9 = arith.cmpi eq, %arg2, %c0_i32_8 : i32
    %10 = arith.extui %9 : i1 to i32
    %c0_i32_9 = arith.constant 0 : i32
    %11 = arith.cmpi ne, %10, %c0_i32_9 : i32
    scf.if %11 {
      %c0_10 = arith.constant 0 : index
      %c0_11 = arith.constant 0 : index
      %12 = vector.load %arg7[%c0_10, %c0_11] : memref<128x128xf32, #tpu.memory_space<vmem>>, vector<128x128xf32>
      %c0_12 = arith.constant 0 : index
      %c0_13 = arith.constant 0 : index
      %13 = vector.load %arg5[%c0_12, %c0_13] : memref<1x128xf32, #tpu.memory_space<vmem>>, vector<1x128xf32>
      %14 = vector.broadcast %13 : vector<1x128xf32> to vector<128x128xf32>
      %15 = arith.addf %12, %14 : vector<128x128xf32>
      %16 = arith.truncf %15 : vector<128x128xf32> to vector<128x128xbf16>
      %c0_14 = arith.constant 0 : index
      %c0_15 = arith.constant 0 : index
      %17 = vector.load %arg6[%c0_14, %c0_15] : memref<128x128xbf16, #tpu.memory_space<vmem>>, vector<128x128xbf16>
      tpu.vector_store %arg6[%c0_14, %c0_15], %16 {strides = array<i32>} : memref<128x128xbf16, #tpu.memory_space<vmem>>, vector<128x128xbf16>,
    } else {
    }
    return
  }
  func.func @transform_0(%arg0: i32, %arg1: i32, %arg2: i32) -> (i32, i32) {
    %c0_i32 = arith.constant 0 : i32
    return %arg0, %arg2 : i32, i32
  }
  func.func @transform_1(%arg0: i32, %arg1: i32, %arg2: i32) -> (i32, i32) {
    %c0_i32 = arith.constant 0 : i32
    return %arg2, %arg1 : i32, i32
  }
  func.func @transform_2(%arg0: i32, %arg1: i32, %arg2: i32) -> (i32, i32) {
    %c0_i32 = arith.constant 0 : i32
    %c0_i32_0 = arith.constant 0 : i32
    return %c0_i32, %arg1 : i32, i32
  }
  func.func @transform_3(%arg0: i32, %arg1: i32, %arg2: i32) -> (i32, i32) {
    %c0_i32 = arith.constant 0 : i32
    return %arg0, %arg1 : i32, i32
  }
}

module attributes {stable_mosaic.version = 11 : i64} {
  func.func @_mm_res_kernel(%arg0: i32, %arg1: i32, %arg2: i32, %arg3: memref<128x128xbf16, #tpu.memory_space<vmem>>, %arg4: memref<128x128xbf16, #tpu.memory_space<vmem>>, %arg5: memref<1x128xf32, #tpu.memory_space<vmem>>, %arg6: memref<128x128xbf16, #tpu.memory_space<vmem>>, %arg7: memref<128x128xbf16, #tpu.memory_space<vmem>>, %arg8: memref<128x128xf32, #tpu.memory_space<vmem>>) attributes {dimension_semantics = [#tpu.dimension_semantics<parallel>, #tpu.dimension_semantics<parallel>, #tpu.dimension_semantics<arbitrary>], iteration_bounds = array<i64: 1, 1, 1>, scalar_prefetch = 0 : i64, scratch_operands = 1 : i64, tpu.core_type = #tpu.core_type<tc>, window_params = [{transform_indices = @transform_0, window_bounds = array<i64: 128, 128>}, {transform_indices = @transform_1, window_bounds = array<i64: 128, 128>}, {transform_indices = @transform_2, window_bounds = array<i64: 1, 128>}, {transform_indices = @transform_3, window_bounds = array<i64: 128, 128>}, {transform_indices = @transform_4, window_bounds = array<i64: 128, 128>}]} {
    %c0_i32 = arith.constant 0 : i32
    %0 = arith.cmpi eq, %arg2, %c0_i32 : i32
    %1 = arith.extui %0 : i1 to i32
    %c0_i32_0 = arith.constant 0 : i32
    %2 = arith.cmpi ne, %1, %c0_i32_0 : i32
    scf.if %2 {
      %cst_10 = arith.constant 0.000000e+00 : f32
      %12 = vector.broadcast %cst_10 : f32 to vector<128x128xf32>
      %c0_11 = arith.constant 0 : index
      %c0_12 = arith.constant 0 : index
      %13 = vector.load %arg8[%c0_11, %c0_12] : memref<128x128xf32, #tpu.memory_space<vmem>>, vector<128x128xf32>
      tpu.vector_store %arg8[%c0_11, %c0_12], %12 {strides = array<i32>} : memref<128x128xf32, #tpu.memory_space<vmem>>, vector<128x128xf32>,
    } else {
    }
    %c0 = arith.constant 0 : index
    %c0_1 = arith.constant 0 : index
    %3 = vector.load %arg8[%c0, %c0_1] : memref<128x128xf32, #tpu.memory_space<vmem>>, vector<128x128xf32>
    %c0_2 = arith.constant 0 : index
    %c0_3 = arith.constant 0 : index
    %4 = vector.load %arg3[%c0_2, %c0_3] : memref<128x128xbf16, #tpu.memory_space<vmem>>, vector<128x128xbf16>
    %c0_4 = arith.constant 0 : index
    %c0_5 = arith.constant 0 : index
    %5 = vector.load %arg4[%c0_4, %c0_5] : memref<128x128xbf16, #tpu.memory_space<vmem>>, vector<128x128xbf16>
    %cst = arith.constant dense<0.000000e+00> : vector<128x128xf32>
    %6 = tpu.matmul %4, %5, %cst {dimension_numbers = #tpu.dot_dimension_numbers<[1], [0], [0], [1], [0, 0, 1, 1], [], []>} : vector<128x128xbf16>, vector<128x128xbf16>, vector<128x128xf32> -> vector<128x128xf32>
    %7 = arith.addf %3, %6 : vector<128x128xf32>
    %c0_6 = arith.constant 0 : index
    %c0_7 = arith.constant 0 : index
    %8 = vector.load %arg8[%c0_6, %c0_7] : memref<128x128xf32, #tpu.memory_space<vmem>>, vector<128x128xf32>
    tpu.vector_store %arg8[%c0_6, %c0_7], %7 {strides = array<i32>} : memref<128x128xf32, #tpu.memory_space<vmem>>, vector<128x128xf32>,
    %c0_i32_8 = arith.constant 0 : i32
    %9 = arith.cmpi eq, %arg2, %c0_i32_8 : i32
    %10 = arith.extui %9 : i1 to i32
    %c0_i32_9 = arith.constant 0 : i32
    %11 = arith.cmpi ne, %10, %c0_i32_9 : i32
    scf.if %11 {
      %c0_10 = arith.constant 0 : index
      %c0_11 = arith.constant 0 : index
      %12 = vector.load %arg8[%c0_10, %c0_11] : memref<128x128xf32, #tpu.memory_space<vmem>>, vector<128x128xf32>
      %c0_12 = arith.constant 0 : index
      %c0_13 = arith.constant 0 : index
      %13 = vector.load %arg5[%c0_12, %c0_13] : memref<1x128xf32, #tpu.memory_space<vmem>>, vector<1x128xf32>
      %14 = vector.broadcast %13 : vector<1x128xf32> to vector<128x128xf32>
      %15 = arith.addf %12, %14 : vector<128x128xf32>
      %c0_14 = arith.constant 0 : index
      %c0_15 = arith.constant 0 : index
      %16 = vector.load %arg6[%c0_14, %c0_15] : memref<128x128xbf16, #tpu.memory_space<vmem>>, vector<128x128xbf16>
      %17 = arith.extf %16 : vector<128x128xbf16> to vector<128x128xf32>
      %18 = arith.addf %15, %17 : vector<128x128xf32>
      %cst_16 = arith.constant 0.000000e+00 : f32
      %19 = vector.broadcast %cst_16 : f32 to vector<128x128xf32>
      %20 = arith.maximumf %18, %19 : vector<128x128xf32>
      %21 = arith.truncf %20 : vector<128x128xf32> to vector<128x128xbf16>
      %c0_17 = arith.constant 0 : index
      %c0_18 = arith.constant 0 : index
      %22 = vector.load %arg7[%c0_17, %c0_18] : memref<128x128xbf16, #tpu.memory_space<vmem>>, vector<128x128xbf16>
      tpu.vector_store %arg7[%c0_17, %c0_18], %21 {strides = array<i32>} : memref<128x128xbf16, #tpu.memory_space<vmem>>, vector<128x128xbf16>,
    } else {
    }
    return
  }
  func.func @transform_0(%arg0: i32, %arg1: i32, %arg2: i32) -> (i32, i32) {
    %c0_i32 = arith.constant 0 : i32
    return %arg0, %arg2 : i32, i32
  }
  func.func @transform_1(%arg0: i32, %arg1: i32, %arg2: i32) -> (i32, i32) {
    %c0_i32 = arith.constant 0 : i32
    return %arg2, %arg1 : i32, i32
  }
  func.func @transform_2(%arg0: i32, %arg1: i32, %arg2: i32) -> (i32, i32) {
    %c0_i32 = arith.constant 0 : i32
    %c0_i32_0 = arith.constant 0 : i32
    return %c0_i32, %arg1 : i32, i32
  }
  func.func @transform_3(%arg0: i32, %arg1: i32, %arg2: i32) -> (i32, i32) {
    %c0_i32 = arith.constant 0 : i32
    return %arg0, %arg1 : i32, i32
  }
  func.func @transform_4(%arg0: i32, %arg1: i32, %arg2: i32) -> (i32, i32) {
    %c0_i32 = arith.constant 0 : i32
    return %arg0, %arg1 : i32, i32
  }
}

module attributes {stable_mosaic.version = 11 : i64} {
  func.func @_mm_kernel(%arg0: i32, %arg1: i32, %arg2: i32, %arg3: memref<32x256xbf16, #tpu.memory_space<vmem>>, %arg4: memref<256x128xbf16, #tpu.memory_space<vmem>>, %arg5: memref<1x128xf32, #tpu.memory_space<vmem>>, %arg6: memref<32x128xbf16, #tpu.memory_space<vmem>>, %arg7: memref<32x128xf32, #tpu.memory_space<vmem>>) attributes {dimension_semantics = [#tpu.dimension_semantics<parallel>, #tpu.dimension_semantics<parallel>, #tpu.dimension_semantics<arbitrary>], iteration_bounds = array<i64: 1, 1, 1>, scalar_prefetch = 0 : i64, scratch_operands = 1 : i64, tpu.core_type = #tpu.core_type<tc>, window_params = [{transform_indices = @transform_0, window_bounds = array<i64: 32, 256>}, {transform_indices = @transform_1, window_bounds = array<i64: 256, 128>}, {transform_indices = @transform_2, window_bounds = array<i64: 1, 128>}, {transform_indices = @transform_3, window_bounds = array<i64: 32, 128>}]} {
    %c0_i32 = arith.constant 0 : i32
    %0 = arith.cmpi eq, %arg2, %c0_i32 : i32
    %1 = arith.extui %0 : i1 to i32
    %c0_i32_0 = arith.constant 0 : i32
    %2 = arith.cmpi ne, %1, %c0_i32_0 : i32
    scf.if %2 {
      %cst_10 = arith.constant 0.000000e+00 : f32
      %12 = vector.broadcast %cst_10 : f32 to vector<32x128xf32>
      %c0_11 = arith.constant 0 : index
      %c0_12 = arith.constant 0 : index
      %13 = vector.load %arg7[%c0_11, %c0_12] : memref<32x128xf32, #tpu.memory_space<vmem>>, vector<32x128xf32>
      tpu.vector_store %arg7[%c0_11, %c0_12], %12 {strides = array<i32>} : memref<32x128xf32, #tpu.memory_space<vmem>>, vector<32x128xf32>,
    } else {
    }
    %c0 = arith.constant 0 : index
    %c0_1 = arith.constant 0 : index
    %3 = vector.load %arg7[%c0, %c0_1] : memref<32x128xf32, #tpu.memory_space<vmem>>, vector<32x128xf32>
    %c0_2 = arith.constant 0 : index
    %c0_3 = arith.constant 0 : index
    %4 = vector.load %arg3[%c0_2, %c0_3] : memref<32x256xbf16, #tpu.memory_space<vmem>>, vector<32x256xbf16>
    %c0_4 = arith.constant 0 : index
    %c0_5 = arith.constant 0 : index
    %5 = vector.load %arg4[%c0_4, %c0_5] : memref<256x128xbf16, #tpu.memory_space<vmem>>, vector<256x128xbf16>
    %cst = arith.constant dense<0.000000e+00> : vector<32x128xf32>
    %6 = tpu.matmul %4, %5, %cst {dimension_numbers = #tpu.dot_dimension_numbers<[1], [0], [0], [1], [0, 0, 1, 1], [], []>} : vector<32x256xbf16>, vector<256x128xbf16>, vector<32x128xf32> -> vector<32x128xf32>
    %7 = arith.addf %3, %6 : vector<32x128xf32>
    %c0_6 = arith.constant 0 : index
    %c0_7 = arith.constant 0 : index
    %8 = vector.load %arg7[%c0_6, %c0_7] : memref<32x128xf32, #tpu.memory_space<vmem>>, vector<32x128xf32>
    tpu.vector_store %arg7[%c0_6, %c0_7], %7 {strides = array<i32>} : memref<32x128xf32, #tpu.memory_space<vmem>>, vector<32x128xf32>,
    %c0_i32_8 = arith.constant 0 : i32
    %9 = arith.cmpi eq, %arg2, %c0_i32_8 : i32
    %10 = arith.extui %9 : i1 to i32
    %c0_i32_9 = arith.constant 0 : i32
    %11 = arith.cmpi ne, %10, %c0_i32_9 : i32
    scf.if %11 {
      %c0_10 = arith.constant 0 : index
      %c0_11 = arith.constant 0 : index
      %12 = vector.load %arg7[%c0_10, %c0_11] : memref<32x128xf32, #tpu.memory_space<vmem>>, vector<32x128xf32>
      %c0_12 = arith.constant 0 : index
      %c0_13 = arith.constant 0 : index
      %13 = vector.load %arg5[%c0_12, %c0_13] : memref<1x128xf32, #tpu.memory_space<vmem>>, vector<1x128xf32>
      %14 = vector.broadcast %13 : vector<1x128xf32> to vector<32x128xf32>
      %15 = arith.addf %12, %14 : vector<32x128xf32>
      %cst_14 = arith.constant 0.000000e+00 : f32
      %16 = vector.broadcast %cst_14 : f32 to vector<32x128xf32>
      %17 = arith.maximumf %15, %16 : vector<32x128xf32>
      %18 = arith.truncf %17 : vector<32x128xf32> to vector<32x128xbf16>
      %c0_15 = arith.constant 0 : index
      %c0_16 = arith.constant 0 : index
      %19 = vector.load %arg6[%c0_15, %c0_16] : memref<32x128xbf16, #tpu.memory_space<vmem>>, vector<32x128xbf16>
      tpu.vector_store %arg6[%c0_15, %c0_16], %18 {strides = array<i32>} : memref<32x128xbf16, #tpu.memory_space<vmem>>, vector<32x128xbf16>,
    } else {
    }
    return
  }
  func.func @transform_0(%arg0: i32, %arg1: i32, %arg2: i32) -> (i32, i32) {
    %c0_i32 = arith.constant 0 : i32
    return %arg0, %arg2 : i32, i32
  }
  func.func @transform_1(%arg0: i32, %arg1: i32, %arg2: i32) -> (i32, i32) {
    %c0_i32 = arith.constant 0 : i32
    return %arg2, %arg1 : i32, i32
  }
  func.func @transform_2(%arg0: i32, %arg1: i32, %arg2: i32) -> (i32, i32) {
    %c0_i32 = arith.constant 0 : i32
    %c0_i32_0 = arith.constant 0 : i32
    return %c0_i32, %arg1 : i32, i32
  }
  func.func @transform_3(%arg0: i32, %arg1: i32, %arg2: i32) -> (i32, i32) {
    %c0_i32 = arith.constant 0 : i32
    return %arg0, %arg1 : i32, i32
  }
}

module attributes {stable_mosaic.version = 11 : i64} {
  func.func @_mm_kernel(%arg0: i32, %arg1: i32, %arg2: i32, %arg3: memref<32x128xbf16, #tpu.memory_space<vmem>>, %arg4: memref<128x128xbf16, #tpu.memory_space<vmem>>, %arg5: memref<1x128xf32, #tpu.memory_space<vmem>>, %arg6: memref<32x128xbf16, #tpu.memory_space<vmem>>, %arg7: memref<32x128xf32, #tpu.memory_space<vmem>>) attributes {dimension_semantics = [#tpu.dimension_semantics<parallel>, #tpu.dimension_semantics<parallel>, #tpu.dimension_semantics<arbitrary>], iteration_bounds = array<i64: 1, 1, 1>, scalar_prefetch = 0 : i64, scratch_operands = 1 : i64, tpu.core_type = #tpu.core_type<tc>, window_params = [{transform_indices = @transform_0, window_bounds = array<i64: 32, 128>}, {transform_indices = @transform_1, window_bounds = array<i64: 128, 128>}, {transform_indices = @transform_2, window_bounds = array<i64: 1, 128>}, {transform_indices = @transform_3, window_bounds = array<i64: 32, 128>}]} {
    %c0_i32 = arith.constant 0 : i32
    %0 = arith.cmpi eq, %arg2, %c0_i32 : i32
    %1 = arith.extui %0 : i1 to i32
    %c0_i32_0 = arith.constant 0 : i32
    %2 = arith.cmpi ne, %1, %c0_i32_0 : i32
    scf.if %2 {
      %cst_10 = arith.constant 0.000000e+00 : f32
      %12 = vector.broadcast %cst_10 : f32 to vector<32x128xf32>
      %c0_11 = arith.constant 0 : index
      %c0_12 = arith.constant 0 : index
      %13 = vector.load %arg7[%c0_11, %c0_12] : memref<32x128xf32, #tpu.memory_space<vmem>>, vector<32x128xf32>
      tpu.vector_store %arg7[%c0_11, %c0_12], %12 {strides = array<i32>} : memref<32x128xf32, #tpu.memory_space<vmem>>, vector<32x128xf32>,
    } else {
    }
    %c0 = arith.constant 0 : index
    %c0_1 = arith.constant 0 : index
    %3 = vector.load %arg7[%c0, %c0_1] : memref<32x128xf32, #tpu.memory_space<vmem>>, vector<32x128xf32>
    %c0_2 = arith.constant 0 : index
    %c0_3 = arith.constant 0 : index
    %4 = vector.load %arg3[%c0_2, %c0_3] : memref<32x128xbf16, #tpu.memory_space<vmem>>, vector<32x128xbf16>
    %c0_4 = arith.constant 0 : index
    %c0_5 = arith.constant 0 : index
    %5 = vector.load %arg4[%c0_4, %c0_5] : memref<128x128xbf16, #tpu.memory_space<vmem>>, vector<128x128xbf16>
    %cst = arith.constant dense<0.000000e+00> : vector<32x128xf32>
    %6 = tpu.matmul %4, %5, %cst {dimension_numbers = #tpu.dot_dimension_numbers<[1], [0], [0], [1], [0, 0, 1, 1], [], []>} : vector<32x128xbf16>, vector<128x128xbf16>, vector<32x128xf32> -> vector<32x128xf32>
    %7 = arith.addf %3, %6 : vector<32x128xf32>
    %c0_6 = arith.constant 0 : index
    %c0_7 = arith.constant 0 : index
    %8 = vector.load %arg7[%c0_6, %c0_7] : memref<32x128xf32, #tpu.memory_space<vmem>>, vector<32x128xf32>
    tpu.vector_store %arg7[%c0_6, %c0_7], %7 {strides = array<i32>} : memref<32x128xf32, #tpu.memory_space<vmem>>, vector<32x128xf32>,
    %c0_i32_8 = arith.constant 0 : i32
    %9 = arith.cmpi eq, %arg2, %c0_i32_8 : i32
    %10 = arith.extui %9 : i1 to i32
    %c0_i32_9 = arith.constant 0 : i32
    %11 = arith.cmpi ne, %10, %c0_i32_9 : i32
    scf.if %11 {
      %c0_10 = arith.constant 0 : index
      %c0_11 = arith.constant 0 : index
      %12 = vector.load %arg7[%c0_10, %c0_11] : memref<32x128xf32, #tpu.memory_space<vmem>>, vector<32x128xf32>
      %c0_12 = arith.constant 0 : index
      %c0_13 = arith.constant 0 : index
      %13 = vector.load %arg5[%c0_12, %c0_13] : memref<1x128xf32, #tpu.memory_space<vmem>>, vector<1x128xf32>
      %14 = vector.broadcast %13 : vector<1x128xf32> to vector<32x128xf32>
      %15 = arith.addf %12, %14 : vector<32x128xf32>
      %16 = arith.truncf %15 : vector<32x128xf32> to vector<32x128xbf16>
      %c0_14 = arith.constant 0 : index
      %c0_15 = arith.constant 0 : index
      %17 = vector.load %arg6[%c0_14, %c0_15] : memref<32x128xbf16, #tpu.memory_space<vmem>>, vector<32x128xbf16>
      tpu.vector_store %arg6[%c0_14, %c0_15], %16 {strides = array<i32>} : memref<32x128xbf16, #tpu.memory_space<vmem>>, vector<32x128xbf16>,
    } else {
    }
    return
  }
  func.func @transform_0(%arg0: i32, %arg1: i32, %arg2: i32) -> (i32, i32) {
    %c0_i32 = arith.constant 0 : i32
    return %arg0, %arg2 : i32, i32
  }
  func.func @transform_1(%arg0: i32, %arg1: i32, %arg2: i32) -> (i32, i32) {
    %c0_i32 = arith.constant 0 : i32
    return %arg2, %arg1 : i32, i32
  }
  func.func @transform_2(%arg0: i32, %arg1: i32, %arg2: i32) -> (i32, i32) {
    %c0_i32 = arith.constant 0 : i32
    %c0_i32_0 = arith.constant 0 : i32
    return %c0_i32, %arg1 : i32, i32
  }
  func.func @transform_3(%arg0: i32, %arg1: i32, %arg2: i32) -> (i32, i32) {
    %c0_i32 = arith.constant 0 : i32
    return %arg0, %arg1 : i32, i32
  }
}

module attributes {stable_mosaic.version = 11 : i64} {
  func.func @_mm_res_kernel(%arg0: i32, %arg1: i32, %arg2: i32, %arg3: memref<32x128xbf16, #tpu.memory_space<vmem>>, %arg4: memref<128x128xbf16, #tpu.memory_space<vmem>>, %arg5: memref<1x128xf32, #tpu.memory_space<vmem>>, %arg6: memref<32x128xbf16, #tpu.memory_space<vmem>>, %arg7: memref<32x128xbf16, #tpu.memory_space<vmem>>, %arg8: memref<32x128xf32, #tpu.memory_space<vmem>>) attributes {dimension_semantics = [#tpu.dimension_semantics<parallel>, #tpu.dimension_semantics<parallel>, #tpu.dimension_semantics<arbitrary>], iteration_bounds = array<i64: 1, 1, 1>, scalar_prefetch = 0 : i64, scratch_operands = 1 : i64, tpu.core_type = #tpu.core_type<tc>, window_params = [{transform_indices = @transform_0, window_bounds = array<i64: 32, 128>}, {transform_indices = @transform_1, window_bounds = array<i64: 128, 128>}, {transform_indices = @transform_2, window_bounds = array<i64: 1, 128>}, {transform_indices = @transform_3, window_bounds = array<i64: 32, 128>}, {transform_indices = @transform_4, window_bounds = array<i64: 32, 128>}]} {
    %c0_i32 = arith.constant 0 : i32
    %0 = arith.cmpi eq, %arg2, %c0_i32 : i32
    %1 = arith.extui %0 : i1 to i32
    %c0_i32_0 = arith.constant 0 : i32
    %2 = arith.cmpi ne, %1, %c0_i32_0 : i32
    scf.if %2 {
      %cst_10 = arith.constant 0.000000e+00 : f32
      %12 = vector.broadcast %cst_10 : f32 to vector<32x128xf32>
      %c0_11 = arith.constant 0 : index
      %c0_12 = arith.constant 0 : index
      %13 = vector.load %arg8[%c0_11, %c0_12] : memref<32x128xf32, #tpu.memory_space<vmem>>, vector<32x128xf32>
      tpu.vector_store %arg8[%c0_11, %c0_12], %12 {strides = array<i32>} : memref<32x128xf32, #tpu.memory_space<vmem>>, vector<32x128xf32>,
    } else {
    }
    %c0 = arith.constant 0 : index
    %c0_1 = arith.constant 0 : index
    %3 = vector.load %arg8[%c0, %c0_1] : memref<32x128xf32, #tpu.memory_space<vmem>>, vector<32x128xf32>
    %c0_2 = arith.constant 0 : index
    %c0_3 = arith.constant 0 : index
    %4 = vector.load %arg3[%c0_2, %c0_3] : memref<32x128xbf16, #tpu.memory_space<vmem>>, vector<32x128xbf16>
    %c0_4 = arith.constant 0 : index
    %c0_5 = arith.constant 0 : index
    %5 = vector.load %arg4[%c0_4, %c0_5] : memref<128x128xbf16, #tpu.memory_space<vmem>>, vector<128x128xbf16>
    %cst = arith.constant dense<0.000000e+00> : vector<32x128xf32>
    %6 = tpu.matmul %4, %5, %cst {dimension_numbers = #tpu.dot_dimension_numbers<[1], [0], [0], [1], [0, 0, 1, 1], [], []>} : vector<32x128xbf16>, vector<128x128xbf16>, vector<32x128xf32> -> vector<32x128xf32>
    %7 = arith.addf %3, %6 : vector<32x128xf32>
    %c0_6 = arith.constant 0 : index
    %c0_7 = arith.constant 0 : index
    %8 = vector.load %arg8[%c0_6, %c0_7] : memref<32x128xf32, #tpu.memory_space<vmem>>, vector<32x128xf32>
    tpu.vector_store %arg8[%c0_6, %c0_7], %7 {strides = array<i32>} : memref<32x128xf32, #tpu.memory_space<vmem>>, vector<32x128xf32>,
    %c0_i32_8 = arith.constant 0 : i32
    %9 = arith.cmpi eq, %arg2, %c0_i32_8 : i32
    %10 = arith.extui %9 : i1 to i32
    %c0_i32_9 = arith.constant 0 : i32
    %11 = arith.cmpi ne, %10, %c0_i32_9 : i32
    scf.if %11 {
      %c0_10 = arith.constant 0 : index
      %c0_11 = arith.constant 0 : index
      %12 = vector.load %arg8[%c0_10, %c0_11] : memref<32x128xf32, #tpu.memory_space<vmem>>, vector<32x128xf32>
      %c0_12 = arith.constant 0 : index
      %c0_13 = arith.constant 0 : index
      %13 = vector.load %arg5[%c0_12, %c0_13] : memref<1x128xf32, #tpu.memory_space<vmem>>, vector<1x128xf32>
      %14 = vector.broadcast %13 : vector<1x128xf32> to vector<32x128xf32>
      %15 = arith.addf %12, %14 : vector<32x128xf32>
      %c0_14 = arith.constant 0 : index
      %c0_15 = arith.constant 0 : index
      %16 = vector.load %arg6[%c0_14, %c0_15] : memref<32x128xbf16, #tpu.memory_space<vmem>>, vector<32x128xbf16>
      %17 = arith.extf %16 : vector<32x128xbf16> to vector<32x128xf32>
      %18 = arith.addf %15, %17 : vector<32x128xf32>
      %cst_16 = arith.constant 0.000000e+00 : f32
      %19 = vector.broadcast %cst_16 : f32 to vector<32x128xf32>
      %20 = arith.maximumf %18, %19 : vector<32x128xf32>
      %21 = arith.truncf %20 : vector<32x128xf32> to vector<32x128xbf16>
      %c0_17 = arith.constant 0 : index
      %c0_18 = arith.constant 0 : index
      %22 = vector.load %arg7[%c0_17, %c0_18] : memref<32x128xbf16, #tpu.memory_space<vmem>>, vector<32x128xbf16>
      tpu.vector_store %arg7[%c0_17, %c0_18], %21 {strides = array<i32>} : memref<32x128xbf16, #tpu.memory_space<vmem>>, vector<32x128xbf16>,
    } else {
    }
    return
  }
  func.func @transform_0(%arg0: i32, %arg1: i32, %arg2: i32) -> (i32, i32) {
    %c0_i32 = arith.constant 0 : i32
    return %arg0, %arg2 : i32, i32
  }
  func.func @transform_1(%arg0: i32, %arg1: i32, %arg2: i32) -> (i32, i32) {
    %c0_i32 = arith.constant 0 : i32
    return %arg2, %arg1 : i32, i32
  }
  func.func @transform_2(%arg0: i32, %arg1: i32, %arg2: i32) -> (i32, i32) {
    %c0_i32 = arith.constant 0 : i32
    %c0_i32_0 = arith.constant 0 : i32
    return %c0_i32, %arg1 : i32, i32
  }
  func.func @transform_3(%arg0: i32, %arg1: i32, %arg2: i32) -> (i32, i32) {
    %c0_i32 = arith.constant 0 : i32
    return %arg0, %arg1 : i32, i32
  }
  func.func @transform_4(%arg0: i32, %arg1: i32, %arg2: i32) -> (i32, i32) {
    %c0_i32 = arith.constant 0 : i32
    return %arg0, %arg1 : i32, i32
  }
}

module attributes {stable_mosaic.version = 11 : i64} {
  func.func @_mm_kernel(%arg0: i32, %arg1: i32, %arg2: i32, %arg3: memref<32x128xbf16, #tpu.memory_space<vmem>>, %arg4: memref<128x128xbf16, #tpu.memory_space<vmem>>, %arg5: memref<1x128xf32, #tpu.memory_space<vmem>>, %arg6: memref<32x128xbf16, #tpu.memory_space<vmem>>, %arg7: memref<32x128xf32, #tpu.memory_space<vmem>>) attributes {dimension_semantics = [#tpu.dimension_semantics<parallel>, #tpu.dimension_semantics<parallel>, #tpu.dimension_semantics<arbitrary>], iteration_bounds = array<i64: 1, 1, 1>, scalar_prefetch = 0 : i64, scratch_operands = 1 : i64, tpu.core_type = #tpu.core_type<tc>, window_params = [{transform_indices = @transform_0, window_bounds = array<i64: 32, 128>}, {transform_indices = @transform_1, window_bounds = array<i64: 128, 128>}, {transform_indices = @transform_2, window_bounds = array<i64: 1, 128>}, {transform_indices = @transform_3, window_bounds = array<i64: 32, 128>}]} {
    %c0_i32 = arith.constant 0 : i32
    %0 = arith.cmpi eq, %arg2, %c0_i32 : i32
    %1 = arith.extui %0 : i1 to i32
    %c0_i32_0 = arith.constant 0 : i32
    %2 = arith.cmpi ne, %1, %c0_i32_0 : i32
    scf.if %2 {
      %cst_10 = arith.constant 0.000000e+00 : f32
      %12 = vector.broadcast %cst_10 : f32 to vector<32x128xf32>
      %c0_11 = arith.constant 0 : index
      %c0_12 = arith.constant 0 : index
      %13 = vector.load %arg7[%c0_11, %c0_12] : memref<32x128xf32, #tpu.memory_space<vmem>>, vector<32x128xf32>
      tpu.vector_store %arg7[%c0_11, %c0_12], %12 {strides = array<i32>} : memref<32x128xf32, #tpu.memory_space<vmem>>, vector<32x128xf32>,
    } else {
    }
    %c0 = arith.constant 0 : index
    %c0_1 = arith.constant 0 : index
    %3 = vector.load %arg7[%c0, %c0_1] : memref<32x128xf32, #tpu.memory_space<vmem>>, vector<32x128xf32>
    %c0_2 = arith.constant 0 : index
    %c0_3 = arith.constant 0 : index
    %4 = vector.load %arg3[%c0_2, %c0_3] : memref<32x128xbf16, #tpu.memory_space<vmem>>, vector<32x128xbf16>
    %c0_4 = arith.constant 0 : index
    %c0_5 = arith.constant 0 : index
    %5 = vector.load %arg4[%c0_4, %c0_5] : memref<128x128xbf16, #tpu.memory_space<vmem>>, vector<128x128xbf16>
    %cst = arith.constant dense<0.000000e+00> : vector<32x128xf32>
    %6 = tpu.matmul %4, %5, %cst {dimension_numbers = #tpu.dot_dimension_numbers<[1], [0], [0], [1], [0, 0, 1, 1], [], []>} : vector<32x128xbf16>, vector<128x128xbf16>, vector<32x128xf32> -> vector<32x128xf32>
    %7 = arith.addf %3, %6 : vector<32x128xf32>
    %c0_6 = arith.constant 0 : index
    %c0_7 = arith.constant 0 : index
    %8 = vector.load %arg7[%c0_6, %c0_7] : memref<32x128xf32, #tpu.memory_space<vmem>>, vector<32x128xf32>
    tpu.vector_store %arg7[%c0_6, %c0_7], %7 {strides = array<i32>} : memref<32x128xf32, #tpu.memory_space<vmem>>, vector<32x128xf32>,
    %c0_i32_8 = arith.constant 0 : i32
    %9 = arith.cmpi eq, %arg2, %c0_i32_8 : i32
    %10 = arith.extui %9 : i1 to i32
    %c0_i32_9 = arith.constant 0 : i32
    %11 = arith.cmpi ne, %10, %c0_i32_9 : i32
    scf.if %11 {
      %c0_10 = arith.constant 0 : index
      %c0_11 = arith.constant 0 : index
      %12 = vector.load %arg7[%c0_10, %c0_11] : memref<32x128xf32, #tpu.memory_space<vmem>>, vector<32x128xf32>
      %c0_12 = arith.constant 0 : index
      %c0_13 = arith.constant 0 : index
      %13 = vector.load %arg5[%c0_12, %c0_13] : memref<1x128xf32, #tpu.memory_space<vmem>>, vector<1x128xf32>
      %14 = vector.broadcast %13 : vector<1x128xf32> to vector<32x128xf32>
      %15 = arith.addf %12, %14 : vector<32x128xf32>
      %cst_14 = arith.constant 0.000000e+00 : f32
      %16 = vector.broadcast %cst_14 : f32 to vector<32x128xf32>
      %17 = arith.maximumf %15, %16 : vector<32x128xf32>
      %18 = arith.truncf %17 : vector<32x128xf32> to vector<32x128xbf16>
      %c0_15 = arith.constant 0 : index
      %c0_16 = arith.constant 0 : index
      %19 = vector.load %arg6[%c0_15, %c0_16] : memref<32x128xbf16, #tpu.memory_space<vmem>>, vector<32x128xbf16>
      tpu.vector_store %arg6[%c0_15, %c0_16], %18 {strides = array<i32>} : memref<32x128xbf16, #tpu.memory_space<vmem>>, vector<32x128xbf16>,
    } else {
    }
    return
  }
  func.func @transform_0(%arg0: i32, %arg1: i32, %arg2: i32) -> (i32, i32) {
    %c0_i32 = arith.constant 0 : i32
    return %arg0, %arg2 : i32, i32
  }
  func.func @transform_1(%arg0: i32, %arg1: i32, %arg2: i32) -> (i32, i32) {
    %c0_i32 = arith.constant 0 : i32
    return %arg2, %arg1 : i32, i32
  }
  func.func @transform_2(%arg0: i32, %arg1: i32, %arg2: i32) -> (i32, i32) {
    %c0_i32 = arith.constant 0 : i32
    %c0_i32_0 = arith.constant 0 : i32
    return %c0_i32, %arg1 : i32, i32
  }
  func.func @transform_3(%arg0: i32, %arg1: i32, %arg2: i32) -> (i32, i32) {
    %c0_i32 = arith.constant 0 : i32
    return %arg0, %arg1 : i32, i32
  }
}

module attributes {stable_mosaic.version = 11 : i64} {
  func.func @_mm_kernel(%arg0: i32, %arg1: i32, %arg2: i32, %arg3: memref<16x128xbf16, #tpu.memory_space<vmem>>, %arg4: memref<128x128xbf16, #tpu.memory_space<vmem>>, %arg5: memref<1x128xf32, #tpu.memory_space<vmem>>, %arg6: memref<16x128xbf16, #tpu.memory_space<vmem>>, %arg7: memref<16x128xf32, #tpu.memory_space<vmem>>) attributes {dimension_semantics = [#tpu.dimension_semantics<parallel>, #tpu.dimension_semantics<parallel>, #tpu.dimension_semantics<arbitrary>], iteration_bounds = array<i64: 1, 1, 3>, scalar_prefetch = 0 : i64, scratch_operands = 1 : i64, tpu.core_type = #tpu.core_type<tc>, window_params = [{transform_indices = @transform_0, window_bounds = array<i64: 16, 128>}, {transform_indices = @transform_1, window_bounds = array<i64: 128, 128>}, {transform_indices = @transform_2, window_bounds = array<i64: 1, 128>}, {transform_indices = @transform_3, window_bounds = array<i64: 16, 128>}]} {
    %c0_i32 = arith.constant 0 : i32
    %0 = arith.cmpi eq, %arg2, %c0_i32 : i32
    %1 = arith.extui %0 : i1 to i32
    %c0_i32_0 = arith.constant 0 : i32
    %2 = arith.cmpi ne, %1, %c0_i32_0 : i32
    scf.if %2 {
      %cst_9 = arith.constant 0.000000e+00 : f32
      %12 = vector.broadcast %cst_9 : f32 to vector<16x128xf32>
      %c0_10 = arith.constant 0 : index
      %c0_11 = arith.constant 0 : index
      %13 = vector.load %arg7[%c0_10, %c0_11] : memref<16x128xf32, #tpu.memory_space<vmem>>, vector<16x128xf32>
      tpu.vector_store %arg7[%c0_10, %c0_11], %12 {strides = array<i32>} : memref<16x128xf32, #tpu.memory_space<vmem>>, vector<16x128xf32>,
    } else {
    }
    %c0 = arith.constant 0 : index
    %c0_1 = arith.constant 0 : index
    %3 = vector.load %arg7[%c0, %c0_1] : memref<16x128xf32, #tpu.memory_space<vmem>>, vector<16x128xf32>
    %c0_2 = arith.constant 0 : index
    %c0_3 = arith.constant 0 : index
    %4 = vector.load %arg3[%c0_2, %c0_3] : memref<16x128xbf16, #tpu.memory_space<vmem>>, vector<16x128xbf16>
    %c0_4 = arith.constant 0 : index
    %c0_5 = arith.constant 0 : index
    %5 = vector.load %arg4[%c0_4, %c0_5] : memref<128x128xbf16, #tpu.memory_space<vmem>>, vector<128x128xbf16>
    %cst = arith.constant dense<0.000000e+00> : vector<16x128xf32>
    %6 = tpu.matmul %4, %5, %cst {dimension_numbers = #tpu.dot_dimension_numbers<[1], [0], [0], [1], [0, 0, 1, 1], [], []>} : vector<16x128xbf16>, vector<128x128xbf16>, vector<16x128xf32> -> vector<16x128xf32>
    %7 = arith.addf %3, %6 : vector<16x128xf32>
    %c0_6 = arith.constant 0 : index
    %c0_7 = arith.constant 0 : index
    %8 = vector.load %arg7[%c0_6, %c0_7] : memref<16x128xf32, #tpu.memory_space<vmem>>, vector<16x128xf32>
    tpu.vector_store %arg7[%c0_6, %c0_7], %7 {strides = array<i32>} : memref<16x128xf32, #tpu.memory_space<vmem>>, vector<16x128xf32>,
    %c2_i32 = arith.constant 2 : i32
    %9 = arith.cmpi eq, %arg2, %c2_i32 : i32
    %10 = arith.extui %9 : i1 to i32
    %c0_i32_8 = arith.constant 0 : i32
    %11 = arith.cmpi ne, %10, %c0_i32_8 : i32
    scf.if %11 {
      %c0_9 = arith.constant 0 : index
      %c0_10 = arith.constant 0 : index
      %12 = vector.load %arg7[%c0_9, %c0_10] : memref<16x128xf32, #tpu.memory_space<vmem>>, vector<16x128xf32>
      %c0_11 = arith.constant 0 : index
      %c0_12 = arith.constant 0 : index
      %13 = vector.load %arg5[%c0_11, %c0_12] : memref<1x128xf32, #tpu.memory_space<vmem>>, vector<1x128xf32>
      %14 = vector.broadcast %13 : vector<1x128xf32> to vector<16x128xf32>
      %15 = arith.addf %12, %14 : vector<16x128xf32>
      %cst_13 = arith.constant 0.000000e+00 : f32
      %16 = vector.broadcast %cst_13 : f32 to vector<16x128xf32>
      %17 = arith.maximumf %15, %16 : vector<16x128xf32>
      %18 = arith.truncf %17 : vector<16x128xf32> to vector<16x128xbf16>
      %c0_14 = arith.constant 0 : index
      %c0_15 = arith.constant 0 : index
      %19 = vector.load %arg6[%c0_14, %c0_15] : memref<16x128xbf16, #tpu.memory_space<vmem>>, vector<16x128xbf16>
      tpu.vector_store %arg6[%c0_14, %c0_15], %18 {strides = array<i32>} : memref<16x128xbf16, #tpu.memory_space<vmem>>, vector<16x128xbf16>,
    } else {
    }
    return
  }
  func.func @transform_0(%arg0: i32, %arg1: i32, %arg2: i32) -> (i32, i32) {
    %c0_i32 = arith.constant 0 : i32
    return %arg0, %arg2 : i32, i32
  }
  func.func @transform_1(%arg0: i32, %arg1: i32, %arg2: i32) -> (i32, i32) {
    %c0_i32 = arith.constant 0 : i32
    return %arg2, %arg1 : i32, i32
  }
  func.func @transform_2(%arg0: i32, %arg1: i32, %arg2: i32) -> (i32, i32) {
    %c0_i32 = arith.constant 0 : i32
    %c0_i32_0 = arith.constant 0 : i32
    return %c0_i32, %arg1 : i32, i32
  }
  func.func @transform_3(%arg0: i32, %arg1: i32, %arg2: i32) -> (i32, i32) {
    %c0_i32 = arith.constant 0 : i32
    return %arg0, %arg1 : i32, i32
  }
}

module attributes {stable_mosaic.version = 11 : i64} {
  func.func @_mm_kernel(%arg0: i32, %arg1: i32, %arg2: i32, %arg3: memref<16x128xbf16, #tpu.memory_space<vmem>>, %arg4: memref<128x128xbf16, #tpu.memory_space<vmem>>, %arg5: memref<1x128xf32, #tpu.memory_space<vmem>>, %arg6: memref<16x128xbf16, #tpu.memory_space<vmem>>, %arg7: memref<16x128xf32, #tpu.memory_space<vmem>>) attributes {dimension_semantics = [#tpu.dimension_semantics<parallel>, #tpu.dimension_semantics<parallel>, #tpu.dimension_semantics<arbitrary>], iteration_bounds = array<i64: 1, 1, 1>, scalar_prefetch = 0 : i64, scratch_operands = 1 : i64, tpu.core_type = #tpu.core_type<tc>, window_params = [{transform_indices = @transform_0, window_bounds = array<i64: 16, 128>}, {transform_indices = @transform_1, window_bounds = array<i64: 128, 128>}, {transform_indices = @transform_2, window_bounds = array<i64: 1, 128>}, {transform_indices = @transform_3, window_bounds = array<i64: 16, 128>}]} {
    %c0_i32 = arith.constant 0 : i32
    %0 = arith.cmpi eq, %arg2, %c0_i32 : i32
    %1 = arith.extui %0 : i1 to i32
    %c0_i32_0 = arith.constant 0 : i32
    %2 = arith.cmpi ne, %1, %c0_i32_0 : i32
    scf.if %2 {
      %cst_10 = arith.constant 0.000000e+00 : f32
      %12 = vector.broadcast %cst_10 : f32 to vector<16x128xf32>
      %c0_11 = arith.constant 0 : index
      %c0_12 = arith.constant 0 : index
      %13 = vector.load %arg7[%c0_11, %c0_12] : memref<16x128xf32, #tpu.memory_space<vmem>>, vector<16x128xf32>
      tpu.vector_store %arg7[%c0_11, %c0_12], %12 {strides = array<i32>} : memref<16x128xf32, #tpu.memory_space<vmem>>, vector<16x128xf32>,
    } else {
    }
    %c0 = arith.constant 0 : index
    %c0_1 = arith.constant 0 : index
    %3 = vector.load %arg7[%c0, %c0_1] : memref<16x128xf32, #tpu.memory_space<vmem>>, vector<16x128xf32>
    %c0_2 = arith.constant 0 : index
    %c0_3 = arith.constant 0 : index
    %4 = vector.load %arg3[%c0_2, %c0_3] : memref<16x128xbf16, #tpu.memory_space<vmem>>, vector<16x128xbf16>
    %c0_4 = arith.constant 0 : index
    %c0_5 = arith.constant 0 : index
    %5 = vector.load %arg4[%c0_4, %c0_5] : memref<128x128xbf16, #tpu.memory_space<vmem>>, vector<128x128xbf16>
    %cst = arith.constant dense<0.000000e+00> : vector<16x128xf32>
    %6 = tpu.matmul %4, %5, %cst {dimension_numbers = #tpu.dot_dimension_numbers<[1], [0], [0], [1], [0, 0, 1, 1], [], []>} : vector<16x128xbf16>, vector<128x128xbf16>, vector<16x128xf32> -> vector<16x128xf32>
    %7 = arith.addf %3, %6 : vector<16x128xf32>
    %c0_6 = arith.constant 0 : index
    %c0_7 = arith.constant 0 : index
    %8 = vector.load %arg7[%c0_6, %c0_7] : memref<16x128xf32, #tpu.memory_space<vmem>>, vector<16x128xf32>
    tpu.vector_store %arg7[%c0_6, %c0_7], %7 {strides = array<i32>} : memref<16x128xf32, #tpu.memory_space<vmem>>, vector<16x128xf32>,
    %c0_i32_8 = arith.constant 0 : i32
    %9 = arith.cmpi eq, %arg2, %c0_i32_8 : i32
    %10 = arith.extui %9 : i1 to i32
    %c0_i32_9 = arith.constant 0 : i32
    %11 = arith.cmpi ne, %10, %c0_i32_9 : i32
    scf.if %11 {
      %c0_10 = arith.constant 0 : index
      %c0_11 = arith.constant 0 : index
      %12 = vector.load %arg7[%c0_10, %c0_11] : memref<16x128xf32, #tpu.memory_space<vmem>>, vector<16x128xf32>
      %c0_12 = arith.constant 0 : index
      %c0_13 = arith.constant 0 : index
      %13 = vector.load %arg5[%c0_12, %c0_13] : memref<1x128xf32, #tpu.memory_space<vmem>>, vector<1x128xf32>
      %14 = vector.broadcast %13 : vector<1x128xf32> to vector<16x128xf32>
      %15 = arith.addf %12, %14 : vector<16x128xf32>
      %16 = arith.truncf %15 : vector<16x128xf32> to vector<16x128xbf16>
      %c0_14 = arith.constant 0 : index
      %c0_15 = arith.constant 0 : index
      %17 = vector.load %arg6[%c0_14, %c0_15] : memref<16x128xbf16, #tpu.memory_space<vmem>>, vector<16x128xbf16>
      tpu.vector_store %arg6[%c0_14, %c0_15], %16 {strides = array<i32>} : memref<16x128xbf16, #tpu.memory_space<vmem>>, vector<16x128xbf16>,
    } else {
    }
    return
  }
  func.func @transform_0(%arg0: i32, %arg1: i32, %arg2: i32) -> (i32, i32) {
    %c0_i32 = arith.constant 0 : i32
    return %arg0, %arg2 : i32, i32
  }
  func.func @transform_1(%arg0: i32, %arg1: i32, %arg2: i32) -> (i32, i32) {
    %c0_i32 = arith.constant 0 : i32
    return %arg2, %arg1 : i32, i32
  }
  func.func @transform_2(%arg0: i32, %arg1: i32, %arg2: i32) -> (i32, i32) {
    %c0_i32 = arith.constant 0 : i32
    %c0_i32_0 = arith.constant 0 : i32
    return %c0_i32, %arg1 : i32, i32
  }
  func.func @transform_3(%arg0: i32, %arg1: i32, %arg2: i32) -> (i32, i32) {
    %c0_i32 = arith.constant 0 : i32
    return %arg0, %arg1 : i32, i32
  }
}

module attributes {stable_mosaic.version = 11 : i64} {
  func.func @_mm_res_kernel(%arg0: i32, %arg1: i32, %arg2: i32, %arg3: memref<16x128xbf16, #tpu.memory_space<vmem>>, %arg4: memref<128x128xbf16, #tpu.memory_space<vmem>>, %arg5: memref<1x128xf32, #tpu.memory_space<vmem>>, %arg6: memref<16x128xbf16, #tpu.memory_space<vmem>>, %arg7: memref<16x128xbf16, #tpu.memory_space<vmem>>, %arg8: memref<16x128xf32, #tpu.memory_space<vmem>>) attributes {dimension_semantics = [#tpu.dimension_semantics<parallel>, #tpu.dimension_semantics<parallel>, #tpu.dimension_semantics<arbitrary>], iteration_bounds = array<i64: 1, 1, 1>, scalar_prefetch = 0 : i64, scratch_operands = 1 : i64, tpu.core_type = #tpu.core_type<tc>, window_params = [{transform_indices = @transform_0, window_bounds = array<i64: 16, 128>}, {transform_indices = @transform_1, window_bounds = array<i64: 128, 128>}, {transform_indices = @transform_2, window_bounds = array<i64: 1, 128>}, {transform_indices = @transform_3, window_bounds = array<i64: 16, 128>}, {transform_indices = @transform_4, window_bounds = array<i64: 16, 128>}]} {
    %c0_i32 = arith.constant 0 : i32
    %0 = arith.cmpi eq, %arg2, %c0_i32 : i32
    %1 = arith.extui %0 : i1 to i32
    %c0_i32_0 = arith.constant 0 : i32
    %2 = arith.cmpi ne, %1, %c0_i32_0 : i32
    scf.if %2 {
      %cst_10 = arith.constant 0.000000e+00 : f32
      %12 = vector.broadcast %cst_10 : f32 to vector<16x128xf32>
      %c0_11 = arith.constant 0 : index
      %c0_12 = arith.constant 0 : index
      %13 = vector.load %arg8[%c0_11, %c0_12] : memref<16x128xf32, #tpu.memory_space<vmem>>, vector<16x128xf32>
      tpu.vector_store %arg8[%c0_11, %c0_12], %12 {strides = array<i32>} : memref<16x128xf32, #tpu.memory_space<vmem>>, vector<16x128xf32>,
    } else {
    }
    %c0 = arith.constant 0 : index
    %c0_1 = arith.constant 0 : index
    %3 = vector.load %arg8[%c0, %c0_1] : memref<16x128xf32, #tpu.memory_space<vmem>>, vector<16x128xf32>
    %c0_2 = arith.constant 0 : index
    %c0_3 = arith.constant 0 : index
    %4 = vector.load %arg3[%c0_2, %c0_3] : memref<16x128xbf16, #tpu.memory_space<vmem>>, vector<16x128xbf16>
    %c0_4 = arith.constant 0 : index
    %c0_5 = arith.constant 0 : index
    %5 = vector.load %arg4[%c0_4, %c0_5] : memref<128x128xbf16, #tpu.memory_space<vmem>>, vector<128x128xbf16>
    %cst = arith.constant dense<0.000000e+00> : vector<16x128xf32>
    %6 = tpu.matmul %4, %5, %cst {dimension_numbers = #tpu.dot_dimension_numbers<[1], [0], [0], [1], [0, 0, 1, 1], [], []>} : vector<16x128xbf16>, vector<128x128xbf16>, vector<16x128xf32> -> vector<16x128xf32>
    %7 = arith.addf %3, %6 : vector<16x128xf32>
    %c0_6 = arith.constant 0 : index
    %c0_7 = arith.constant 0 : index
    %8 = vector.load %arg8[%c0_6, %c0_7] : memref<16x128xf32, #tpu.memory_space<vmem>>, vector<16x128xf32>
    tpu.vector_store %arg8[%c0_6, %c0_7], %7 {strides = array<i32>} : memref<16x128xf32, #tpu.memory_space<vmem>>, vector<16x128xf32>,
    %c0_i32_8 = arith.constant 0 : i32
    %9 = arith.cmpi eq, %arg2, %c0_i32_8 : i32
    %10 = arith.extui %9 : i1 to i32
    %c0_i32_9 = arith.constant 0 : i32
    %11 = arith.cmpi ne, %10, %c0_i32_9 : i32
    scf.if %11 {
      %c0_10 = arith.constant 0 : index
      %c0_11 = arith.constant 0 : index
      %12 = vector.load %arg8[%c0_10, %c0_11] : memref<16x128xf32, #tpu.memory_space<vmem>>, vector<16x128xf32>
      %c0_12 = arith.constant 0 : index
      %c0_13 = arith.constant 0 : index
      %13 = vector.load %arg5[%c0_12, %c0_13] : memref<1x128xf32, #tpu.memory_space<vmem>>, vector<1x128xf32>
      %14 = vector.broadcast %13 : vector<1x128xf32> to vector<16x128xf32>
      %15 = arith.addf %12, %14 : vector<16x128xf32>
      %c0_14 = arith.constant 0 : index
      %c0_15 = arith.constant 0 : index
      %16 = vector.load %arg6[%c0_14, %c0_15] : memref<16x128xbf16, #tpu.memory_space<vmem>>, vector<16x128xbf16>
      %17 = arith.extf %16 : vector<16x128xbf16> to vector<16x128xf32>
      %18 = arith.addf %15, %17 : vector<16x128xf32>
      %cst_16 = arith.constant 0.000000e+00 : f32
      %19 = vector.broadcast %cst_16 : f32 to vector<16x128xf32>
      %20 = arith.maximumf %18, %19 : vector<16x128xf32>
      %21 = arith.truncf %20 : vector<16x128xf32> to vector<16x128xbf16>
      %c0_17 = arith.constant 0 : index
      %c0_18 = arith.constant 0 : index
      %22 = vector.load %arg7[%c0_17, %c0_18] : memref<16x128xbf16, #tpu.memory_space<vmem>>, vector<16x128xbf16>
      tpu.vector_store %arg7[%c0_17, %c0_18], %21 {strides = array<i32>} : memref<16x128xbf16, #tpu.memory_space<vmem>>, vector<16x128xbf16>,
    } else {
    }
    return
  }
  func.func @transform_0(%arg0: i32, %arg1: i32, %arg2: i32) -> (i32, i32) {
    %c0_i32 = arith.constant 0 : i32
    return %arg0, %arg2 : i32, i32
  }
  func.func @transform_1(%arg0: i32, %arg1: i32, %arg2: i32) -> (i32, i32) {
    %c0_i32 = arith.constant 0 : i32
    return %arg2, %arg1 : i32, i32
  }
  func.func @transform_2(%arg0: i32, %arg1: i32, %arg2: i32) -> (i32, i32) {
    %c0_i32 = arith.constant 0 : i32
    %c0_i32_0 = arith.constant 0 : i32
    return %c0_i32, %arg1 : i32, i32
  }
  func.func @transform_3(%arg0: i32, %arg1: i32, %arg2: i32) -> (i32, i32) {
    %c0_i32 = arith.constant 0 : i32
    return %arg0, %arg1 : i32, i32
  }
  func.func @transform_4(%arg0: i32, %arg1: i32, %arg2: i32) -> (i32, i32) {
    %c0_i32 = arith.constant 0 : i32
    return %arg0, %arg1 : i32, i32
  }
}

module attributes {stable_mosaic.version = 11 : i64} {
  func.func @_mm_kernel(%arg0: i32, %arg1: i32, %arg2: i32, %arg3: memref<16x128xbf16, #tpu.memory_space<vmem>>, %arg4: memref<128x128xbf16, #tpu.memory_space<vmem>>, %arg5: memref<1x128xf32, #tpu.memory_space<vmem>>, %arg6: memref<16x128xbf16, #tpu.memory_space<vmem>>, %arg7: memref<16x128xf32, #tpu.memory_space<vmem>>) attributes {dimension_semantics = [#tpu.dimension_semantics<parallel>, #tpu.dimension_semantics<parallel>, #tpu.dimension_semantics<arbitrary>], iteration_bounds = array<i64: 1, 1, 1>, scalar_prefetch = 0 : i64, scratch_operands = 1 : i64, tpu.core_type = #tpu.core_type<tc>, window_params = [{transform_indices = @transform_0, window_bounds = array<i64: 16, 128>}, {transform_indices = @transform_1, window_bounds = array<i64: 128, 128>}, {transform_indices = @transform_2, window_bounds = array<i64: 1, 128>}, {transform_indices = @transform_3, window_bounds = array<i64: 16, 128>}]} {
    %c0_i32 = arith.constant 0 : i32
    %0 = arith.cmpi eq, %arg2, %c0_i32 : i32
    %1 = arith.extui %0 : i1 to i32
    %c0_i32_0 = arith.constant 0 : i32
    %2 = arith.cmpi ne, %1, %c0_i32_0 : i32
    scf.if %2 {
      %cst_10 = arith.constant 0.000000e+00 : f32
      %12 = vector.broadcast %cst_10 : f32 to vector<16x128xf32>
      %c0_11 = arith.constant 0 : index
      %c0_12 = arith.constant 0 : index
      %13 = vector.load %arg7[%c0_11, %c0_12] : memref<16x128xf32, #tpu.memory_space<vmem>>, vector<16x128xf32>
      tpu.vector_store %arg7[%c0_11, %c0_12], %12 {strides = array<i32>} : memref<16x128xf32, #tpu.memory_space<vmem>>, vector<16x128xf32>,
    } else {
    }
    %c0 = arith.constant 0 : index
    %c0_1 = arith.constant 0 : index
    %3 = vector.load %arg7[%c0, %c0_1] : memref<16x128xf32, #tpu.memory_space<vmem>>, vector<16x128xf32>
    %c0_2 = arith.constant 0 : index
    %c0_3 = arith.constant 0 : index
    %4 = vector.load %arg3[%c0_2, %c0_3] : memref<16x128xbf16, #tpu.memory_space<vmem>>, vector<16x128xbf16>
    %c0_4 = arith.constant 0 : index
    %c0_5 = arith.constant 0 : index
    %5 = vector.load %arg4[%c0_4, %c0_5] : memref<128x128xbf16, #tpu.memory_space<vmem>>, vector<128x128xbf16>
    %cst = arith.constant dense<0.000000e+00> : vector<16x128xf32>
    %6 = tpu.matmul %4, %5, %cst {dimension_numbers = #tpu.dot_dimension_numbers<[1], [0], [0], [1], [0, 0, 1, 1], [], []>} : vector<16x128xbf16>, vector<128x128xbf16>, vector<16x128xf32> -> vector<16x128xf32>
    %7 = arith.addf %3, %6 : vector<16x128xf32>
    %c0_6 = arith.constant 0 : index
    %c0_7 = arith.constant 0 : index
    %8 = vector.load %arg7[%c0_6, %c0_7] : memref<16x128xf32, #tpu.memory_space<vmem>>, vector<16x128xf32>
    tpu.vector_store %arg7[%c0_6, %c0_7], %7 {strides = array<i32>} : memref<16x128xf32, #tpu.memory_space<vmem>>, vector<16x128xf32>,
    %c0_i32_8 = arith.constant 0 : i32
    %9 = arith.cmpi eq, %arg2, %c0_i32_8 : i32
    %10 = arith.extui %9 : i1 to i32
    %c0_i32_9 = arith.constant 0 : i32
    %11 = arith.cmpi ne, %10, %c0_i32_9 : i32
    scf.if %11 {
      %c0_10 = arith.constant 0 : index
      %c0_11 = arith.constant 0 : index
      %12 = vector.load %arg7[%c0_10, %c0_11] : memref<16x128xf32, #tpu.memory_space<vmem>>, vector<16x128xf32>
      %c0_12 = arith.constant 0 : index
      %c0_13 = arith.constant 0 : index
      %13 = vector.load %arg5[%c0_12, %c0_13] : memref<1x128xf32, #tpu.memory_space<vmem>>, vector<1x128xf32>
      %14 = vector.broadcast %13 : vector<1x128xf32> to vector<16x128xf32>
      %15 = arith.addf %12, %14 : vector<16x128xf32>
      %cst_14 = arith.constant 0.000000e+00 : f32
      %16 = vector.broadcast %cst_14 : f32 to vector<16x128xf32>
      %17 = arith.maximumf %15, %16 : vector<16x128xf32>
      %18 = arith.truncf %17 : vector<16x128xf32> to vector<16x128xbf16>
      %c0_15 = arith.constant 0 : index
      %c0_16 = arith.constant 0 : index
      %19 = vector.load %arg6[%c0_15, %c0_16] : memref<16x128xbf16, #tpu.memory_space<vmem>>, vector<16x128xbf16>
      tpu.vector_store %arg6[%c0_15, %c0_16], %18 {strides = array<i32>} : memref<16x128xbf16, #tpu.memory_space<vmem>>, vector<16x128xbf16>,
    } else {
    }
    return
  }
  func.func @transform_0(%arg0: i32, %arg1: i32, %arg2: i32) -> (i32, i32) {
    %c0_i32 = arith.constant 0 : i32
    return %arg0, %arg2 : i32, i32
  }
  func.func @transform_1(%arg0: i32, %arg1: i32, %arg2: i32) -> (i32, i32) {
    %c0_i32 = arith.constant 0 : i32
    return %arg2, %arg1 : i32, i32
  }
  func.func @transform_2(%arg0: i32, %arg1: i32, %arg2: i32) -> (i32, i32) {
    %c0_i32 = arith.constant 0 : i32
    %c0_i32_0 = arith.constant 0 : i32
    return %c0_i32, %arg1 : i32, i32
  }
  func.func @transform_3(%arg0: i32, %arg1: i32, %arg2: i32) -> (i32, i32) {
    %c0_i32 = arith.constant 0 : i32
    return %arg0, %arg1 : i32, i32
  }
}

module attributes {stable_mosaic.version = 11 : i64} {
  func.func @_mm_kernel(%arg0: i32, %arg1: i32, %arg2: i32, %arg3: memref<16x128xbf16, #tpu.memory_space<vmem>>, %arg4: memref<128x128xbf16, #tpu.memory_space<vmem>>, %arg5: memref<1x128xf32, #tpu.memory_space<vmem>>, %arg6: memref<16x128xbf16, #tpu.memory_space<vmem>>, %arg7: memref<16x128xf32, #tpu.memory_space<vmem>>) attributes {dimension_semantics = [#tpu.dimension_semantics<parallel>, #tpu.dimension_semantics<parallel>, #tpu.dimension_semantics<arbitrary>], iteration_bounds = array<i64: 1, 1, 5>, scalar_prefetch = 0 : i64, scratch_operands = 1 : i64, tpu.core_type = #tpu.core_type<tc>, window_params = [{transform_indices = @transform_0, window_bounds = array<i64: 16, 128>}, {transform_indices = @transform_1, window_bounds = array<i64: 128, 128>}, {transform_indices = @transform_2, window_bounds = array<i64: 1, 128>}, {transform_indices = @transform_3, window_bounds = array<i64: 16, 128>}]} {
    %c0_i32 = arith.constant 0 : i32
    %0 = arith.cmpi eq, %arg2, %c0_i32 : i32
    %1 = arith.extui %0 : i1 to i32
    %c0_i32_0 = arith.constant 0 : i32
    %2 = arith.cmpi ne, %1, %c0_i32_0 : i32
    scf.if %2 {
      %cst_9 = arith.constant 0.000000e+00 : f32
      %12 = vector.broadcast %cst_9 : f32 to vector<16x128xf32>
      %c0_10 = arith.constant 0 : index
      %c0_11 = arith.constant 0 : index
      %13 = vector.load %arg7[%c0_10, %c0_11] : memref<16x128xf32, #tpu.memory_space<vmem>>, vector<16x128xf32>
      tpu.vector_store %arg7[%c0_10, %c0_11], %12 {strides = array<i32>} : memref<16x128xf32, #tpu.memory_space<vmem>>, vector<16x128xf32>,
    } else {
    }
    %c0 = arith.constant 0 : index
    %c0_1 = arith.constant 0 : index
    %3 = vector.load %arg7[%c0, %c0_1] : memref<16x128xf32, #tpu.memory_space<vmem>>, vector<16x128xf32>
    %c0_2 = arith.constant 0 : index
    %c0_3 = arith.constant 0 : index
    %4 = vector.load %arg3[%c0_2, %c0_3] : memref<16x128xbf16, #tpu.memory_space<vmem>>, vector<16x128xbf16>
    %c0_4 = arith.constant 0 : index
    %c0_5 = arith.constant 0 : index
    %5 = vector.load %arg4[%c0_4, %c0_5] : memref<128x128xbf16, #tpu.memory_space<vmem>>, vector<128x128xbf16>
    %cst = arith.constant dense<0.000000e+00> : vector<16x128xf32>
    %6 = tpu.matmul %4, %5, %cst {dimension_numbers = #tpu.dot_dimension_numbers<[1], [0], [0], [1], [0, 0, 1, 1], [], []>} : vector<16x128xbf16>, vector<128x128xbf16>, vector<16x128xf32> -> vector<16x128xf32>
    %7 = arith.addf %3, %6 : vector<16x128xf32>
    %c0_6 = arith.constant 0 : index
    %c0_7 = arith.constant 0 : index
    %8 = vector.load %arg7[%c0_6, %c0_7] : memref<16x128xf32, #tpu.memory_space<vmem>>, vector<16x128xf32>
    tpu.vector_store %arg7[%c0_6, %c0_7], %7 {strides = array<i32>} : memref<16x128xf32, #tpu.memory_space<vmem>>, vector<16x128xf32>,
    %c4_i32 = arith.constant 4 : i32
    %9 = arith.cmpi eq, %arg2, %c4_i32 : i32
    %10 = arith.extui %9 : i1 to i32
    %c0_i32_8 = arith.constant 0 : i32
    %11 = arith.cmpi ne, %10, %c0_i32_8 : i32
    scf.if %11 {
      %c0_9 = arith.constant 0 : index
      %c0_10 = arith.constant 0 : index
      %12 = vector.load %arg7[%c0_9, %c0_10] : memref<16x128xf32, #tpu.memory_space<vmem>>, vector<16x128xf32>
      %c0_11 = arith.constant 0 : index
      %c0_12 = arith.constant 0 : index
      %13 = vector.load %arg5[%c0_11, %c0_12] : memref<1x128xf32, #tpu.memory_space<vmem>>, vector<1x128xf32>
      %14 = vector.broadcast %13 : vector<1x128xf32> to vector<16x128xf32>
      %15 = arith.addf %12, %14 : vector<16x128xf32>
      %cst_13 = arith.constant 0.000000e+00 : f32
      %16 = vector.broadcast %cst_13 : f32 to vector<16x128xf32>
      %17 = arith.maximumf %15, %16 : vector<16x128xf32>
      %18 = arith.truncf %17 : vector<16x128xf32> to vector<16x128xbf16>
      %c0_14 = arith.constant 0 : index
      %c0_15 = arith.constant 0 : index
      %19 = vector.load %arg6[%c0_14, %c0_15] : memref<16x128xbf16, #tpu.memory_space<vmem>>, vector<16x128xbf16>
      tpu.vector_store %arg6[%c0_14, %c0_15], %18 {strides = array<i32>} : memref<16x128xbf16, #tpu.memory_space<vmem>>, vector<16x128xbf16>,
    } else {
    }
    return
  }
  func.func @transform_0(%arg0: i32, %arg1: i32, %arg2: i32) -> (i32, i32) {
    %c0_i32 = arith.constant 0 : i32
    return %arg0, %arg2 : i32, i32
  }
  func.func @transform_1(%arg0: i32, %arg1: i32, %arg2: i32) -> (i32, i32) {
    %c0_i32 = arith.constant 0 : i32
    return %arg2, %arg1 : i32, i32
  }
  func.func @transform_2(%arg0: i32, %arg1: i32, %arg2: i32) -> (i32, i32) {
    %c0_i32 = arith.constant 0 : i32
    %c0_i32_0 = arith.constant 0 : i32
    return %c0_i32, %arg1 : i32, i32
  }
  func.func @transform_3(%arg0: i32, %arg1: i32, %arg2: i32) -> (i32, i32) {
    %c0_i32 = arith.constant 0 : i32
    return %arg0, %arg1 : i32, i32
  }
}

module attributes {stable_mosaic.version = 11 : i64} {
  func.func @_head_kernel(%arg0: memref<1x2x128xbf16, #tpu.memory_space<vmem>>, %arg1: memref<128x10xf32, #tpu.memory_space<vmem>>, %arg2: memref<1x10xf32, #tpu.memory_space<vmem>>, %arg3: memref<2x10xf32, #tpu.memory_space<vmem>>) attributes {dimension_semantics = [], scalar_prefetch = 0 : i64, scratch_operands = 0 : i64, tpu.core_type = #tpu.core_type<tc>} {
    %c0 = arith.constant 0 : index
    %c0_0 = arith.constant 0 : index
    %c0_1 = arith.constant 0 : index
    %0 = vector.load %arg0[%c0, %c0_0, %c0_1] : memref<1x2x128xbf16, #tpu.memory_space<vmem>>, vector<1x2x128xbf16>
    %1 = arith.extf %0 : vector<1x2x128xbf16> to vector<1x2x128xf32>
    %cst = arith.constant dense<0.000000e+00> : vector<2x128xf32>
    %2 = vector.multi_reduction <add>, %1, %cst [0] : vector<1x2x128xf32> to vector<2x128xf32>
    %cst_2 = arith.constant 1.000000e+00 : f32
    %3 = vector.broadcast %cst_2 : f32 to vector<2x128xf32>
    %4 = arith.divf %2, %3 : vector<2x128xf32>
    %c0_3 = arith.constant 0 : index
    %c0_4 = arith.constant 0 : index
    %5 = vector.load %arg1[%c0_3, %c0_4] : memref<128x10xf32, #tpu.memory_space<vmem>>, vector<128x10xf32>
    %cst_5 = arith.constant dense<0.000000e+00> : vector<2x10xf32>
    %6 = tpu.matmul %4, %5, %cst_5 {dimension_numbers = #tpu.dot_dimension_numbers<[1], [0], [0], [1], [0, 0, 1, 1], [], []>} : vector<2x128xf32>, vector<128x10xf32>, vector<2x10xf32> -> vector<2x10xf32>
    %c0_6 = arith.constant 0 : index
    %c0_7 = arith.constant 0 : index
    %7 = vector.load %arg2[%c0_6, %c0_7] : memref<1x10xf32, #tpu.memory_space<vmem>>, vector<1x10xf32>
    %8 = vector.broadcast %7 : vector<1x10xf32> to vector<2x10xf32>
    %9 = arith.addf %6, %8 : vector<2x10xf32>
    %cst_8 = arith.constant dense<0xFF800000> : vector<2xf32>
    %10 = vector.multi_reduction <maximumf>, %9, %cst_8 [1] : vector<2x10xf32> to vector<2xf32>
    %11 = vector.shape_cast %10 : vector<2xf32> to vector<2x1xf32>
    %12 = vector.broadcast %11 : vector<2x1xf32> to vector<2x10xf32>
    %13 = arith.subf %9, %12 : vector<2x10xf32>
    %14 = math.exp %13 : vector<2x10xf32>
    %cst_9 = arith.constant dense<0.000000e+00> : vector<2xf32>
    %15 = vector.multi_reduction <add>, %14, %cst_9 [1] : vector<2x10xf32> to vector<2xf32>
    %16 = vector.shape_cast %15 : vector<2xf32> to vector<2x1xf32>
    %17 = math.log %16 : vector<2x1xf32>
    %18 = vector.broadcast %17 : vector<2x1xf32> to vector<2x10xf32>
    %19 = arith.subf %13, %18 : vector<2x10xf32>
    %c0_10 = arith.constant 0 : index
    %c0_11 = arith.constant 0 : index
    %20 = vector.load %arg3[%c0_10, %c0_11] : memref<2x10xf32, #tpu.memory_space<vmem>>, vector<2x10xf32>
    tpu.vector_store %arg3[%c0_10, %c0_11], %19 {strides = array<i32>} : memref<2x10xf32, #tpu.memory_space<vmem>>, vector<2x10xf32>,
    return
  }
}

</mosaic_0001>

<bundles_post_ra>
// kernel: _lambda_.32
= control target key start
LH: loop header
LB: loop body
LE: loop exit
PB: predicated region body
PF: predicated region fallthrough
CT: control target
= control target key end

     0   :  { %s617_s12 = smov 0   ;;  %s826_s0 = inlined_call_operand.vmem [shape: bf16[2,18,16,4], index: 0, kind: input, shape index: {}]   ;;  %s827_s1 = inlined_call_operand.vmem [shape: bf16[2,18,16,4], index: 1, kind: input, shape index: {}]   ;;  %s828_s2 = inlined_call_operand.vmem [shape: bf16[2,18,16,4], index: 2, kind: input, shape index: {}]   ;;  %s829_s3 = inlined_call_operand.vmem [shape: bf16[2,16,16,4], index: 3, kind: output, shape index: {}]  }
   0x1 LB: > { %s567_s13 = sadd.s32 4294967295, %s595_s12   ;;  %p571_p0 = scmp.ge.s32.totalorder %s595_s12, 1  ;;  %s595_s12 = sphi %s617_s12, %s13_s12  }
   0x2   : > { %p157_p1 = scmp.lt.s32.totalorder %s595_s12, 3 }
   0x4   : > { %p158_p2 = pnand %p571_p0, %p157_p1 }
   0x5   : > { %p191_p3 = scmp.lt.s32.totalorder (!%p158_p2), %s567_s13, 1  ;;  %vm455_vm0 = vcmask (!%p158_p2), 27648  }
   0x6   : > { %161 = sbr.rel (%p158_p2) target bundleno = 68 (0x44), region = 32 }
   0xd   : > { %s831_s13 = smov (!%p191_p3, %s567_s13), 1 }
   0xe   : > { %s580_s14 = smul.u32 144, %s831_s13  ;;  %s579_s15 = sshll.u32 %s831_s13, 7 }
   0xf   : > { %s670_s27 = scalar_lea.vmem %s829_s3, %s579_s15 }
  0x10   : > { %s632_s18 = scalar_lea.vmem %s826_s0, %s580_s14  ;;  %s637_s21 = scalar_lea.vmem %s827_s1, %s580_s14 }
  0x11   : > { %s642_s24 = scalar_lea.vmem %s828_s2, %s580_s14  ;;  %v211_v0 = vld [vmem:[%s632_s18] sm:$0xf]  ;;  %v213_v1 = vld [vmem:[%s632_s18 + $0x8] sm:$0xf]  ;;  %v215_v2 = vld [vmem:[%s632_s18 + $0x10] sm:$0xf] }
  0x12   : > { %v247_v3 = vld [vmem:[%s637_s21] sm:$0xf]  ;;  %v249_v4 = vld [vmem:[%s637_s21 + $0x8] sm:$0xf]  ;;  %v251_v5 = vld [vmem:[%s637_s21 + $0x10] sm:$0xf] }
  0x13   : > { %v283_v6 = vmax.bf16 %v247_v3, %v211_v0  ;;  %v285_v7 = vmax.bf16 %v249_v4, %v213_v1  ;;  %v287_v8 = vmax.bf16 %v251_v5, %v215_v2  ;;  %v319_v9 = vld [vmem:[%s642_s24] sm:$0xf]  ;;  %v321_v10 = vld [vmem:[%s642_s24 + $0x8] sm:$0xf]  ;;  %v323_v11 = vld [vmem:[%s642_s24 + $0x10] sm:$0xf] }
  0x14   : > { %v212_v12 = vld [vmem:[%s632_s18 + $0x4] sm:$0xf]  ;;  %v214_v13 = vld [vmem:[%s632_s18 + $0xc] sm:$0xf]  ;;  %v216_v14 = vld [vmem:[%s632_s18 + $0x14] sm:$0xf] }
  0x15   : > { %v355_v15 = vmax.bf16 %v319_v9, %v283_v6  ;;  %v357_v16 = vmax.bf16 %v321_v10, %v285_v7  ;;  %v359_v17 = vmax.bf16 %v323_v11, %v287_v8  ;;  %v248_v18 = vld [vmem:[%s637_s21 + $0x4] sm:$0xf]  ;;  %v250_v19 = vld [vmem:[%s637_s21 + $0xc] sm:$0xf]  ;;  %v252_v20 = vld [vmem:[%s637_s21 + $0x14] sm:$0xf] }
  0x16   : > { %v284_v21 = vmax.bf16 %v248_v18, %v212_v12  ;;  %v286_v22 = vmax.bf16 %v250_v19, %v214_v13  ;;  %v288_v23 = vmax.bf16 %v252_v20, %v216_v14  ;;  %v320_v24 = vld [vmem:[%s642_s24 + $0x4] sm:$0xf]  ;;  %v322_v25 = vld [vmem:[%s642_s24 + $0xc] sm:$0xf]  ;;  %v324_v26 = vld [vmem:[%s642_s24 + $0x14] sm:$0xf] }
  0x17   : > { %v391_v27 = vmax.bf16 %v357_v16, %v355_v15  ;;  %v217_v28 = vld [vmem:[%s632_s18 + $0x18] sm:$0xf]  ;;  %v393_v31 = vmax.bf16 %v359_v17, %v357_v16  ;;  %v218_v36 = vld [vmem:[%s632_s18 + $0x1c] sm:$0xf]  ;;  %v219_v41 = vld [vmem:[%s632_s18 + $0x20] sm:$0xf] }
  0x18   : > { %v253_v29 = vld [vmem:[%s637_s21 + $0x18] sm:$0xf]  ;;  %v356_v32 = vmax.bf16 %v320_v24, %v284_v21  ;;  %v358_v33 = vmax.bf16 %v322_v25, %v286_v22  ;;  %v360_v34 = vmax.bf16 %v324_v26, %v288_v23  ;;  %v254_v37 = vld [vmem:[%s637_s21 + $0x1c] sm:$0xf]  ;;  %v255_v42 = vld [vmem:[%s637_s21 + $0x20] sm:$0xf] }
  0x19   : > { %v325_v30 = vld [vmem:[%s642_s24 + $0x18] sm:$0xf]  ;;  %v289_v35 = vmax.bf16 %v253_v29, %v217_v28  ;;  %v326_v38 = vld [vmem:[%s642_s24 + $0x1c] sm:$0xf]  ;;  %v423_v39 = vmax.bf16 %v391_v27, %v359_v17  ;;  %v290_v40 = vmax.bf16 %v254_v37, %v218_v36  ;;  %v327_v43 = vld [vmem:[%s642_s24 + $0x20] sm:$0xf]  ;;  %v291_v47 = vmax.bf16 %v255_v42, %v219_v41 }
  0x1a   : > { %v392_v44 = vmax.bf16 %v358_v33, %v356_v32  ;;  %v394_v46 = vmax.bf16 %v360_v34, %v358_v33  ;;  %v220_v48 = vld [vmem:[%s632_s18 + $0x24] sm:$0xf]  ;;  %v221_v53 = vld [vmem:[%s632_s18 + $0x28] sm:$0xf]  ;;  %v222_v60 = vld [vmem:[%s632_s18 + $0x2c] sm:$0xf] }
  0x1b   : > { %v361_v45 = vmax.bf16 %v325_v30, %v289_v35  ;;  %v256_v49 = vld [vmem:[%s637_s21 + $0x24] sm:$0xf]  ;;  %456 = vst.msk [vmem:[%s670_s27] sm:$0xf] %vm455_vm0, %v423_v39  ;;  %v362_v51 = vmax.bf16 %v326_v38, %v290_v40  ;;  %v257_v54 = vld [vmem:[%s637_s21 + $0x28] sm:$0xf]  ;;  %v363_v58 = vmax.bf16 %v327_v43, %v291_v47 }
  0x1c   : > { %v328_v50 = vld [vmem:[%s642_s24 + $0x24] sm:$0xf]  ;;  %v292_v52 = vmax.bf16 %v256_v49, %v220_v48  ;;  %v329_v55 = vld [vmem:[%s642_s24 + $0x28] sm:$0xf]  ;;  %v424_v56 = vmax.bf16 %v392_v44, %v360_v34  ;;  %v258_v61 = vld [vmem:[%s637_s21 + $0x2c] sm:$0xf]  ;;  %v293_v2 = vmax.bf16 %v257_v54, %v221_v53 }
  0x1d   : > { %v425_v57 = vmax.bf16 %v393_v31, %v361_v45  ;;  %v395_v59 = vmax.bf16 %v361_v45, %v359_v17  ;;  %v330_v62 = vld [vmem:[%s642_s24 + $0x2c] sm:$0xf]  ;;  %v426_v63 = vmax.bf16 %v394_v46, %v362_v51  ;;  %v396_v1 = vmax.bf16 %v362_v51, %v360_v34  ;;  %v223_v3 = vld [vmem:[%s632_s18 + $0x30] sm:$0xf]  ;;  %v224_v10 = vld [vmem:[%s632_s18 + $0x34] sm:$0xf] }
  0x1e   : > { %v364_v0 = vmax.bf16 %v328_v50, %v292_v52  ;;  %v259_v4 = vld [vmem:[%s637_s21 + $0x30] sm:$0xf]  ;;  %457 = vst.msk [vmem:[%s670_s27 + $0x4] sm:$0xf] %vm455_vm0, %v424_v56  ;;  %v397_v7 = vmax.bf16 %v363_v58, %v361_v45  ;;  %v294_v8 = vmax.bf16 %v258_v61, %v222_v60  ;;  %v260_v11 = vld [vmem:[%s637_s21 + $0x34] sm:$0xf]  ;;  %v365_v14 = vmax.bf16 %v329_v55, %v293_v2 }
  0x1f   : > { %v331_v5 = vld [vmem:[%s642_s24 + $0x30] sm:$0xf]  ;;  %458 = vst.msk [vmem:[%s670_s27 + $0x8] sm:$0xf] %vm455_vm0, %v425_v57  ;;  %v427_v6 = vmax.bf16 %v395_v59, %v363_v58  ;;  %v295_v9 = vmax.bf16 %v259_v4, %v223_v3  ;;  %v332_v12 = vld [vmem:[%s642_s24 + $0x34] sm:$0xf]  ;;  %v296_v16 = vmax.bf16 %v260_v11, %v224_v10 }
  0x20   : > { %459 = vst.msk [vmem:[%s670_s27 + $0xc] sm:$0xf] %vm455_vm0, %v426_v63  ;;  %v428_v13 = vmax.bf16 %v396_v1, %v364_v0  ;;  %v398_v15 = vmax.bf16 %v364_v0, %v362_v51  ;;  %v225_v17 = vld [vmem:[%s632_s18 + $0x38] sm:$0xf]  ;;  %v366_v20 = vmax.bf16 %v330_v62, %v294_v8  ;;  %v226_v23 = vld [vmem:[%s632_s18 + $0x3c] sm:$0xf]  ;;  %v429_v26 = vmax.bf16 %v397_v7, %v365_v14 }
  0x21   : > { %v261_v18 = vld [vmem:[%s637_s21 + $0x38] sm:$0xf]  ;;  %460 = vst.msk [vmem:[%s670_s27 + $0x10] sm:$0xf] %vm455_vm0, %v427_v6  ;;  %v367_v21 = vmax.bf16 %v331_v5, %v295_v9  ;;  %v262_v24 = vld [vmem:[%s637_s21 + $0x3c] sm:$0xf]  ;;  %v399_v27 = vmax.bf16 %v365_v14, %v363_v58  ;;  %v368_v28 = vmax.bf16 %v332_v12, %v296_v16 }
  0x22   : > { %v333_v19 = vld [vmem:[%s642_s24 + $0x38] sm:$0xf]  ;;  %v297_v22 = vmax.bf16 %v261_v18, %v225_v17  ;;  %v334_v25 = vld [vmem:[%s642_s24 + $0x3c] sm:$0xf]  ;;  %461 = vst.msk [vmem:[%s670_s27 + $0x14] sm:$0xf] %vm455_vm0, %v428_v13  ;;  %v298_v29 = vmax.bf16 %v262_v24, %v226_v23  ;;  %v430_v33 = vmax.bf16 %v398_v15, %v366_v20  ;;  %v400_v34 = vmax.bf16 %v366_v20, %v364_v0 }
  0x23   : > { %v227_v30 = vld [vmem:[%s632_s18 + $0x40] sm:$0xf]  ;;  %v401_v36 = vmax.bf16 %v367_v21, %v365_v14  ;;  %v228_v37 = vld [vmem:[%s632_s18 + $0x44] sm:$0xf]  ;;  %462 = vst.msk [vmem:[%s670_s27 + $0x18] sm:$0xf] %vm455_vm0, %v429_v26  ;;  %v431_v40 = vmax.bf16 %v399_v27, %v367_v21  ;;  %v402_v42 = vmax.bf16 %v368_v28, %v366_v20 }
  0x24   : > { %v263_v31 = vld [vmem:[%s637_s21 + $0x40] sm:$0xf]  ;;  %v369_v35 = vmax.bf16 %v333_v19, %v297_v22  ;;  %v264_v38 = vld [vmem:[%s637_s21 + $0x44] sm:$0xf]  ;;  %v370_v41 = vmax.bf16 %v334_v25, %v298_v29  ;;  %v229_v44 = vld [vmem:[%s632_s18 + $0x48] sm:$0xf]  ;;  %v432_v47 = vmax.bf16 %v400_v34, %v368_v28 }
  0x25   : > { %v335_v32 = vld [vmem:[%s642_s24 + $0x40] sm:$0xf]  ;;  %v336_v39 = vld [vmem:[%s642_s24 + $0x44] sm:$0xf]  ;;  %v299_v43 = vmax.bf16 %v263_v31, %v227_v30  ;;  %v265_v45 = vld [vmem:[%s637_s21 + $0x48] sm:$0xf]  ;;  %v300_v50 = vmax.bf16 %v264_v38, %v228_v37 }
  0x26   : > { %v337_v46 = vld [vmem:[%s642_s24 + $0x48] sm:$0xf]  ;;  %463 = vst.msk [vmem:[%s670_s27 + $0x1c] sm:$0xf] %vm455_vm0, %v430_v33  ;;  %v433_v48 = vmax.bf16 %v401_v36, %v369_v35  ;;  %v403_v49 = vmax.bf16 %v369_v35, %v367_v21  ;;  %v230_v51 = vld [vmem:[%s632_s18 + $0x4c] sm:$0xf]  ;;  %v434_v54 = vmax.bf16 %v402_v42, %v370_v41  ;;  %v404_v56 = vmax.bf16 %v370_v41, %v368_v28 }
  0x27   : > { %v266_v52 = vld [vmem:[%s637_s21 + $0x4c] sm:$0xf]  ;;  %464 = vst.msk [vmem:[%s670_s27 + $0x20] sm:$0xf] %vm455_vm0, %v431_v40  ;;  %v371_v55 = vmax.bf16 %v335_v32, %v299_v43  ;;  %v301_v57 = vmax.bf16 %v265_v45, %v229_v44  ;;  %v231_v58 = vld [vmem:[%s632_s18 + $0x50] sm:$0xf]  ;;  %v372_v61 = vmax.bf16 %v336_v39, %v300_v50 }
  0x28   : > { %v338_v53 = vld [vmem:[%s642_s24 + $0x4c] sm:$0xf]  ;;  %v267_v59 = vld [vmem:[%s637_s21 + $0x50] sm:$0xf]  ;;  %465 = vst.msk [vmem:[%s670_s27 + $0x24] sm:$0xf] %vm455_vm0, %v432_v47  ;;  %v302_v62 = vmax.bf16 %v266_v52, %v230_v51 }
  0x29   : > { %v339_v60 = vld [vmem:[%s642_s24 + $0x50] sm:$0xf]  ;;  %466 = vst.msk [vmem:[%s670_s27 + $0x28] sm:$0xf] %vm455_vm0, %v433_v48  ;;  %v303_v63 = vmax.bf16 %v267_v59, %v231_v58  ;;  %v232_v0 = vld [vmem:[%s632_s18 + $0x54] sm:$0xf]  ;;  %v435_v3 = vmax.bf16 %v403_v49, %v371_v55  ;;  %v373_v4 = vmax.bf16 %v337_v46, %v301_v57  ;;  %v405_v5 = vmax.bf16 %v371_v55, %v369_v35 }
  0x2a   : > { %v268_v1 = vld [vmem:[%s637_s21 + $0x54] sm:$0xf]  ;;  %467 = vst.msk [vmem:[%s670_s27 + $0x2c] sm:$0xf] %vm455_vm0, %v434_v54  ;;  %v233_v7 = vld [vmem:[%s632_s18 + $0x58] sm:$0xf]  ;;  %v436_v10 = vmax.bf16 %v404_v56, %v372_v61  ;;  %v374_v11 = vmax.bf16 %v338_v53, %v302_v62  ;;  %v406_v12 = vmax.bf16 %v372_v61, %v370_v41 }
  0x2b   : > { %v340_v2 = vld [vmem:[%s642_s24 + $0x54] sm:$0xf]  ;;  %v304_v6 = vmax.bf16 %v268_v1, %v232_v0  ;;  %v269_v8 = vld [vmem:[%s637_s21 + $0x58] sm:$0xf]  ;;  %v375_v13 = vmax.bf16 %v339_v60, %v303_v63  ;;  %v234_v14 = vld [vmem:[%s632_s18 + $0x5c] sm:$0xf]  ;;  %v437_v17 = vmax.bf16 %v405_v5, %v373_v4  ;;  %v407_v18 = vmax.bf16 %v373_v4, %v371_v55 }
  0x2c   : > { %v341_v9 = vld [vmem:[%s642_s24 + $0x58] sm:$0xf]  ;;  %v270_v15 = vld [vmem:[%s637_s21 + $0x5c] sm:$0xf]  ;;  %468 = vst.msk [vmem:[%s670_s27 + $0x30] sm:$0xf] %vm455_vm0, %v435_v3  ;;  %v305_v20 = vmax.bf16 %v269_v8, %v233_v7  ;;  %v438_v24 = vmax.bf16 %v406_v12, %v374_v11  ;;  %v408_v25 = vmax.bf16 %v374_v11, %v372_v61 }
  0x2d   : > { %v342_v16 = vld [vmem:[%s642_s24 + $0x5c] sm:$0xf]  ;;  %v376_v19 = vmax.bf16 %v340_v2, %v304_v6  ;;  %v235_v21 = vld [vmem:[%s632_s18 + $0x60] sm:$0xf]  ;;  %469 = vst.msk [vmem:[%s670_s27 + $0x34] sm:$0xf] %vm455_vm0, %v436_v10  ;;  %v409_v26 = vmax.bf16 %v375_v13, %v373_v4  ;;  %v306_v27 = vmax.bf16 %v270_v15, %v234_v14  ;;  %v439_v31 = vmax.bf16 %v407_v18, %v375_v13 }
  0x2e   : > { %v271_v22 = vld [vmem:[%s637_s21 + $0x60] sm:$0xf]  ;;  %v236_v28 = vld [vmem:[%s632_s18 + $0x64] sm:$0xf]  ;;  %470 = vst.msk [vmem:[%s670_s27 + $0x38] sm:$0xf] %vm455_vm0, %v437_v17  ;;  %v377_v32 = vmax.bf16 %v341_v9, %v305_v20 }
  0x2f   : > { %v343_v23 = vld [vmem:[%s642_s24 + $0x60] sm:$0xf]  ;;  %v272_v29 = vld [vmem:[%s637_s21 + $0x64] sm:$0xf]  ;;  %v410_v33 = vmax.bf16 %v376_v19, %v374_v11  ;;  %v307_v34 = vmax.bf16 %v271_v22, %v235_v21  ;;  %v237_v35 = vld [vmem:[%s632_s18 + $0x68] sm:$0xf]  ;;  %v440_v38 = vmax.bf16 %v408_v25, %v376_v19  ;;  %v378_v39 = vmax.bf16 %v342_v16, %v306_v27 }
  0x30   : > { %v344_v30 = vld [vmem:[%s642_s24 + $0x64] sm:$0xf]  ;;  %v273_v36 = vld [vmem:[%s637_s21 + $0x68] sm:$0xf]  ;;  %471 = vst.msk [vmem:[%s670_s27 + $0x3c] sm:$0xf] %vm455_vm0, %v438_v24  ;;  %v308_v40 = vmax.bf16 %v272_v29, %v236_v28  ;;  %v441_v45 = vmax.bf16 %v409_v26, %v377_v32  ;;  %v411_v47 = vmax.bf16 %v377_v32, %v375_v13 }
  0x31   : > { %v345_v37 = vld [vmem:[%s642_s24 + $0x68] sm:$0xf]  ;;  %v309_v41 = vmax.bf16 %v273_v36, %v237_v35  ;;  %v238_v42 = vld [vmem:[%s632_s18 + $0x6c] sm:$0xf]  ;;  %472 = vst.msk [vmem:[%s670_s27 + $0x40] sm:$0xf] %vm455_vm0, %v439_v31  ;;  %v379_v46 = vmax.bf16 %v343_v23, %v307_v34  ;;  %v442_v52 = vmax.bf16 %v410_v33, %v378_v39  ;;  %v412_v54 = vmax.bf16 %v378_v39, %v376_v19 }
  0x32   : > { %v274_v43 = vld [vmem:[%s637_s21 + $0x6c] sm:$0xf]  ;;  %v239_v49 = vld [vmem:[%s632_s18 + $0x70] sm:$0xf]  ;;  %473 = vst.msk [vmem:[%s670_s27 + $0x44] sm:$0xf] %vm455_vm0, %v440_v38  ;;  %v380_v53 = vmax.bf16 %v344_v30, %v308_v40 }
  0x33   : > { %v346_v44 = vld [vmem:[%s642_s24 + $0x6c] sm:$0xf]  ;;  %v310_v48 = vmax.bf16 %v274_v43, %v238_v42  ;;  %v275_v50 = vld [vmem:[%s637_s21 + $0x70] sm:$0xf]  ;;  %v381_v55 = vmax.bf16 %v345_v37, %v309_v41  ;;  %v240_v56 = vld [vmem:[%s632_s18 + $0x74] sm:$0xf]  ;;  %v443_v59 = vmax.bf16 %v411_v47, %v379_v46  ;;  %v413_v60 = vmax.bf16 %v379_v46, %v377_v32 }
  0x34   : > { %v347_v51 = vld [vmem:[%s642_s24 + $0x70] sm:$0xf]  ;;  %v276_v57 = vld [vmem:[%s637_s21 + $0x74] sm:$0xf]  ;;  %474 = vst.msk [vmem:[%s670_s27 + $0x48] sm:$0xf] %vm455_vm0, %v441_v45  ;;  %v311_v62 = vmax.bf16 %v275_v50, %v239_v49  ;;  %v444_v2 = vmax.bf16 %v412_v54, %v380_v53  ;;  %v414_v3 = vmax.bf16 %v380_v53, %v378_v39 }
  0x35   : > { %v348_v58 = vld [vmem:[%s642_s24 + $0x74] sm:$0xf]  ;;  %v382_v61 = vmax.bf16 %v346_v44, %v310_v48  ;;  %v241_v63 = vld [vmem:[%s632_s18 + $0x78] sm:$0xf]  ;;  %475 = vst.msk [vmem:[%s670_s27 + $0x4c] sm:$0xf] %vm455_vm0, %v442_v52  ;;  %v415_v4 = vmax.bf16 %v381_v55, %v379_v46  ;;  %v312_v5 = vmax.bf16 %v276_v57, %v240_v56  ;;  %v445_v9 = vmax.bf16 %v413_v60, %v381_v55 }
  0x36   : > { %v277_v0 = vld [vmem:[%s637_s21 + $0x78] sm:$0xf]  ;;  %v242_v6 = vld [vmem:[%s632_s18 + $0x7c] sm:$0xf]  ;;  %476 = vst.msk [vmem:[%s670_s27 + $0x50] sm:$0xf] %vm455_vm0, %v443_v59  ;;  %v383_v10 = vmax.bf16 %v347_v51, %v311_v62 }
  0x37   : > { %v349_v1 = vld [vmem:[%s642_s24 + $0x78] sm:$0xf]  ;;  %v278_v7 = vld [vmem:[%s637_s21 + $0x7c] sm:$0xf]  ;;  %v416_v11 = vmax.bf16 %v382_v61, %v380_v53  ;;  %v313_v12 = vmax.bf16 %v277_v0, %v241_v63  ;;  %v243_v13 = vld [vmem:[%s632_s18 + $0x80] sm:$0xf]  ;;  %v446_v16 = vmax.bf16 %v414_v3, %v382_v61  ;;  %v384_v17 = vmax.bf16 %v348_v58, %v312_v5 }
  0x38   : > { %v350_v8 = vld [vmem:[%s642_s24 + $0x7c] sm:$0xf]  ;;  %v279_v14 = vld [vmem:[%s637_s21 + $0x80] sm:$0xf]  ;;  %477 = vst.msk [vmem:[%s670_s27 + $0x54] sm:$0xf] %vm455_vm0, %v444_v2  ;;  %v314_v18 = vmax.bf16 %v278_v7, %v242_v6  ;;  %v447_v23 = vmax.bf16 %v415_v4, %v383_v10  ;;  %v417_v25 = vmax.bf16 %v383_v10, %v381_v55 }
  0x39   : > { %v351_v15 = vld [vmem:[%s642_s24 + $0x80] sm:$0xf]  ;;  %v315_v19 = vmax.bf16 %v279_v14, %v243_v13  ;;  %v244_v20 = vld [vmem:[%s632_s18 + $0x84] sm:$0xf]  ;;  %478 = vst.msk [vmem:[%s670_s27 + $0x58] sm:$0xf] %vm455_vm0, %v445_v9  ;;  %v385_v24 = vmax.bf16 %v349_v1, %v313_v12  ;;  %v448_v29 = vmax.bf16 %v416_v11, %v384_v17  ;;  %v418_v31 = vmax.bf16 %v384_v17, %v382_v61 }
  0x3a   : > { %v280_v21 = vld [vmem:[%s637_s21 + $0x84] sm:$0xf]  ;;  %v245_v27 = vld [vmem:[%s632_s18 + $0x88] sm:$0xf]  ;;  %479 = vst.msk [vmem:[%s670_s27 + $0x5c] sm:$0xf] %vm455_vm0, %v446_v16  ;;  %v386_v30 = vmax.bf16 %v350_v8, %v314_v18 }
  0x3b   : > { %v352_v22 = vld [vmem:[%s642_s24 + $0x84] sm:$0xf]  ;;  %v316_v26 = vmax.bf16 %v280_v21, %v244_v20  ;;  %v281_v28 = vld [vmem:[%s637_s21 + $0x88] sm:$0xf]  ;;  %v387_v32 = vmax.bf16 %v351_v15, %v315_v19  ;;  %v246_v34 = vld [vmem:[%s632_s18 + $0x8c] sm:$0xf]  ;;  %v449_v36 = vmax.bf16 %v417_v25, %v385_v24  ;;  %v419_v37 = vmax.bf16 %v385_v24, %v383_v10 }
  0x3c   : > { %v353_v33 = vld [vmem:[%s642_s24 + $0x88] sm:$0xf]  ;;  %v282_v35 = vld [vmem:[%s637_s21 + $0x8c] sm:$0xf]  ;;  %480 = vst.msk [vmem:[%s670_s27 + $0x60] sm:$0xf] %vm455_vm0, %v447_v23  ;;  %v317_v39 = vmax.bf16 %v281_v28, %v245_v27  ;;  %v450_v41 = vmax.bf16 %v418_v31, %v386_v30  ;;  %v420_v42 = vmax.bf16 %v386_v30, %v384_v17 }
  0x3d   : > { %v388_v38 = vmax.bf16 %v352_v22, %v316_v26  ;;  %v354_v40 = vld [vmem:[%s642_s24 + $0x8c] sm:$0xf]  ;;  %481 = vst.msk [vmem:[%s670_s27 + $0x64] sm:$0xf] %vm455_vm0, %v448_v29  ;;  %v421_v43 = vmax.bf16 %v387_v32, %v385_v24  ;;  %v318_v44 = vmax.bf16 %v282_v35, %v246_v34  ;;  %482 = vst.msk [vmem:[%s670_s27 + $0x68] sm:$0xf] %vm455_vm0, %v449_v36 }
  0x3e   : > { %v451_v45 = vmax.bf16 %v419_v37, %v387_v32  ;;  %v389_v46 = vmax.bf16 %v353_v33, %v317_v39  ;;  %483 = vst.msk [vmem:[%s670_s27 + $0x6c] sm:$0xf] %vm455_vm0, %v450_v41 }
  0x3f   : > { %v422_v47 = vmax.bf16 %v388_v38, %v386_v30  ;;  %v452_v48 = vmax.bf16 %v420_v42, %v388_v38  ;;  %v390_v49 = vmax.bf16 %v354_v40, %v318_v44 }
  0x40   : > { %484 = vst.msk [vmem:[%s670_s27 + $0x70] sm:$0xf] %vm455_vm0, %v451_v45  ;;  %v453_v50 = vmax.bf16 %v421_v43, %v389_v46 }
  0x41   : > { %485 = vst.msk [vmem:[%s670_s27 + $0x74] sm:$0xf] %vm455_vm0, %v452_v48  ;;  %v454_v51 = vmax.bf16 %v422_v47, %v390_v49 }
  0x42   : > { %486 = vst.msk [vmem:[%s670_s27 + $0x78] sm:$0xf] %vm455_vm0, %v453_v50 }
  0x43   : > { %487 = vst.msk [vmem:[%s670_s27 + $0x7c] sm:$0xf] %vm455_vm0, %v454_v51 }
  0x44 PF: > { %s13_s12 = sadd.s32 1, %s595_s12  }
  0x45   : > { %p10_p4 = scmp.ge.s32.totalorder %s13_s12, 4  }
  0x47   :  { %12 = sbr.rel (!%p10_p4) target bundleno = 1 (0x1), region = 68 }

// kernel: _lambda_.31
= control target key start
LH: loop header
LB: loop body
LE: loop exit
PB: predicated region body
PF: predicated region fallthrough
CT: control target
= control target key end

     0   :  { %v2147_v0 = vmov 0   ;;  %s2605_s1 = inlined_call_operand.vmem [shape: bf16[256,128], index: 1, kind: input, shape index: {}]   ;;  %s2606_s0 = inlined_call_operand.vmem [shape: bf16[512,256], index: 0, kind: input, shape index: {}]   ;;  %s2607_s2 = inlined_call_operand.vmem [shape: f32[1,128], index: 2, kind: input, shape index: {}]   ;;  %s2608_s3 = inlined_call_operand.vmem [shape: bf16[512,128], index: 3, kind: output, shape index: {}]  }
   0x1   :  { %659 = vmatprep.subr.bf16.mxu0 %v2147_v0  ;;  %2002 = vmatprep.subr.bf16.mxu1 %v2147_v0  ;;  %v2035_v1 = vld [vmem:[%s2605_s1] sm:$0xff]   ;;  %v2036_v2 = vld [vmem:[%s2605_s1 + $0x8] sm:$0xff]   ;;  %v2037_v3 = vld [vmem:[%s2605_s1 + $0x10] sm:$0xff]  }
   0x2   :  { %660 = vmatpush1.bf16.msra.mxu0 %v2035_v1  ;;  %2018 = vmatpush1.bf16.msra.mxu1 %v2035_v1  ;;  %v2038_v4 = vld [vmem:[%s2605_s1 + $0x18] sm:$0xff]   ;;  %v2039_v5 = vld [vmem:[%s2605_s1 + $0x20] sm:$0xff]   ;;  %v2040_v7 = vld [vmem:[%s2605_s1 + $0x28] sm:$0xff]  }
   0x3   :  { %661 = vmatprep.subr.bf16.mxu0 %v2147_v0  ;;  %2003 = vmatprep.subr.bf16.mxu1 %v2147_v0  ;;  %v2053_v6 = vld [vmem:[%s2606_s0 + $0x4] ss:$8 sps:$4 sm:$0xff]   ;;  %v2041_v9 = vld [vmem:[%s2605_s1 + $0x30] sm:$0xff]   ;;  %v2042_v10 = vld [vmem:[%s2605_s1 + $0x38] sm:$0xff]  }
   0x4   :  { %v2056_v8 = vld [vmem:[%s2606_s0 + $0x104] ss:$8 sps:$4 sm:$0xff]   ;;  %691 = vmatprep.mubr.bf16.mxu0 %v2053_v6  ;;  %v2045_v13 = vld [vmem:[%s2605_s1 + $0x50] sm:$0xff]   ;;  %v2046_v14 = vld [vmem:[%s2605_s1 + $0x58] sm:$0xff]  }
   0x5   :  { %819 = vmatprep.mubr.bf16.mxu1 %v2056_v8  ;;  %v2043_v11 = vld [vmem:[%s2605_s1 + $0x40] sm:$0xff]   ;;  %v2044_v12 = vld [vmem:[%s2605_s1 + $0x48] sm:$0xff]   ;;  %v2049_v17 = vld [vmem:[%s2605_s1 + $0x70] sm:$0xff]  }
   0x6   :  { %662 = vmatpush1.bf16.msra.mxu0 %v2036_v2  ;;  %2019 = vmatpush1.bf16.msra.mxu1 %v2036_v2  ;;  %v2047_v15 = vld [vmem:[%s2605_s1 + $0x60] sm:$0xff]   ;;  %v2048_v16 = vld [vmem:[%s2605_s1 + $0x68] sm:$0xff]   ;;  %v2050_v18 = vld [vmem:[%s2605_s1 + $0x78] sm:$0xff]  }
   0x7   :  { %663 = vmatprep.subr.bf16.mxu0 %v2147_v0  ;;  %2004 = vmatprep.subr.bf16.mxu1 %v2147_v0  ;;  %v2051_v19 = vld [vmem:[%s2606_s0] ss:$8 sps:$4 sm:$0xff]   ;;  %v2057_v21 = vld [vmem:[%s2606_s0 + $0x14] ss:$8 sps:$4 sm:$0xff]   ;;  %v2061_v23 = vld [vmem:[%s2606_s0 + $0x10] ss:$8 sps:$4 sm:$0xff]  }
   0x8   :  { %v2054_v20 = vld [vmem:[%s2606_s0 + $0x100] ss:$8 sps:$4 sm:$0xff]   ;;  %v2059_v22 = vld [vmem:[%s2606_s0 + $0x114] ss:$8 sps:$4 sm:$0xff]   ;;  %v2062_v24 = vld [vmem:[%s2606_s0 + $0x110] ss:$8 sps:$4 sm:$0xff]  }
   0x9   :  { %v2063_v25 = vld [vmem:[%s2606_s0 + $0x24] ss:$8 sps:$4 sm:$0xff]   ;;  %v2067_v27 = vld [vmem:[%s2606_s0 + $0x20] ss:$8 sps:$4 sm:$0xff]   ;;  %v2069_v29 = vld [vmem:[%s2606_s0 + $0x34] ss:$8 sps:$4 sm:$0xff]  }
   0xa   :  { %664 = vmatpush1.bf16.msra.mxu0 %v2037_v3  ;;  %2020 = vmatpush1.bf16.msra.mxu1 %v2037_v3  ;;  %v2065_v26 = vld [vmem:[%s2606_s0 + $0x124] ss:$8 sps:$4 sm:$0xff]   ;;  %v2068_v28 = vld [vmem:[%s2606_s0 + $0x120] ss:$8 sps:$4 sm:$0xff]   ;;  %v2071_v30 = vld [vmem:[%s2606_s0 + $0x134] ss:$8 sps:$4 sm:$0xff]  }
   0xb   :  { %665 = vmatprep.subr.bf16.mxu0 %v2147_v0  ;;  %2005 = vmatprep.subr.bf16.mxu1 %v2147_v0  ;;  %v2073_v31 = vld [vmem:[%s2606_s0 + $0x30] ss:$8 sps:$4 sm:$0xff]   ;;  %v2075_v33 = vld [vmem:[%s2606_s0 + $0x44] ss:$8 sps:$4 sm:$0xff]   ;;  %v2079_v35 = vld [vmem:[%s2606_s0 + $0x40] ss:$8 sps:$4 sm:$0xff]  }
   0xc   :  { %v2074_v32 = vld [vmem:[%s2606_s0 + $0x130] ss:$8 sps:$4 sm:$0xff]   ;;  %v2077_v34 = vld [vmem:[%s2606_s0 + $0x144] ss:$8 sps:$4 sm:$0xff]   ;;  %v2080_v36 = vld [vmem:[%s2606_s0 + $0x140] ss:$8 sps:$4 sm:$0xff]  }
   0xd   :  { %v2081_v37 = vld [vmem:[%s2606_s0 + $0x54] ss:$8 sps:$4 sm:$0xff]   ;;  %v2085_v39 = vld [vmem:[%s2606_s0 + $0x50] ss:$8 sps:$4 sm:$0xff]   ;;  %v2087_v41 = vld [vmem:[%s2606_s0 + $0x64] ss:$8 sps:$4 sm:$0xff]  }
   0xe   :  { %666 = vmatpush1.bf16.msra.mxu0 %v2038_v4  ;;  %2021 = vmatpush1.bf16.msra.mxu1 %v2038_v4  ;;  %v2083_v38 = vld [vmem:[%s2606_s0 + $0x154] ss:$8 sps:$4 sm:$0xff]   ;;  %v2086_v40 = vld [vmem:[%s2606_s0 + $0x150] ss:$8 sps:$4 sm:$0xff]   ;;  %v2089_v42 = vld [vmem:[%s2606_s0 + $0x164] ss:$8 sps:$4 sm:$0xff]  }
   0xf   :  { %667 = vmatprep.subr.bf16.mxu0 %v2147_v0  ;;  %2006 = vmatprep.subr.bf16.mxu1 %v2147_v0  ;;  %v2091_v43 = vld [vmem:[%s2606_s0 + $0x60] ss:$8 sps:$4 sm:$0xff]   ;;  %v2093_v45 = vld [vmem:[%s2606_s0 + $0x74] ss:$8 sps:$4 sm:$0xff]   ;;  %v2097_v47 = vld [vmem:[%s2606_s0 + $0x70] ss:$8 sps:$4 sm:$0xff]  }
  0x10   :  { %v2092_v44 = vld [vmem:[%s2606_s0 + $0x160] ss:$8 sps:$4 sm:$0xff]   ;;  %v2095_v46 = vld [vmem:[%s2606_s0 + $0x174] ss:$8 sps:$4 sm:$0xff]   ;;  %v2098_v48 = vld [vmem:[%s2606_s0 + $0x170] ss:$8 sps:$4 sm:$0xff]  }
  0x11   :  { %v2099_v49 = vld [vmem:[%s2606_s0 + $0x84] ss:$8 sps:$4 sm:$0xff]   ;;  %v2103_v51 = vld [vmem:[%s2606_s0 + $0x80] ss:$8 sps:$4 sm:$0xff]   ;;  %v2105_v53 = vld [vmem:[%s2606_s0 + $0x94] ss:$8 sps:$4 sm:$0xff]  }
  0x12   :  { %668 = vmatpush1.bf16.msra.mxu0 %v2039_v5  ;;  %2022 = vmatpush1.bf16.msra.mxu1 %v2039_v5  ;;  %v2101_v50 = vld [vmem:[%s2606_s0 + $0x184] ss:$8 sps:$4 sm:$0xff]   ;;  %v2104_v52 = vld [vmem:[%s2606_s0 + $0x180] ss:$8 sps:$4 sm:$0xff]   ;;  %v2107_v54 = vld [vmem:[%s2606_s0 + $0x194] ss:$8 sps:$4 sm:$0xff]  }
  0x13   :  { %669 = vmatprep.subr.bf16.mxu0 %v2147_v0  ;;  %2007 = vmatprep.subr.bf16.mxu1 %v2147_v0  ;;  %v2109_v55 = vld [vmem:[%s2606_s0 + $0x90] ss:$8 sps:$4 sm:$0xff]   ;;  %v2111_v57 = vld [vmem:[%s2606_s0 + $0xa4] ss:$8 sps:$4 sm:$0xff]   ;;  %v2115_v59 = vld [vmem:[%s2606_s0 + $0xa0] ss:$8 sps:$4 sm:$0xff]  }
  0x14   :  { %v2110_v56 = vld [vmem:[%s2606_s0 + $0x190] ss:$8 sps:$4 sm:$0xff]   ;;  %v2113_v58 = vld [vmem:[%s2606_s0 + $0x1a4] ss:$8 sps:$4 sm:$0xff]   ;;  %v2116_v60 = vld [vmem:[%s2606_s0 + $0x1a0] ss:$8 sps:$4 sm:$0xff]  }
  0x15   :  { %v2117_v61 = vld [vmem:[%s2606_s0 + $0xb4] ss:$8 sps:$4 sm:$0xff]   ;;  %v2121_v63 = vld [vmem:[%s2606_s0 + $0xb0] ss:$8 sps:$4 sm:$0xff]   ;;  %v2123_v1 = vld [vmem:[%s2606_s0 + $0xc4] ss:$8 sps:$4 sm:$0xff]  }
  0x16   :  { %670 = vmatpush1.bf16.msra.mxu0 %v2040_v7  ;;  %2023 = vmatpush1.bf16.msra.mxu1 %v2040_v7  ;;  %v2119_v62 = vld [vmem:[%s2606_s0 + $0x1b4] ss:$8 sps:$4 sm:$0xff]   ;;  %v2125_v2 = vld [vmem:[%s2606_s0 + $0x1c4] ss:$8 sps:$4 sm:$0xff]   ;;  %v2127_v3 = vld [vmem:[%s2606_s0 + $0xc0] ss:$8 sps:$4 sm:$0xff]  }
  0x17   :  { %671 = vmatprep.subr.bf16.mxu0 %v2147_v0  ;;  %2008 = vmatprep.subr.bf16.mxu1 %v2147_v0  ;;  %v2128_v4 = vld [vmem:[%s2606_s0 + $0x1c0] ss:$8 sps:$4 sm:$0xff]   ;;  %v2129_v5 = vld [vmem:[%s2606_s0 + $0xd4] ss:$8 sps:$4 sm:$0xff]   ;;  %v2133_v7 = vld [vmem:[%s2606_s0 + $0xd0] ss:$8 sps:$4 sm:$0xff]  }
  0x18   :  { %v2131_v6 = vld [vmem:[%s2606_s0 + $0x1d4] ss:$8 sps:$4 sm:$0xff]   ;;  %v2134_v8 = vld [vmem:[%s2606_s0 + $0x1d0] ss:$8 sps:$4 sm:$0xff]  }
  0x1a   :  { %672 = vmatpush1.bf16.msra.mxu0 %v2041_v9  ;;  %2024 = vmatpush1.bf16.msra.mxu1 %v2041_v9  ;;  %v2135_v9 = vld [vmem:[%s2606_s0 + $0xe4] ss:$8 sps:$4 sm:$0xff]  }
  0x1b   :  { %673 = vmatprep.subr.bf16.mxu0 %v2147_v0  ;;  %2009 = vmatprep.subr.bf16.mxu1 %v2147_v0 }
  0x1e   :  { %674 = vmatpush1.bf16.msra.mxu0 %v2042_v10  ;;  %2025 = vmatpush1.bf16.msra.mxu1 %v2042_v10  ;;  %v2137_v10 = vld [vmem:[%s2606_s0 + $0x1e4] ss:$8 sps:$4 sm:$0xff]  }
  0x1f   :  { %675 = vmatprep.subr.bf16.mxu0 %v2147_v0  ;;  %2010 = vmatprep.subr.bf16.mxu1 %v2147_v0 }
  0x22   :  { %676 = vmatpush1.bf16.msra.mxu0 %v2043_v11  ;;  %2026 = vmatpush1.bf16.msra.mxu1 %v2043_v11  ;;  %v2139_v11 = vld [vmem:[%s2606_s0 + $0xe0] ss:$8 sps:$4 sm:$0xff]  }
  0x23   :  { %677 = vmatprep.subr.bf16.mxu0 %v2147_v0  ;;  %2011 = vmatprep.subr.bf16.mxu1 %v2147_v0 }
  0x26   :  { %678 = vmatpush1.bf16.msra.mxu0 %v2044_v12  ;;  %2027 = vmatpush1.bf16.msra.mxu1 %v2044_v12  ;;  %v2140_v12 = vld [vmem:[%s2606_s0 + $0x1e0] ss:$8 sps:$4 sm:$0xff]  }
  0x27   :  { %679 = vmatprep.subr.bf16.mxu0 %v2147_v0  ;;  %2012 = vmatprep.subr.bf16.mxu1 %v2147_v0 }
  0x2a   :  { %680 = vmatpush1.bf16.msra.mxu0 %v2045_v13  ;;  %2028 = vmatpush1.bf16.msra.mxu1 %v2045_v13  ;;  %v2141_v13 = vld [vmem:[%s2606_s0 + $0xf4] ss:$8 sps:$4 sm:$0xff]  }
  0x2b   :  { %681 = vmatprep.subr.bf16.mxu0 %v2147_v0  ;;  %2013 = vmatprep.subr.bf16.mxu1 %v2147_v0 }
  0x2e   :  { %682 = vmatpush1.bf16.msra.mxu0 %v2046_v14  ;;  %2029 = vmatpush1.bf16.msra.mxu1 %v2046_v14  ;;  %v2143_v14 = vld [vmem:[%s2606_s0 + $0x1f4] ss:$8 sps:$4 sm:$0xff]  }
  0x2f   :  { %683 = vmatprep.subr.bf16.mxu0 %v2147_v0  ;;  %2014 = vmatprep.subr.bf16.mxu1 %v2147_v0 }
  0x32   :  { %684 = vmatpush1.bf16.msra.mxu0 %v2047_v15  ;;  %2030 = vmatpush1.bf16.msra.mxu1 %v2047_v15  ;;  %v2145_v15 = vld [vmem:[%s2606_s0 + $0xf0] ss:$8 sps:$4 sm:$0xff]  }
  0x33   :  { %685 = vmatprep.subr.bf16.mxu0 %v2147_v0  ;;  %2015 = vmatprep.subr.bf16.mxu1 %v2147_v0 }
  0x36   :  { %686 = vmatpush1.bf16.msra.mxu0 %v2048_v16  ;;  %2031 = vmatpush1.bf16.msra.mxu1 %v2048_v16  ;;  %v2146_v16 = vld [vmem:[%s2606_s0 + $0x1f0] ss:$8 sps:$4 sm:$0xff]  }
  0x37   :  { %687 = vmatprep.subr.bf16.mxu0 %v2147_v0  ;;  %2016 = vmatprep.subr.bf16.mxu1 %v2147_v0 }
  0x3a   :  { %688 = vmatpush1.bf16.msra.mxu0 %v2049_v17  ;;  %2032 = vmatpush1.bf16.msra.mxu1 %v2049_v17  ;;  %v2443_v17 = vld [vmem:[%s2607_s2] ss:$0 sm:$0xff] }
  0x3b   :  { %689 = vmatprep.subr.bf16.mxu0 %v2147_v0  ;;  %2017 = vmatprep.subr.bf16.mxu1 %v2147_v0  ;;  %v2122_v0 = vld [vmem:[%s2606_s0 + $0x1b0] ss:$8 sps:$4 sm:$0xff]  }
  0x3e   :  { %690 = vmatpush1.bf16.msra.mxu0 %v2050_v18  ;;  %2033 = vmatpush1.bf16.msra.mxu1 %v2050_v18 }
  0x41   :  { %692 = vmatmul.mubr.bf16.vlgmr.msra.gmra.mrb[0].mxu0 %v2051_v19  ;;  %820 = vmatmul.mubr.bf16.vlgmr.msra.gmra.mrb[0].mxu1 %v2054_v20 }
  0x42   :  { %699 = vmatprep.mubr.bf16.mxu0 %v2057_v21  ;;  %827 = vmatprep.mubr.bf16.mxu1 %v2059_v22 }
  0x49   :  { %700 = vmatmul.mubr.bf16.gmra.mrb[4].mxu0 %v2061_v23  ;;  %828 = vmatmul.mubr.bf16.gmra.mrb[4].mxu1 %v2062_v24 }
  0x4a   :  { %707 = vmatprep.mubr.bf16.mxu0 %v2063_v25  ;;  %835 = vmatprep.mubr.bf16.mxu1 %v2065_v26 }
  0x51   :  { %708 = vmatmul.mubr.bf16.gmra.mrb[8].mxu0 %v2067_v27  ;;  %836 = vmatmul.mubr.bf16.gmra.mrb[8].mxu1 %v2068_v28 }
  0x52   :  { %715 = vmatprep.mubr.bf16.mxu0 %v2069_v29  ;;  %843 = vmatprep.mubr.bf16.mxu1 %v2071_v30 }
  0x59   :  { %716 = vmatmul.mubr.bf16.gmra.mrb[12].mxu0 %v2073_v31  ;;  %844 = vmatmul.mubr.bf16.gmra.mrb[12].mxu1 %v2074_v32 }
  0x5a   :  { %723 = vmatprep.mubr.bf16.mxu0 %v2075_v33  ;;  %851 = vmatprep.mubr.bf16.mxu1 %v2077_v34 }
  0x61   :  { %724 = vmatmul.mubr.bf16.gmra.mrb[16].mxu0 %v2079_v35  ;;  %852 = vmatmul.mubr.bf16.gmra.mrb[16].mxu1 %v2080_v36 }
  0x62   :  { %731 = vmatprep.mubr.bf16.mxu0 %v2081_v37  ;;  %859 = vmatprep.mubr.bf16.mxu1 %v2083_v38 }
  0x69   :  { %732 = vmatmul.mubr.bf16.gmra.mrb[20].mxu0 %v2085_v39  ;;  %860 = vmatmul.mubr.bf16.gmra.mrb[20].mxu1 %v2086_v40 }
  0x6a   :  { %739 = vmatprep.mubr.bf16.mxu0 %v2087_v41  ;;  %867 = vmatprep.mubr.bf16.mxu1 %v2089_v42 }
  0x71   :  { %740 = vmatmul.mubr.bf16.gmra.mrb[24].mxu0 %v2091_v43  ;;  %868 = vmatmul.mubr.bf16.gmra.mrb[24].mxu1 %v2092_v44 }
  0x72   :  { %747 = vmatprep.mubr.bf16.mxu0 %v2093_v45  ;;  %875 = vmatprep.mubr.bf16.mxu1 %v2095_v46 }
  0x79   :  { %748 = vmatmul.mubr.bf16.gmra.mrb[28].mxu0 %v2097_v47  ;;  %876 = vmatmul.mubr.bf16.gmra.mrb[28].mxu1 %v2098_v48 }
  0x7a   :  { %755 = vmatprep.mubr.bf16.mxu0 %v2099_v49  ;;  %883 = vmatprep.mubr.bf16.mxu1 %v2101_v50 }
  0x81   :  { %756 = vmatmul.mubr.bf16.gmra.mrb[32].mxu0 %v2103_v51  ;;  %884 = vmatmul.mubr.bf16.gmra.mrb[32].mxu1 %v2104_v52 }
  0x82   :  { %763 = vmatprep.mubr.bf16.mxu0 %v2105_v53  ;;  %891 = vmatprep.mubr.bf16.mxu1 %v2107_v54 }
  0x89   :  { %764 = vmatmul.mubr.bf16.gmra.mrb[36].mxu0 %v2109_v55  ;;  %892 = vmatmul.mubr.bf16.gmra.mrb[36].mxu1 %v2110_v56 }
  0x8a   :  { %771 = vmatprep.mubr.bf16.mxu0 %v2111_v57  ;;  %899 = vmatprep.mubr.bf16.mxu1 %v2113_v58 }
  0x91   :  { %772 = vmatmul.mubr.bf16.gmra.mrb[40].mxu0 %v2115_v59  ;;  %900 = vmatmul.mubr.bf16.gmra.mrb[40].mxu1 %v2116_v60 }
  0x92   :  { %779 = vmatprep.mubr.bf16.mxu0 %v2117_v61  ;;  %907 = vmatprep.mubr.bf16.mxu1 %v2119_v62 }
  0x99   :  { %780 = vmatmul.mubr.bf16.gmra.mrb[44].mxu0 %v2121_v63  ;;  %908 = vmatmul.mubr.bf16.gmra.mrb[44].mxu1 %v2122_v0 }
  0x9a   :  { %787 = vmatprep.mubr.bf16.mxu0 %v2123_v1  ;;  %915 = vmatprep.mubr.bf16.mxu1 %v2125_v2 }
  0xa1   :  { %788 = vmatmul.mubr.bf16.gmra.mrb[48].mxu0 %v2127_v3  ;;  %916 = vmatmul.mubr.bf16.gmra.mrb[48].mxu1 %v2128_v4 }
  0xa2   :  { %795 = vmatprep.mubr.bf16.mxu0 %v2129_v5  ;;  %923 = vmatprep.mubr.bf16.mxu1 %v2131_v6 }
  0xa9   :  { %796 = vmatmul.mubr.bf16.gmra.mrb[52].mxu0 %v2133_v7  ;;  %924 = vmatmul.mubr.bf16.gmra.mrb[52].mxu1 %v2134_v8 }
  0xaa   :  { %803 = vmatprep.mubr.bf16.mxu0 %v2135_v9  ;;  %931 = vmatprep.mubr.bf16.mxu1 %v2137_v10 }
  0xb1   :  { %804 = vmatmul.mubr.bf16.gmra.mrb[56].mxu0 %v2139_v11  ;;  %932 = vmatmul.mubr.bf16.gmra.mrb[56].mxu1 %v2140_v12 }
  0xb2   :  { %811 = vmatprep.mubr.bf16.mxu0 %v2141_v13  ;;  %939 = vmatprep.mubr.bf16.mxu1 %v2143_v14 }
  0xb9   :  { %812 = vmatmul.mubr.bf16.gmra.mrb[60].mxu0 %v2145_v15  ;;  %940 = vmatmul.mubr.bf16.gmra.mrb[60].mxu1 %v2146_v16 }
 0x114   :  { %v693_v18 = vpop.f32.mrb[0].mxu0  ;;  %v821_v19 = vpop.f32.mrb[0].mxu1 }
 0x115   :  { %v1150_v20 = vadd.f32 %v2443_v17, %v693_v18  ;;  %v1182_v21 = vadd.f32 %v2443_v17, %v821_v19  ;;  %v695_v22 = vpop.f32.mrb[1].mxu0  ;;  %v823_v23 = vpop.f32.mrb[1].mxu1 }
 0x116   :  { %v696_v24 = vpop.f32.mrb[2].mxu0  ;;  %v824_v25 = vpop.f32.mrb[2].mxu1 }
 0x117   :  { %v1151_v26 = vadd.f32 %v2443_v17, %v696_v24  ;;  %v1183_v27 = vadd.f32 %v2443_v17, %v824_v25  ;;  %v698_v28 = vpop.f32.mrb[3].mxu0  ;;  %v826_v29 = vpop.f32.mrb[3].mxu1  ;;  %v1214_v30 = vmax.f32 %v1150_v20, 0.0  ;;  %v1246_v31 = vmax.f32 %v1182_v21, 0.0 }
 0x119   :  { %v1215_v32 = vmax.f32 %v1151_v26, 0.0  ;;  %v1247_v33 = vmax.f32 %v1183_v27, 0.0 }
 0x11b   :  { %v1814_v34 = vpack.c.bf16 %v1215_v32, %v1214_v30  ;;  %v1894_v35 = vpack.c.bf16 %v1247_v33, %v1246_v31 }
 0x11c   :  { %v701_v36 = vpop.f32.mrb[4].mxu0  ;;  %v829_v37 = vpop.f32.mrb[4].mxu1 }
 0x11d   :  { %1815 = vst [vmem:[%s2608_s3] sm:$0xff] %v1814_v34   ;;  %1986 = vst [vmem:[%s2608_s3 + $0x80] sm:$0xff] %v1894_v35   ;;  %v1152_v38 = vadd.f32 %v2443_v17, %v701_v36  ;;  %v1184_v39 = vadd.f32 %v2443_v17, %v829_v37  ;;  %v703_v40 = vpop.f32.mrb[5].mxu0  ;;  %v831_v41 = vpop.f32.mrb[5].mxu1 }
 0x11e   :  { %v704_v42 = vpop.f32.mrb[6].mxu0  ;;  %v832_v43 = vpop.f32.mrb[6].mxu1 }
 0x11f   :  { %v1153_v44 = vadd.f32 %v2443_v17, %v704_v42  ;;  %v1185_v45 = vadd.f32 %v2443_v17, %v832_v43  ;;  %v706_v46 = vpop.f32.mrb[7].mxu0  ;;  %v834_v47 = vpop.f32.mrb[7].mxu1  ;;  %v1216_v48 = vmax.f32 %v1152_v38, 0.0  ;;  %v1248_v49 = vmax.f32 %v1184_v39, 0.0 }
 0x121   :  { %v1217_v50 = vmax.f32 %v1153_v44, 0.0  ;;  %v1249_v51 = vmax.f32 %v1185_v45, 0.0 }
 0x123   :  { %v1819_v52 = vpack.c.bf16 %v1217_v50, %v1216_v48  ;;  %v1899_v53 = vpack.c.bf16 %v1249_v51, %v1248_v49 }
 0x124   :  { %v709_v54 = vpop.f32.mrb[8].mxu0  ;;  %v837_v55 = vpop.f32.mrb[8].mxu1 }
 0x125   :  { %1971 = vst [vmem:[%s2608_s3 + $0x8] sm:$0xff] %v1819_v52   ;;  %1987 = vst [vmem:[%s2608_s3 + $0x88] sm:$0xff] %v1899_v53   ;;  %v1154_v56 = vadd.f32 %v2443_v17, %v709_v54  ;;  %v1186_v57 = vadd.f32 %v2443_v17, %v837_v55  ;;  %v711_v58 = vpop.f32.mrb[9].mxu0  ;;  %v839_v59 = vpop.f32.mrb[9].mxu1 }
 0x126   :  { %v712_v60 = vpop.f32.mrb[10].mxu0  ;;  %v840_v61 = vpop.f32.mrb[10].mxu1 }
 0x127   :  { %v1155_v62 = vadd.f32 %v2443_v17, %v712_v60  ;;  %v1187_v63 = vadd.f32 %v2443_v17, %v840_v61  ;;  %v714_v0 = vpop.f32.mrb[11].mxu0  ;;  %v842_v1 = vpop.f32.mrb[11].mxu1  ;;  %v1218_v2 = vmax.f32 %v1154_v56, 0.0  ;;  %v1250_v3 = vmax.f32 %v1186_v57, 0.0 }
 0x129   :  { %v1219_v4 = vmax.f32 %v1155_v62, 0.0  ;;  %v1251_v5 = vmax.f32 %v1187_v63, 0.0 }
 0x12b   :  { %v1824_v6 = vpack.c.bf16 %v1219_v4, %v1218_v2  ;;  %v1904_v7 = vpack.c.bf16 %v1251_v5, %v1250_v3 }
 0x12c   :  { %v717_v8 = vpop.f32.mrb[12].mxu0  ;;  %v845_v9 = vpop.f32.mrb[12].mxu1 }
 0x12d   :  { %1972 = vst [vmem:[%s2608_s3 + $0x10] sm:$0xff] %v1824_v6   ;;  %1988 = vst [vmem:[%s2608_s3 + $0x90] sm:$0xff] %v1904_v7   ;;  %v1156_v10 = vadd.f32 %v2443_v17, %v717_v8  ;;  %v1188_v11 = vadd.f32 %v2443_v17, %v845_v9  ;;  %v719_v12 = vpop.f32.mrb[13].mxu0  ;;  %v847_v13 = vpop.f32.mrb[13].mxu1 }
 0x12e   :  { %v720_v14 = vpop.f32.mrb[14].mxu0  ;;  %v848_v15 = vpop.f32.mrb[14].mxu1 }
 0x12f   :  { %v1157_v16 = vadd.f32 %v2443_v17, %v720_v14  ;;  %v1189_v18 = vadd.f32 %v2443_v17, %v848_v15  ;;  %v722_v19 = vpop.f32.mrb[15].mxu0  ;;  %v850_v20 = vpop.f32.mrb[15].mxu1  ;;  %v1220_v21 = vmax.f32 %v1156_v10, 0.0  ;;  %v1252_v22 = vmax.f32 %v1188_v11, 0.0 }
 0x131   :  { %v1221_v23 = vmax.f32 %v1157_v16, 0.0  ;;  %v1253_v24 = vmax.f32 %v1189_v18, 0.0 }
 0x133   :  { %v1829_v25 = vpack.c.bf16 %v1221_v23, %v1220_v21  ;;  %v1909_v26 = vpack.c.bf16 %v1253_v24, %v1252_v22 }
 0x134   :  { %v725_v27 = vpop.f32.mrb[16].mxu0  ;;  %v853_v28 = vpop.f32.mrb[16].mxu1 }
 0x135   :  { %1973 = vst [vmem:[%s2608_s3 + $0x18] sm:$0xff] %v1829_v25   ;;  %1989 = vst [vmem:[%s2608_s3 + $0x98] sm:$0xff] %v1909_v26   ;;  %v1158_v29 = vadd.f32 %v2443_v17, %v725_v27  ;;  %v1190_v30 = vadd.f32 %v2443_v17, %v853_v28  ;;  %v727_v31 = vpop.f32.mrb[17].mxu0  ;;  %v855_v32 = vpop.f32.mrb[17].mxu1 }
 0x136   :  { %v728_v33 = vpop.f32.mrb[18].mxu0  ;;  %v856_v34 = vpop.f32.mrb[18].mxu1 }
 0x137   :  { %v1159_v35 = vadd.f32 %v2443_v17, %v728_v33  ;;  %v1191_v36 = vadd.f32 %v2443_v17, %v856_v34  ;;  %v730_v37 = vpop.f32.mrb[19].mxu0  ;;  %v858_v38 = vpop.f32.mrb[19].mxu1  ;;  %v1222_v39 = vmax.f32 %v1158_v29, 0.0  ;;  %v1254_v40 = vmax.f32 %v1190_v30, 0.0 }
 0x139   :  { %v1223_v41 = vmax.f32 %v1159_v35, 0.0  ;;  %v1255_v42 = vmax.f32 %v1191_v36, 0.0 }
 0x13b   :  { %v1834_v43 = vpack.c.bf16 %v1223_v41, %v1222_v39  ;;  %v1914_v44 = vpack.c.bf16 %v1255_v42, %v1254_v40 }
 0x13c   :  { %v733_v45 = vpop.f32.mrb[20].mxu0  ;;  %v861_v46 = vpop.f32.mrb[20].mxu1 }
 0x13d   :  { %1974 = vst [vmem:[%s2608_s3 + $0x20] sm:$0xff] %v1834_v43   ;;  %1990 = vst [vmem:[%s2608_s3 + $0xa0] sm:$0xff] %v1914_v44   ;;  %v1160_v47 = vadd.f32 %v2443_v17, %v733_v45  ;;  %v1192_v48 = vadd.f32 %v2443_v17, %v861_v46  ;;  %v735_v49 = vpop.f32.mrb[21].mxu0  ;;  %v863_v50 = vpop.f32.mrb[21].mxu1 }
 0x13e   :  { %v736_v51 = vpop.f32.mrb[22].mxu0  ;;  %v864_v52 = vpop.f32.mrb[22].mxu1 }
 0x13f   :  { %v1161_v53 = vadd.f32 %v2443_v17, %v736_v51  ;;  %v1193_v54 = vadd.f32 %v2443_v17, %v864_v52  ;;  %v738_v55 = vpop.f32.mrb[23].mxu0  ;;  %v866_v56 = vpop.f32.mrb[23].mxu1  ;;  %v1224_v57 = vmax.f32 %v1160_v47, 0.0  ;;  %v1256_v58 = vmax.f32 %v1192_v48, 0.0 }
 0x141   :  { %v1225_v59 = vmax.f32 %v1161_v53, 0.0  ;;  %v1257_v60 = vmax.f32 %v1193_v54, 0.0 }
 0x143   :  { %v1839_v61 = vpack.c.bf16 %v1225_v59, %v1224_v57  ;;  %v1919_v62 = vpack.c.bf16 %v1257_v60, %v1256_v58 }
 0x144   :  { %v741_v63 = vpop.f32.mrb[24].mxu0  ;;  %v869_v0 = vpop.f32.mrb[24].mxu1 }
 0x145   :  { %1975 = vst [vmem:[%s2608_s3 + $0x28] sm:$0xff] %v1839_v61   ;;  %1991 = vst [vmem:[%s2608_s3 + $0xa8] sm:$0xff] %v1919_v62   ;;  %v1162_v1 = vadd.f32 %v2443_v17, %v741_v63  ;;  %v1194_v2 = vadd.f32 %v2443_v17, %v869_v0  ;;  %v743_v3 = vpop.f32.mrb[25].mxu0  ;;  %v871_v4 = vpop.f32.mrb[25].mxu1 }
 0x146   :  { %v744_v5 = vpop.f32.mrb[26].mxu0  ;;  %v872_v6 = vpop.f32.mrb[26].mxu1 }
 0x147   :  { %v1163_v7 = vadd.f32 %v2443_v17, %v744_v5  ;;  %v1195_v8 = vadd.f32 %v2443_v17, %v872_v6  ;;  %v746_v9 = vpop.f32.mrb[27].mxu0  ;;  %v874_v10 = vpop.f32.mrb[27].mxu1  ;;  %v1226_v11 = vmax.f32 %v1162_v1, 0.0  ;;  %v1258_v12 = vmax.f32 %v1194_v2, 0.0 }
 0x149   :  { %v1227_v13 = vmax.f32 %v1163_v7, 0.0  ;;  %v1259_v14 = vmax.f32 %v1195_v8, 0.0 }
 0x14b   :  { %v1844_v15 = vpack.c.bf16 %v1227_v13, %v1226_v11  ;;  %v1924_v16 = vpack.c.bf16 %v1259_v14, %v1258_v12 }
 0x14c   :  { %v749_v18 = vpop.f32.mrb[28].mxu0  ;;  %v877_v19 = vpop.f32.mrb[28].mxu1 }
 0x14d   :  { %1976 = vst [vmem:[%s2608_s3 + $0x30] sm:$0xff] %v1844_v15   ;;  %1992 = vst [vmem:[%s2608_s3 + $0xb0] sm:$0xff] %v1924_v16   ;;  %v1164_v20 = vadd.f32 %v2443_v17, %v749_v18  ;;  %v1196_v21 = vadd.f32 %v2443_v17, %v877_v19  ;;  %v751_v22 = vpop.f32.mrb[29].mxu0  ;;  %v879_v23 = vpop.f32.mrb[29].mxu1 }
 0x14e   :  { %v752_v24 = vpop.f32.mrb[30].mxu0  ;;  %v880_v25 = vpop.f32.mrb[30].mxu1 }
 0x14f   :  { %v1165_v26 = vadd.f32 %v2443_v17, %v752_v24  ;;  %v1197_v27 = vadd.f32 %v2443_v17, %v880_v25  ;;  %v754_v28 = vpop.f32.mrb[31].mxu0  ;;  %v882_v29 = vpop.f32.mrb[31].mxu1  ;;  %v1228_v30 = vmax.f32 %v1164_v20, 0.0  ;;  %v1260_v31 = vmax.f32 %v1196_v21, 0.0 }
 0x151   :  { %v1229_v32 = vmax.f32 %v1165_v26, 0.0  ;;  %v1261_v33 = vmax.f32 %v1197_v27, 0.0 }
 0x153   :  { %v1849_v34 = vpack.c.bf16 %v1229_v32, %v1228_v30  ;;  %v1929_v35 = vpack.c.bf16 %v1261_v33, %v1260_v31 }
 0x154   :  { %v757_v36 = vpop.f32.mrb[32].mxu0  ;;  %v885_v37 = vpop.f32.mrb[32].mxu1 }
 0x155   :  { %1977 = vst [vmem:[%s2608_s3 + $0x38] sm:$0xff] %v1849_v34   ;;  %1993 = vst [vmem:[%s2608_s3 + $0xb8] sm:$0xff] %v1929_v35   ;;  %v1166_v38 = vadd.f32 %v2443_v17, %v757_v36  ;;  %v1198_v39 = vadd.f32 %v2443_v17, %v885_v37  ;;  %v759_v40 = vpop.f32.mrb[33].mxu0  ;;  %v887_v41 = vpop.f32.mrb[33].mxu1 }
 0x156   :  { %v760_v42 = vpop.f32.mrb[34].mxu0  ;;  %v888_v43 = vpop.f32.mrb[34].mxu1 }
 0x157   :  { %v1167_v44 = vadd.f32 %v2443_v17, %v760_v42  ;;  %v1199_v45 = vadd.f32 %v2443_v17, %v888_v43  ;;  %v762_v46 = vpop.f32.mrb[35].mxu0  ;;  %v890_v47 = vpop.f32.mrb[35].mxu1  ;;  %v1230_v48 = vmax.f32 %v1166_v38, 0.0  ;;  %v1262_v49 = vmax.f32 %v1198_v39, 0.0 }
 0x159   :  { %v1231_v50 = vmax.f32 %v1167_v44, 0.0  ;;  %v1263_v51 = vmax.f32 %v1199_v45, 0.0 }
 0x15b   :  { %v1854_v52 = vpack.c.bf16 %v1231_v50, %v1230_v48  ;;  %v1934_v53 = vpack.c.bf16 %v1263_v51, %v1262_v49 }
 0x15c   :  { %v765_v54 = vpop.f32.mrb[36].mxu0  ;;  %v893_v55 = vpop.f32.mrb[36].mxu1 }
 0x15d   :  { %1978 = vst [vmem:[%s2608_s3 + $0x40] sm:$0xff] %v1854_v52   ;;  %1994 = vst [vmem:[%s2608_s3 + $0xc0] sm:$0xff] %v1934_v53   ;;  %v1168_v56 = vadd.f32 %v2443_v17, %v765_v54  ;;  %v1200_v57 = vadd.f32 %v2443_v17, %v893_v55  ;;  %v767_v58 = vpop.f32.mrb[37].mxu0  ;;  %v895_v59 = vpop.f32.mrb[37].mxu1 }
 0x15e   :  { %v768_v60 = vpop.f32.mrb[38].mxu0  ;;  %v896_v61 = vpop.f32.mrb[38].mxu1 }
 0x15f   :  { %v1169_v62 = vadd.f32 %v2443_v17, %v768_v60  ;;  %v1201_v63 = vadd.f32 %v2443_v17, %v896_v61  ;;  %v770_v0 = vpop.f32.mrb[39].mxu0  ;;  %v898_v1 = vpop.f32.mrb[39].mxu1  ;;  %v1232_v2 = vmax.f32 %v1168_v56, 0.0  ;;  %v1264_v3 = vmax.f32 %v1200_v57, 0.0 }
 0x161   :  { %v1233_v4 = vmax.f32 %v1169_v62, 0.0  ;;  %v1265_v5 = vmax.f32 %v1201_v63, 0.0 }
 0x163   :  { %v1859_v6 = vpack.c.bf16 %v1233_v4, %v1232_v2  ;;  %v1939_v7 = vpack.c.bf16 %v1265_v5, %v1264_v3 }
 0x164   :  { %v773_v8 = vpop.f32.mrb[40].mxu0  ;;  %v901_v9 = vpop.f32.mrb[40].mxu1 }
 0x165   :  { %1979 = vst [vmem:[%s2608_s3 + $0x48] sm:$0xff] %v1859_v6   ;;  %1995 = vst [vmem:[%s2608_s3 + $0xc8] sm:$0xff] %v1939_v7   ;;  %v1170_v10 = vadd.f32 %v2443_v17, %v773_v8  ;;  %v1202_v11 = vadd.f32 %v2443_v17, %v901_v9  ;;  %v775_v12 = vpop.f32.mrb[41].mxu0  ;;  %v903_v13 = vpop.f32.mrb[41].mxu1 }
 0x166   :  { %v776_v14 = vpop.f32.mrb[42].mxu0  ;;  %v904_v15 = vpop.f32.mrb[42].mxu1 }
 0x167   :  { %v1171_v16 = vadd.f32 %v2443_v17, %v776_v14  ;;  %v1203_v18 = vadd.f32 %v2443_v17, %v904_v15  ;;  %v778_v19 = vpop.f32.mrb[43].mxu0  ;;  %v906_v20 = vpop.f32.mrb[43].mxu1  ;;  %v1234_v21 = vmax.f32 %v1170_v10, 0.0  ;;  %v1266_v22 = vmax.f32 %v1202_v11, 0.0 }
 0x169   :  { %v1235_v23 = vmax.f32 %v1171_v16, 0.0  ;;  %v1267_v24 = vmax.f32 %v1203_v18, 0.0 }
 0x16b   :  { %v1864_v25 = vpack.c.bf16 %v1235_v23, %v1234_v21  ;;  %v1944_v26 = vpack.c.bf16 %v1267_v24, %v1266_v22 }
 0x16c   :  { %v781_v27 = vpop.f32.mrb[44].mxu0  ;;  %v909_v28 = vpop.f32.mrb[44].mxu1 }
 0x16d   :  { %1980 = vst [vmem:[%s2608_s3 + $0x50] sm:$0xff] %v1864_v25   ;;  %1996 = vst [vmem:[%s2608_s3 + $0xd0] sm:$0xff] %v1944_v26   ;;  %v1172_v29 = vadd.f32 %v2443_v17, %v781_v27  ;;  %v1204_v30 = vadd.f32 %v2443_v17, %v909_v28  ;;  %v783_v31 = vpop.f32.mrb[45].mxu0  ;;  %v911_v32 = vpop.f32.mrb[45].mxu1 }
 0x16e   :  { %v784_v33 = vpop.f32.mrb[46].mxu0  ;;  %v912_v34 = vpop.f32.mrb[46].mxu1 }
 0x16f   :  { %v1173_v35 = vadd.f32 %v2443_v17, %v784_v33  ;;  %v1205_v36 = vadd.f32 %v2443_v17, %v912_v34  ;;  %v786_v37 = vpop.f32.mrb[47].mxu0  ;;  %v914_v38 = vpop.f32.mrb[47].mxu1  ;;  %v1236_v39 = vmax.f32 %v1172_v29, 0.0  ;;  %v1268_v40 = vmax.f32 %v1204_v30, 0.0 }
 0x171   :  { %v1237_v41 = vmax.f32 %v1173_v35, 0.0  ;;  %v1269_v42 = vmax.f32 %v1205_v36, 0.0 }
 0x173   :  { %v1869_v43 = vpack.c.bf16 %v1237_v41, %v1236_v39  ;;  %v1949_v44 = vpack.c.bf16 %v1269_v42, %v1268_v40 }
 0x174   :  { %v789_v45 = vpop.f32.mrb[48].mxu0  ;;  %v917_v46 = vpop.f32.mrb[48].mxu1 }
 0x175   :  { %1981 = vst [vmem:[%s2608_s3 + $0x58] sm:$0xff] %v1869_v43   ;;  %1997 = vst [vmem:[%s2608_s3 + $0xd8] sm:$0xff] %v1949_v44   ;;  %v1174_v47 = vadd.f32 %v2443_v17, %v789_v45  ;;  %v1206_v48 = vadd.f32 %v2443_v17, %v917_v46  ;;  %v791_v49 = vpop.f32.mrb[49].mxu0  ;;  %v919_v50 = vpop.f32.mrb[49].mxu1 }
 0x176   :  { %v792_v51 = vpop.f32.mrb[50].mxu0  ;;  %v920_v52 = vpop.f32.mrb[50].mxu1 }
 0x177   :  { %v1175_v53 = vadd.f32 %v2443_v17, %v792_v51  ;;  %v1207_v54 = vadd.f32 %v2443_v17, %v920_v52  ;;  %v794_v55 = vpop.f32.mrb[51].mxu0  ;;  %v922_v56 = vpop.f32.mrb[51].mxu1  ;;  %v1238_v57 = vmax.f32 %v1174_v47, 0.0  ;;  %v1270_v58 = vmax.f32 %v1206_v48, 0.0 }
 0x179   :  { %v1239_v59 = vmax.f32 %v1175_v53, 0.0  ;;  %v1271_v60 = vmax.f32 %v1207_v54, 0.0 }
 0x17b   :  { %v1874_v61 = vpack.c.bf16 %v1239_v59, %v1238_v57  ;;  %v1954_v62 = vpack.c.bf16 %v1271_v60, %v1270_v58 }
 0x17c   :  { %v797_v63 = vpop.f32.mrb[52].mxu0  ;;  %v925_v0 = vpop.f32.mrb[52].mxu1 }
 0x17d   :  { %1982 = vst [vmem:[%s2608_s3 + $0x60] sm:$0xff] %v1874_v61   ;;  %1998 = vst [vmem:[%s2608_s3 + $0xe0] sm:$0xff] %v1954_v62   ;;  %v1176_v1 = vadd.f32 %v2443_v17, %v797_v63  ;;  %v1208_v2 = vadd.f32 %v2443_v17, %v925_v0  ;;  %v799_v3 = vpop.f32.mrb[53].mxu0  ;;  %v927_v4 = vpop.f32.mrb[53].mxu1 }
 0x17e   :  { %v800_v5 = vpop.f32.mrb[54].mxu0  ;;  %v928_v6 = vpop.f32.mrb[54].mxu1 }
 0x17f   :  { %v1177_v7 = vadd.f32 %v2443_v17, %v800_v5  ;;  %v1209_v8 = vadd.f32 %v2443_v17, %v928_v6  ;;  %v802_v9 = vpop.f32.mrb[55].mxu0  ;;  %v930_v10 = vpop.f32.mrb[55].mxu1  ;;  %v1240_v11 = vmax.f32 %v1176_v1, 0.0  ;;  %v1272_v12 = vmax.f32 %v1208_v2, 0.0 }
 0x181   :  { %v1241_v13 = vmax.f32 %v1177_v7, 0.0  ;;  %v1273_v14 = vmax.f32 %v1209_v8, 0.0 }
 0x183   :  { %v1879_v15 = vpack.c.bf16 %v1241_v13, %v1240_v11  ;;  %v1959_v16 = vpack.c.bf16 %v1273_v14, %v1272_v12 }
 0x184   :  { %v805_v18 = vpop.f32.mrb[56].mxu0  ;;  %v933_v19 = vpop.f32.mrb[56].mxu1 }
 0x185   :  { %1983 = vst [vmem:[%s2608_s3 + $0x68] sm:$0xff] %v1879_v15   ;;  %1999 = vst [vmem:[%s2608_s3 + $0xe8] sm:$0xff] %v1959_v16   ;;  %v1178_v20 = vadd.f32 %v2443_v17, %v805_v18  ;;  %v1210_v21 = vadd.f32 %v2443_v17, %v933_v19  ;;  %v807_v22 = vpop.f32.mrb[57].mxu0  ;;  %v935_v23 = vpop.f32.mrb[57].mxu1 }
 0x186   :  { %v808_v24 = vpop.f32.mrb[58].mxu0  ;;  %v936_v25 = vpop.f32.mrb[58].mxu1 }
 0x187   :  { %v1179_v26 = vadd.f32 %v2443_v17, %v808_v24  ;;  %v1211_v27 = vadd.f32 %v2443_v17, %v936_v25  ;;  %v810_v28 = vpop.f32.mrb[59].mxu0  ;;  %v938_v29 = vpop.f32.mrb[59].mxu1  ;;  %v1242_v30 = vmax.f32 %v1178_v20, 0.0  ;;  %v1274_v31 = vmax.f32 %v1210_v21, 0.0 }
 0x189   :  { %v1243_v32 = vmax.f32 %v1179_v26, 0.0  ;;  %v1275_v33 = vmax.f32 %v1211_v27, 0.0 }
 0x18b   :  { %v1884_v34 = vpack.c.bf16 %v1243_v32, %v1242_v30  ;;  %v1964_v35 = vpack.c.bf16 %v1275_v33, %v1274_v31 }
 0x18c   :  { %v813_v36 = vpop.f32.mrb[60].mxu0  ;;  %v941_v37 = vpop.f32.mrb[60].mxu1 }
 0x18d   :  { %1984 = vst [vmem:[%s2608_s3 + $0x70] sm:$0xff] %v1884_v34   ;;  %2000 = vst [vmem:[%s2608_s3 + $0xf0] sm:$0xff] %v1964_v35   ;;  %v1180_v38 = vadd.f32 %v2443_v17, %v813_v36  ;;  %v1212_v39 = vadd.f32 %v2443_v17, %v941_v37  ;;  %v815_v40 = vpop.f32.mrb[61].mxu0  ;;  %v943_v41 = vpop.f32.mrb[61].mxu1 }
 0x18e   :  { %v816_v42 = vpop.f32.mrb[62].mxu0  ;;  %v944_v43 = vpop.f32.mrb[62].mxu1 }
 0x18f   :  { %v1181_v44 = vadd.f32 %v2443_v17, %v816_v42  ;;  %v1213_v45 = vadd.f32 %v2443_v17, %v944_v43  ;;  %v818_v46 = vpop.f32.mrb[63].mxu0  ;;  %v946_v47 = vpop.f32.mrb[63].mxu1  ;;  %v1244_v48 = vmax.f32 %v1180_v38, 0.0  ;;  %v1276_v49 = vmax.f32 %v1212_v39, 0.0 }
 0x191   :  { %v1245_v50 = vmax.f32 %v1181_v44, 0.0  ;;  %v1277_v51 = vmax.f32 %v1213_v45, 0.0 }
 0x193   :  { %v1889_v52 = vpack.c.bf16 %v1245_v50, %v1244_v48  ;;  %v1969_v53 = vpack.c.bf16 %v1277_v51, %v1276_v49 }
 0x195   :  { %1985 = vst [vmem:[%s2608_s3 + $0x78] sm:$0xff] %v1889_v52   ;;  %2001 = vst [vmem:[%s2608_s3 + $0xf8] sm:$0xff] %v1969_v53  }

// kernel: _lambda_.33
= control target key start
LH: loop header
LB: loop body
LE: loop exit
PB: predicated region body
PF: predicated region fallthrough
CT: control target
= control target key end

     0   :  { %s721_s1 = inlined_call_operand.vmem [shape: bf16[128,128], index: 1, kind: input, shape index: {}]   ;;  %s722_s0 = inlined_call_operand.vmem [shape: bf16[128,128], index: 0, kind: input, shape index: {}]   ;;  %s723_s2 = inlined_call_operand.vmem [shape: f32[1,128], index: 2, kind: input, shape index: {}]   ;;  %s724_s3 = inlined_call_operand.vmem [shape: bf16[128,128], index: 3, kind: output, shape index: {}]  }
   0x1   :  { %v610_v0 = vld [vmem:[%s721_s1] sm:$0xff]   ;;  %v611_v1 = vld [vmem:[%s721_s1 + $0x8] sm:$0xff]   ;;  %v612_v2 = vld [vmem:[%s721_s1 + $0x10] sm:$0xff]  }
   0x2   :  { %562 = vmatprep.subr.bf16.mxu0 %v610_v0  ;;  %594 = vmatprep.subr.bf16.mxu1 %v610_v0  ;;  %v613_v3 = vld [vmem:[%s721_s1 + $0x18] sm:$0xff]   ;;  %v618_v4 = vld [vmem:[%s722_s0] sm:$0xff]   ;;  %v615_v7 = vld [vmem:[%s721_s1 + $0x28] sm:$0xff]  }
   0x3   :  { %563 = vmatpush3.bf16.msra.mxu0 %v610_v0  ;;  %602 = vmatpush3.bf16.msra.mxu1 %v610_v0  ;;  %v619_v5 = vld [vmem:[%s722_s0 + $0x20] sm:$0xff]   ;;  %v616_v8 = vld [vmem:[%s721_s1 + $0x30] sm:$0xff]   ;;  %v617_v9 = vld [vmem:[%s721_s1 + $0x38] sm:$0xff]  }
   0x4   :  { %564 = vmatprep.subr.bf16.mxu0 %v611_v1  ;;  %595 = vmatprep.subr.bf16.mxu1 %v611_v1  ;;  %v614_v6 = vld [vmem:[%s721_s1 + $0x20] sm:$0xff]   ;;  %v620_v10 = vld [vmem:[%s722_s0 + $0x8] sm:$0xff]   ;;  %v622_v12 = vld [vmem:[%s722_s0 + $0x10] sm:$0xff]  }
   0x5   :  { %578 = vmatprep.mubr.bf16.mxu0 %v618_v4  ;;  %586 = vmatprep.mubr.bf16.mxu1 %v619_v5  ;;  %v621_v11 = vld [vmem:[%s722_s0 + $0x28] sm:$0xff]   ;;  %v623_v13 = vld [vmem:[%s722_s0 + $0x30] sm:$0xff]   ;;  %v624_v14 = vld [vmem:[%s722_s0 + $0x18] sm:$0xff]  }
   0x6   :  { %v625_v15 = vld [vmem:[%s722_s0 + $0x38] sm:$0xff]   ;;  %v466_v16 = vld [vmem:[%s723_s2] ss:$0 sm:$0xff] }
   0x7   :  { %565 = vmatpush3.bf16.msra.mxu0 %v611_v1  ;;  %603 = vmatpush3.bf16.msra.mxu1 %v611_v1 }
   0x8   :  { %566 = vmatprep.subr.bf16.mxu0 %v612_v2  ;;  %596 = vmatprep.subr.bf16.mxu1 %v612_v2 }
   0xb   :  { %567 = vmatpush3.bf16.msra.mxu0 %v612_v2  ;;  %604 = vmatpush3.bf16.msra.mxu1 %v612_v2 }
   0xc   :  { %568 = vmatprep.subr.bf16.mxu0 %v613_v3  ;;  %597 = vmatprep.subr.bf16.mxu1 %v613_v3 }
   0xf   :  { %569 = vmatpush3.bf16.msra.mxu0 %v613_v3  ;;  %605 = vmatpush3.bf16.msra.mxu1 %v613_v3 }
  0x10   :  { %570 = vmatprep.subr.bf16.mxu0 %v614_v6  ;;  %598 = vmatprep.subr.bf16.mxu1 %v614_v6 }
  0x13   :  { %571 = vmatpush3.bf16.msra.mxu0 %v614_v6  ;;  %606 = vmatpush3.bf16.msra.mxu1 %v614_v6 }
  0x14   :  { %572 = vmatprep.subr.bf16.mxu0 %v615_v7  ;;  %599 = vmatprep.subr.bf16.mxu1 %v615_v7 }
  0x17   :  { %573 = vmatpush3.bf16.msra.mxu0 %v615_v7  ;;  %607 = vmatpush3.bf16.msra.mxu1 %v615_v7 }
  0x18   :  { %574 = vmatprep.subr.bf16.mxu0 %v616_v8  ;;  %600 = vmatprep.subr.bf16.mxu1 %v616_v8 }
  0x1b   :  { %575 = vmatpush3.bf16.msra.mxu0 %v616_v8  ;;  %608 = vmatpush3.bf16.msra.mxu1 %v616_v8 }
  0x1c   :  { %576 = vmatprep.subr.bf16.mxu0 %v617_v9  ;;  %601 = vmatprep.subr.bf16.mxu1 %v617_v9 }
  0x1f   :  { %577 = vmatpush3.bf16.msra.mxu0 %v617_v9  ;;  %609 = vmatpush3.bf16.msra.mxu1 %v617_v9 }
  0x22   :  { %579 = vmatmul.mubr.bf16.vlgmr.msra.gmra.mrb[0].mxu0 %v620_v10  ;;  %587 = vmatmul.mubr.bf16.vlgmr.msra.gmra.mrb[0].mxu1 %v621_v11 }
  0x23   :  { %582 = vmatprep.mubr.bf16.mxu0 %v622_v12  ;;  %590 = vmatprep.mubr.bf16.mxu1 %v623_v13 }
  0x2a   :  { %583 = vmatmul.mubr.bf16.gmra.mrb[4].mxu0 %v624_v14  ;;  %591 = vmatmul.mubr.bf16.gmra.mrb[4].mxu1 %v625_v15 }
  0xf5   :  { %v580_v17 = vpop.f32.mrb[0].mxu0  ;;  %v588_v18 = vpop.f32.mrb[0].mxu1 }
  0xf6   :  { %v336_v19 = vadd.f32 %v580_v17, %v466_v16  ;;  %v344_v20 = vadd.f32 %v588_v18, %v466_v16  ;;  %v213_v21 = vpop.f32.mrb[1].mxu0  ;;  %v245_v22 = vpop.f32.mrb[1].mxu1 }
  0xf7   :  { %v334_v23 = vadd.f32 %v466_v16, %v213_v21  ;;  %v342_v24 = vadd.f32 %v466_v16, %v245_v22  ;;  %v581_v25 = vpop.f32.mrb[2].mxu0  ;;  %v589_v26 = vpop.f32.mrb[2].mxu1 }
  0xf8   :  { %v337_v27 = vadd.f32 %v581_v25, %v466_v16  ;;  %v345_v28 = vadd.f32 %v589_v26, %v466_v16  ;;  %v216_v29 = vpop.f32.mrb[3].mxu0  ;;  %v248_v30 = vpop.f32.mrb[3].mxu1  ;;  %v352_v33 = vmax.f32 %v336_v19, 0.0  ;;  %v360_v34 = vmax.f32 %v344_v20, 0.0 }
  0xf9   :  { %v335_v31 = vadd.f32 %v466_v16, %v216_v29  ;;  %v343_v32 = vadd.f32 %v466_v16, %v248_v30  ;;  %v350_v37 = vmax.f32 %v334_v23, 0.0  ;;  %v358_v38 = vmax.f32 %v342_v24, 0.0 }
  0xfa   :  { %v353_v35 = vmax.f32 %v337_v27, 0.0  ;;  %v361_v36 = vmax.f32 %v345_v28, 0.0 }
  0xfb   :  { %v351_v39 = vmax.f32 %v335_v31, 0.0  ;;  %v359_v40 = vmax.f32 %v343_v32, 0.0 }
  0xfc   :  { %v507_v41 = vpack.c.bf16 %v353_v35, %v352_v33  ;;  %v527_v42 = vpack.c.bf16 %v361_v36, %v360_v34 }
  0xfd   :  { %v502_v43 = vpack.c.bf16 %v351_v39, %v350_v37  ;;  %v522_v44 = vpack.c.bf16 %v359_v40, %v358_v38  ;;  %v584_v45 = vpop.f32.mrb[4].mxu0  ;;  %v592_v46 = vpop.f32.mrb[4].mxu1 }
  0xfe   :  { %539 = vst [vmem:[%s724_s3 + $0x8] sm:$0xff] %v507_v41   ;;  %543 = vst [vmem:[%s724_s3 + $0x28] sm:$0xff] %v527_v42   ;;  %v340_v47 = vadd.f32 %v584_v45, %v466_v16  ;;  %v348_v48 = vadd.f32 %v592_v46, %v466_v16  ;;  %v229_v49 = vpop.f32.mrb[5].mxu0  ;;  %v261_v50 = vpop.f32.mrb[5].mxu1 }
  0xff   :  { %503 = vst [vmem:[%s724_s3] sm:$0xff] %v502_v43   ;;  %542 = vst [vmem:[%s724_s3 + $0x20] sm:$0xff] %v522_v44   ;;  %v338_v51 = vadd.f32 %v466_v16, %v229_v49  ;;  %v346_v52 = vadd.f32 %v466_v16, %v261_v50  ;;  %v585_v53 = vpop.f32.mrb[6].mxu0  ;;  %v593_v54 = vpop.f32.mrb[6].mxu1 }
 0x100   :  { %v341_v55 = vadd.f32 %v585_v53, %v466_v16  ;;  %v349_v56 = vadd.f32 %v593_v54, %v466_v16  ;;  %v232_v57 = vpop.f32.mrb[7].mxu0  ;;  %v264_v58 = vpop.f32.mrb[7].mxu1  ;;  %v356_v61 = vmax.f32 %v340_v47, 0.0  ;;  %v364_v62 = vmax.f32 %v348_v48, 0.0 }
 0x101   :  { %v339_v59 = vadd.f32 %v466_v16, %v232_v57  ;;  %v347_v60 = vadd.f32 %v466_v16, %v264_v58  ;;  %v354_v1 = vmax.f32 %v338_v51, 0.0  ;;  %v362_v2 = vmax.f32 %v346_v52, 0.0 }
 0x102   :  { %v357_v63 = vmax.f32 %v341_v55, 0.0  ;;  %v365_v0 = vmax.f32 %v349_v56, 0.0 }
 0x103   :  { %v355_v3 = vmax.f32 %v339_v59, 0.0  ;;  %v363_v4 = vmax.f32 %v347_v60, 0.0 }
 0x104   :  { %v517_v5 = vpack.c.bf16 %v357_v63, %v356_v61  ;;  %v537_v6 = vpack.c.bf16 %v365_v0, %v364_v62 }
 0x105   :  { %v512_v7 = vpack.c.bf16 %v355_v3, %v354_v1  ;;  %v532_v8 = vpack.c.bf16 %v363_v4, %v362_v2 }
 0x106   :  { %541 = vst [vmem:[%s724_s3 + $0x18] sm:$0xff] %v517_v5   ;;  %545 = vst [vmem:[%s724_s3 + $0x38] sm:$0xff] %v537_v6  }
 0x107   :  { %540 = vst [vmem:[%s724_s3 + $0x10] sm:$0xff] %v512_v7   ;;  %544 = vst [vmem:[%s724_s3 + $0x30] sm:$0xff] %v532_v8  }

// kernel: _lambda_.35
= control target key start
LH: loop header
LB: loop body
LE: loop exit
PB: predicated region body
PF: predicated region fallthrough
CT: control target
= control target key end

     0   :  { %s705_s1 = inlined_call_operand.vmem [shape: bf16[128,128], index: 1, kind: input, shape index: {}]   ;;  %s706_s0 = inlined_call_operand.vmem [shape: bf16[128,128], index: 0, kind: input, shape index: {}]   ;;  %s707_s2 = inlined_call_operand.vmem [shape: f32[1,128], index: 2, kind: input, shape index: {}]   ;;  %s708_s3 = inlined_call_operand.vmem [shape: bf16[128,128], index: 3, kind: output, shape index: {}]  }
   0x1   :  { %v594_v0 = vld [vmem:[%s705_s1] sm:$0xff]   ;;  %v595_v1 = vld [vmem:[%s705_s1 + $0x8] sm:$0xff]   ;;  %v596_v2 = vld [vmem:[%s705_s1 + $0x10] sm:$0xff]  }
   0x2   :  { %546 = vmatprep.subr.bf16.mxu0 %v594_v0  ;;  %578 = vmatprep.subr.bf16.mxu1 %v594_v0  ;;  %v597_v3 = vld [vmem:[%s705_s1 + $0x18] sm:$0xff]   ;;  %v602_v4 = vld [vmem:[%s706_s0] sm:$0xff]   ;;  %v599_v7 = vld [vmem:[%s705_s1 + $0x28] sm:$0xff]  }
   0x3   :  { %547 = vmatpush3.bf16.msra.mxu0 %v594_v0  ;;  %586 = vmatpush3.bf16.msra.mxu1 %v594_v0  ;;  %v603_v5 = vld [vmem:[%s706_s0 + $0x20] sm:$0xff]   ;;  %v600_v8 = vld [vmem:[%s705_s1 + $0x30] sm:$0xff]   ;;  %v601_v9 = vld [vmem:[%s705_s1 + $0x38] sm:$0xff]  }
   0x4   :  { %548 = vmatprep.subr.bf16.mxu0 %v595_v1  ;;  %579 = vmatprep.subr.bf16.mxu1 %v595_v1  ;;  %v598_v6 = vld [vmem:[%s705_s1 + $0x20] sm:$0xff]   ;;  %v604_v10 = vld [vmem:[%s706_s0 + $0x8] sm:$0xff]   ;;  %v606_v12 = vld [vmem:[%s706_s0 + $0x10] sm:$0xff]  }
   0x5   :  { %562 = vmatprep.mubr.bf16.mxu0 %v602_v4  ;;  %570 = vmatprep.mubr.bf16.mxu1 %v603_v5  ;;  %v605_v11 = vld [vmem:[%s706_s0 + $0x28] sm:$0xff]   ;;  %v607_v13 = vld [vmem:[%s706_s0 + $0x30] sm:$0xff]   ;;  %v608_v14 = vld [vmem:[%s706_s0 + $0x18] sm:$0xff]  }
   0x6   :  { %v609_v15 = vld [vmem:[%s706_s0 + $0x38] sm:$0xff]   ;;  %v450_v17 = vld [vmem:[%s707_s2] ss:$0 sm:$0xff] }
   0x7   :  { %549 = vmatpush3.bf16.msra.mxu0 %v595_v1  ;;  %587 = vmatpush3.bf16.msra.mxu1 %v595_v1 }
   0x8   :  { %550 = vmatprep.subr.bf16.mxu0 %v596_v2  ;;  %580 = vmatprep.subr.bf16.mxu1 %v596_v2 }
   0xb   :  { %551 = vmatpush3.bf16.msra.mxu0 %v596_v2  ;;  %588 = vmatpush3.bf16.msra.mxu1 %v596_v2 }
   0xc   :  { %552 = vmatprep.subr.bf16.mxu0 %v597_v3  ;;  %581 = vmatprep.subr.bf16.mxu1 %v597_v3 }
   0xf   :  { %553 = vmatpush3.bf16.msra.mxu0 %v597_v3  ;;  %589 = vmatpush3.bf16.msra.mxu1 %v597_v3 }
  0x10   :  { %554 = vmatprep.subr.bf16.mxu0 %v598_v6  ;;  %582 = vmatprep.subr.bf16.mxu1 %v598_v6 }
  0x13   :  { %555 = vmatpush3.bf16.msra.mxu0 %v598_v6  ;;  %590 = vmatpush3.bf16.msra.mxu1 %v598_v6 }
  0x14   :  { %556 = vmatprep.subr.bf16.mxu0 %v599_v7  ;;  %583 = vmatprep.subr.bf16.mxu1 %v599_v7 }
  0x17   :  { %557 = vmatpush3.bf16.msra.mxu0 %v599_v7  ;;  %591 = vmatpush3.bf16.msra.mxu1 %v599_v7 }
  0x18   :  { %558 = vmatprep.subr.bf16.mxu0 %v600_v8  ;;  %584 = vmatprep.subr.bf16.mxu1 %v600_v8 }
  0x1b   :  { %559 = vmatpush3.bf16.msra.mxu0 %v600_v8  ;;  %592 = vmatpush3.bf16.msra.mxu1 %v600_v8 }
  0x1c   :  { %560 = vmatprep.subr.bf16.mxu0 %v601_v9  ;;  %585 = vmatprep.subr.bf16.mxu1 %v601_v9 }
  0x1f   :  { %561 = vmatpush3.bf16.msra.mxu0 %v601_v9  ;;  %593 = vmatpush3.bf16.msra.mxu1 %v601_v9 }
  0x22   :  { %563 = vmatmul.mubr.bf16.vlgmr.msra.gmra.mrb[0].mxu0 %v604_v10  ;;  %571 = vmatmul.mubr.bf16.vlgmr.msra.gmra.mrb[0].mxu1 %v605_v11 }
  0x23   :  { %566 = vmatprep.mubr.bf16.mxu0 %v606_v12  ;;  %574 = vmatprep.mubr.bf16.mxu1 %v607_v13 }
  0x2a   :  { %567 = vmatmul.mubr.bf16.gmra.mrb[4].mxu0 %v608_v14  ;;  %575 = vmatmul.mubr.bf16.gmra.mrb[4].mxu1 %v609_v15 }
  0xf5   :  { %v564_v16 = vpop.f32.mrb[0].mxu0  ;;  %v572_v18 = vpop.f32.mrb[0].mxu1 }
  0xf6   :  { %v213_v19 = vpop.f32.mrb[1].mxu0  ;;  %v245_v20 = vpop.f32.mrb[1].mxu1  ;;  %v336_v23 = vadd.f32 %v564_v16, %v450_v17  ;;  %v344_v24 = vadd.f32 %v572_v18, %v450_v17 }
  0xf7   :  { %v565_v21 = vpop.f32.mrb[2].mxu0  ;;  %v573_v22 = vpop.f32.mrb[2].mxu1  ;;  %v334_v29 = vadd.f32 %v450_v17, %v213_v19  ;;  %v342_v30 = vadd.f32 %v450_v17, %v245_v20 }
  0xf8   :  { %v337_v25 = vadd.f32 %v565_v21, %v450_v17  ;;  %v345_v26 = vadd.f32 %v573_v22, %v450_v17  ;;  %v216_v27 = vpop.f32.mrb[3].mxu0  ;;  %v248_v28 = vpop.f32.mrb[3].mxu1 }
  0xf9   :  { %v335_v31 = vadd.f32 %v450_v17, %v216_v27  ;;  %v343_v32 = vadd.f32 %v450_v17, %v248_v28 }
  0xfa   :  { %v491_v33 = vpack.c.bf16 %v337_v25, %v336_v23  ;;  %v511_v34 = vpack.c.bf16 %v345_v26, %v344_v24 }
  0xfb   :  { %v486_v35 = vpack.c.bf16 %v335_v31, %v334_v29  ;;  %v506_v36 = vpack.c.bf16 %v343_v32, %v342_v30 }
  0xfc   :  { %523 = vst [vmem:[%s708_s3 + $0x8] sm:$0xff] %v491_v33   ;;  %527 = vst [vmem:[%s708_s3 + $0x28] sm:$0xff] %v511_v34  }
  0xfd   :  { %487 = vst [vmem:[%s708_s3] sm:$0xff] %v486_v35   ;;  %526 = vst [vmem:[%s708_s3 + $0x20] sm:$0xff] %v506_v36   ;;  %v568_v37 = vpop.f32.mrb[4].mxu0  ;;  %v576_v38 = vpop.f32.mrb[4].mxu1 }
  0xfe   :  { %v229_v39 = vpop.f32.mrb[5].mxu0  ;;  %v261_v40 = vpop.f32.mrb[5].mxu1  ;;  %v340_v43 = vadd.f32 %v568_v37, %v450_v17  ;;  %v348_v44 = vadd.f32 %v576_v38, %v450_v17 }
  0xff   :  { %v569_v41 = vpop.f32.mrb[6].mxu0  ;;  %v577_v42 = vpop.f32.mrb[6].mxu1  ;;  %v338_v49 = vadd.f32 %v450_v17, %v229_v39  ;;  %v346_v50 = vadd.f32 %v450_v17, %v261_v40 }
 0x100   :  { %v341_v45 = vadd.f32 %v569_v41, %v450_v17  ;;  %v349_v46 = vadd.f32 %v577_v42, %v450_v17  ;;  %v232_v47 = vpop.f32.mrb[7].mxu0  ;;  %v264_v48 = vpop.f32.mrb[7].mxu1 }
 0x101   :  { %v339_v51 = vadd.f32 %v450_v17, %v232_v47  ;;  %v347_v52 = vadd.f32 %v450_v17, %v264_v48 }
 0x102   :  { %v501_v53 = vpack.c.bf16 %v341_v45, %v340_v43  ;;  %v521_v54 = vpack.c.bf16 %v349_v46, %v348_v44 }
 0x103   :  { %v496_v55 = vpack.c.bf16 %v339_v51, %v338_v49  ;;  %v516_v56 = vpack.c.bf16 %v347_v52, %v346_v50 }
 0x104   :  { %525 = vst [vmem:[%s708_s3 + $0x18] sm:$0xff] %v501_v53   ;;  %529 = vst [vmem:[%s708_s3 + $0x38] sm:$0xff] %v521_v54  }
 0x105   :  { %524 = vst [vmem:[%s708_s3 + $0x10] sm:$0xff] %v496_v55   ;;  %528 = vst [vmem:[%s708_s3 + $0x30] sm:$0xff] %v516_v56  }

// kernel: _lambda_.36
= control target key start
LH: loop header
LB: loop body
LE: loop exit
PB: predicated region body
PF: predicated region fallthrough
CT: control target
= control target key end

     0   :  { %s874_s1 = inlined_call_operand.vmem [shape: bf16[128,128], index: 1, kind: input, shape index: {}]   ;;  %s875_s0 = inlined_call_operand.vmem [shape: bf16[128,128], index: 0, kind: input, shape index: {}]   ;;  %s876_s3 = inlined_call_operand.vmem [shape: bf16[128,128], index: 3, kind: input, shape index: {}]   ;;  %s877_s2 = inlined_call_operand.vmem [shape: f32[1,128], index: 2, kind: input, shape index: {}]   ;;  %s878_s4 = inlined_call_operand.vmem [shape: bf16[128,128], index: 4, kind: output, shape index: {}]  }
   0x1   :  { %v700_v0 = vld [vmem:[%s874_s1] sm:$0xff]   ;;  %v701_v1 = vld [vmem:[%s874_s1 + $0x8] sm:$0xff]   ;;  %v702_v2 = vld [vmem:[%s874_s1 + $0x10] sm:$0xff]  }
   0x2   :  { %652 = vmatprep.subr.bf16.mxu0 %v700_v0  ;;  %684 = vmatprep.subr.bf16.mxu1 %v700_v0  ;;  %v703_v3 = vld [vmem:[%s874_s1 + $0x18] sm:$0xff]   ;;  %v708_v4 = vld [vmem:[%s875_s0] sm:$0xff]   ;;  %v705_v7 = vld [vmem:[%s874_s1 + $0x28] sm:$0xff]  }
   0x3   :  { %653 = vmatpush3.bf16.msra.mxu0 %v700_v0  ;;  %692 = vmatpush3.bf16.msra.mxu1 %v700_v0  ;;  %v709_v5 = vld [vmem:[%s875_s0 + $0x20] sm:$0xff]   ;;  %v706_v8 = vld [vmem:[%s874_s1 + $0x30] sm:$0xff]   ;;  %v707_v9 = vld [vmem:[%s874_s1 + $0x38] sm:$0xff]  }
   0x4   :  { %654 = vmatprep.subr.bf16.mxu0 %v701_v1  ;;  %685 = vmatprep.subr.bf16.mxu1 %v701_v1  ;;  %v704_v6 = vld [vmem:[%s874_s1 + $0x20] sm:$0xff]   ;;  %v710_v10 = vld [vmem:[%s875_s0 + $0x8] sm:$0xff]   ;;  %v712_v12 = vld [vmem:[%s875_s0 + $0x10] sm:$0xff]  }
   0x5   :  { %668 = vmatprep.mubr.bf16.mxu0 %v708_v4  ;;  %676 = vmatprep.mubr.bf16.mxu1 %v709_v5  ;;  %v711_v11 = vld [vmem:[%s875_s0 + $0x28] sm:$0xff]   ;;  %v713_v13 = vld [vmem:[%s875_s0 + $0x30] sm:$0xff]   ;;  %v714_v14 = vld [vmem:[%s875_s0 + $0x18] sm:$0xff]  }
   0x6   :  { %v715_v15 = vld [vmem:[%s875_s0 + $0x38] sm:$0xff]   ;;  %v622_v16 = vld [vmem:[%s876_s3 + $0x8] sm:$0xff]   ;;  %v551_v18 = vld [vmem:[%s876_s3] sm:$0xff]  }
   0x7   :  { %655 = vmatpush3.bf16.msra.mxu0 %v701_v1  ;;  %693 = vmatpush3.bf16.msra.mxu1 %v701_v1  ;;  %v626_v17 = vld [vmem:[%s876_s3 + $0x28] sm:$0xff]   ;;  %v625_v19 = vld [vmem:[%s876_s3 + $0x20] sm:$0xff]   ;;  %v809_v21 = vld [vmem:[%s876_s3 + $0x18] sm:$0xff]   ;;  %v556_v23 = vunpack.c.l.bf16 %v622_v16  ;;  %v552_v25 = vunpack.c.l.bf16 %v551_v18  ;;  %v557_v31 = vunpack.c.h.bf16 %v622_v16  ;;  %v553_v33 = vunpack.c.h.bf16 %v551_v18 }
   0x8   :  { %656 = vmatprep.subr.bf16.mxu0 %v702_v2  ;;  %686 = vmatprep.subr.bf16.mxu1 %v702_v2  ;;  %v804_v20 = vld [vmem:[%s877_s2] ss:$0 sm:$0xff]  ;;  %v814_v22 = vld [vmem:[%s876_s3 + $0x38] sm:$0xff]   ;;  %v572_v24 = vunpack.c.l.bf16 %v626_v17  ;;  %v568_v26 = vunpack.c.l.bf16 %v625_v19  ;;  %v819_v27 = vld [vmem:[%s876_s3 + $0x10] sm:$0xff]   ;;  %v573_v32 = vunpack.c.h.bf16 %v626_v17  ;;  %v569_v34 = vunpack.c.h.bf16 %v625_v19 }
   0x9   :  { %v824_v28 = vld [vmem:[%s876_s3 + $0x30] sm:$0xff]   ;;  %v564_v39 = vunpack.c.l.bf16 %v809_v21  ;;  %v580_v40 = vunpack.c.l.bf16 %v814_v22  ;;  %v560_v45 = vunpack.c.l.bf16 %v819_v27  ;;  %v565_v59 = vunpack.c.h.bf16 %v809_v21 }
   0xa   :  { %v576_v46 = vunpack.c.l.bf16 %v824_v28  ;;  %v581_v60 = vunpack.c.h.bf16 %v814_v22  ;;  %v561_v63 = vunpack.c.h.bf16 %v819_v27  ;;  %v577_v0 = vunpack.c.h.bf16 %v824_v28 }
   0xb   :  { %657 = vmatpush3.bf16.msra.mxu0 %v702_v2  ;;  %694 = vmatpush3.bf16.msra.mxu1 %v702_v2 }
   0xc   :  { %658 = vmatprep.subr.bf16.mxu0 %v703_v3  ;;  %687 = vmatprep.subr.bf16.mxu1 %v703_v3 }
   0xf   :  { %659 = vmatpush3.bf16.msra.mxu0 %v703_v3  ;;  %695 = vmatpush3.bf16.msra.mxu1 %v703_v3 }
  0x10   :  { %660 = vmatprep.subr.bf16.mxu0 %v704_v6  ;;  %688 = vmatprep.subr.bf16.mxu1 %v704_v6 }
  0x13   :  { %661 = vmatpush3.bf16.msra.mxu0 %v704_v6  ;;  %696 = vmatpush3.bf16.msra.mxu1 %v704_v6 }
  0x14   :  { %662 = vmatprep.subr.bf16.mxu0 %v705_v7  ;;  %689 = vmatprep.subr.bf16.mxu1 %v705_v7 }
  0x17   :  { %663 = vmatpush3.bf16.msra.mxu0 %v705_v7  ;;  %697 = vmatpush3.bf16.msra.mxu1 %v705_v7 }
  0x18   :  { %664 = vmatprep.subr.bf16.mxu0 %v706_v8  ;;  %690 = vmatprep.subr.bf16.mxu1 %v706_v8 }
  0x1b   :  { %665 = vmatpush3.bf16.msra.mxu0 %v706_v8  ;;  %698 = vmatpush3.bf16.msra.mxu1 %v706_v8 }
  0x1c   :  { %666 = vmatprep.subr.bf16.mxu0 %v707_v9  ;;  %691 = vmatprep.subr.bf16.mxu1 %v707_v9 }
  0x1f   :  { %667 = vmatpush3.bf16.msra.mxu0 %v707_v9  ;;  %699 = vmatpush3.bf16.msra.mxu1 %v707_v9 }
  0x22   :  { %669 = vmatmul.mubr.bf16.vlgmr.msra.gmra.mrb[0].mxu0 %v710_v10  ;;  %677 = vmatmul.mubr.bf16.vlgmr.msra.gmra.mrb[0].mxu1 %v711_v11 }
  0x23   :  { %672 = vmatprep.mubr.bf16.mxu0 %v712_v12  ;;  %680 = vmatprep.mubr.bf16.mxu1 %v713_v13 }
  0x2a   :  { %673 = vmatmul.mubr.bf16.gmra.mrb[4].mxu0 %v714_v14  ;;  %681 = vmatmul.mubr.bf16.gmra.mrb[4].mxu1 %v715_v15 }
  0xf5   :  { %v670_v29 = vpop.f32.mrb[0].mxu0  ;;  %v678_v30 = vpop.f32.mrb[0].mxu1 }
  0xf6   :  { %v339_v35 = vadd.f32 %v670_v29, %v804_v20  ;;  %v347_v36 = vadd.f32 %v678_v30, %v804_v20  ;;  %v216_v37 = vpop.f32.mrb[1].mxu0  ;;  %v248_v38 = vpop.f32.mrb[1].mxu1 }
  0xf7   :  { %v337_v41 = vadd.f32 %v804_v20, %v216_v37  ;;  %v345_v42 = vadd.f32 %v804_v20, %v248_v38  ;;  %v671_v43 = vpop.f32.mrb[2].mxu0  ;;  %v679_v44 = vpop.f32.mrb[2].mxu1 }
  0xf8   :  { %v387_v47 = vadd.f32 %v556_v23, %v339_v35  ;;  %v395_v48 = vadd.f32 %v572_v24, %v347_v36  ;;  %v340_v49 = vadd.f32 %v671_v43, %v804_v20  ;;  %v348_v50 = vadd.f32 %v679_v44, %v804_v20  ;;  %v219_v51 = vpop.f32.mrb[3].mxu0  ;;  %v251_v52 = vpop.f32.mrb[3].mxu1 }
  0xf9   :  { %v385_v53 = vadd.f32 %v552_v25, %v337_v41  ;;  %v393_v54 = vadd.f32 %v568_v26, %v345_v42  ;;  %v338_v55 = vadd.f32 %v804_v20, %v219_v51  ;;  %v346_v56 = vadd.f32 %v804_v20, %v251_v52 }
  0xfa   :  { %v388_v57 = vadd.f32 %v557_v31, %v340_v49  ;;  %v396_v58 = vadd.f32 %v573_v32, %v348_v50  ;;  %v403_v1 = vmax.f32 %v387_v47, 0.0  ;;  %v411_v2 = vmax.f32 %v395_v48, 0.0 }
  0xfb   :  { %v386_v61 = vadd.f32 %v553_v33, %v338_v55  ;;  %v394_v62 = vadd.f32 %v569_v34, %v346_v56  ;;  %v401_v5 = vmax.f32 %v385_v53, 0.0  ;;  %v409_v6 = vmax.f32 %v393_v54, 0.0 }
  0xfc   :  { %v404_v3 = vmax.f32 %v388_v57, 0.0  ;;  %v412_v4 = vmax.f32 %v396_v58, 0.0 }
  0xfd   :  { %v402_v7 = vmax.f32 %v386_v61, 0.0  ;;  %v410_v8 = vmax.f32 %v394_v62, 0.0  ;;  %v674_v9 = vpop.f32.mrb[4].mxu0  ;;  %v682_v10 = vpop.f32.mrb[4].mxu1 }
  0xfe   :  { %v590_v11 = vpack.c.bf16 %v404_v3, %v403_v1  ;;  %v610_v12 = vpack.c.bf16 %v412_v4, %v411_v2  ;;  %v343_v13 = vadd.f32 %v674_v9, %v804_v20  ;;  %v351_v14 = vadd.f32 %v682_v10, %v804_v20  ;;  %v232_v15 = vpop.f32.mrb[5].mxu0  ;;  %v264_v16 = vpop.f32.mrb[5].mxu1 }
  0xff   :  { %v585_v17 = vpack.c.bf16 %v402_v7, %v401_v5  ;;  %v605_v18 = vpack.c.bf16 %v410_v8, %v409_v6  ;;  %v341_v19 = vadd.f32 %v804_v20, %v232_v15  ;;  %v349_v21 = vadd.f32 %v804_v20, %v264_v16  ;;  %v675_v22 = vpop.f32.mrb[6].mxu0  ;;  %v683_v23 = vpop.f32.mrb[6].mxu1 }
 0x100   :  { %629 = vst [vmem:[%s878_s4 + $0x8] sm:$0xff] %v590_v11   ;;  %633 = vst [vmem:[%s878_s4 + $0x28] sm:$0xff] %v610_v12   ;;  %v391_v24 = vadd.f32 %v564_v39, %v343_v13  ;;  %v399_v25 = vadd.f32 %v580_v40, %v351_v14  ;;  %v344_v26 = vadd.f32 %v675_v22, %v804_v20  ;;  %v235_v28 = vpop.f32.mrb[7].mxu0  ;;  %v267_v29 = vpop.f32.mrb[7].mxu1 }
 0x101   :  { %v352_v27 = vadd.f32 %v683_v23, %v804_v20  ;;  %586 = vst [vmem:[%s878_s4] sm:$0xff] %v585_v17   ;;  %632 = vst [vmem:[%s878_s4 + $0x20] sm:$0xff] %v605_v18   ;;  %v389_v30 = vadd.f32 %v560_v45, %v341_v19  ;;  %v397_v31 = vadd.f32 %v576_v46, %v349_v21 }
 0x102   :  { %v342_v32 = vadd.f32 %v804_v20, %v235_v28  ;;  %v350_v33 = vadd.f32 %v804_v20, %v267_v29  ;;  %v392_v34 = vadd.f32 %v565_v59, %v344_v26  ;;  %v407_v38 = vmax.f32 %v391_v24, 0.0 }
 0x103   :  { %v400_v35 = vadd.f32 %v581_v60, %v352_v27  ;;  %v415_v39 = vmax.f32 %v399_v25, 0.0  ;;  %v405_v42 = vmax.f32 %v389_v30, 0.0  ;;  %v413_v43 = vmax.f32 %v397_v31, 0.0 }
 0x104   :  { %v390_v36 = vadd.f32 %v561_v63, %v342_v32  ;;  %v398_v37 = vadd.f32 %v577_v0, %v350_v33  ;;  %v408_v40 = vmax.f32 %v392_v34, 0.0 }
 0x105   :  { %v416_v41 = vmax.f32 %v400_v35, 0.0 }
 0x106   :  { %v406_v44 = vmax.f32 %v390_v36, 0.0  ;;  %v414_v47 = vmax.f32 %v398_v37, 0.0  ;;  %v600_v48 = vpack.c.bf16 %v408_v40, %v407_v38 }
 0x107   :  { %v620_v49 = vpack.c.bf16 %v416_v41, %v415_v39 }
 0x108   :  { %v595_v45 = vpack.c.bf16 %v406_v44, %v405_v42  ;;  %v615_v46 = vpack.c.bf16 %v414_v47, %v413_v43  ;;  %631 = vst [vmem:[%s878_s4 + $0x18] sm:$0xff] %v600_v48  }
 0x109   :  { %635 = vst [vmem:[%s878_s4 + $0x38] sm:$0xff] %v620_v49  }
 0x10a   :  { %630 = vst [vmem:[%s878_s4 + $0x10] sm:$0xff] %v595_v45   ;;  %634 = vst [vmem:[%s878_s4 + $0x30] sm:$0xff] %v615_v46  }

// kernel: _lambda_.41
= control target key start
LH: loop header
LB: loop body
LE: loop exit
PB: predicated region body
PF: predicated region fallthrough
CT: control target
= control target key end

     0   :  { %s477_s1 = inlined_call_operand.vmem [shape: bf16[256,128], index: 1, kind: input, shape index: {}]   ;;  %s478_s0 = inlined_call_operand.vmem [shape: bf16[32,256], index: 0, kind: input, shape index: {}]   ;;  %s479_s2 = inlined_call_operand.vmem [shape: f32[1,128], index: 2, kind: input, shape index: {}]   ;;  %s480_s3 = inlined_call_operand.vmem [shape: bf16[32,128], index: 3, kind: output, shape index: {}]  }
   0x1   :  { %v366_v0 = vld [vmem:[%s477_s1 + $0x40] sm:$0xff]   ;;  %v368_v2 = vld [vmem:[%s477_s1 + $0x48] sm:$0xff]   ;;  %v370_v4 = vld [vmem:[%s477_s1 + $0x50] sm:$0xff]  }
   0x2   :  { %v367_v1 = vld [vmem:[%s477_s1] sm:$0xff]   ;;  %322 = vmatprep.subr.bf16.mxu0 %v366_v0  ;;  %350 = vmatprep.subr.bf16.mxu1 %v366_v0  ;;  %v369_v3 = vld [vmem:[%s477_s1 + $0x8] sm:$0xff]   ;;  %v371_v5 = vld [vmem:[%s477_s1 + $0x10] sm:$0xff]  }
   0x3   :  { %323 = vmatpush3.bf16.msra.mxu0 %v367_v1  ;;  %358 = vmatpush3.bf16.msra.mxu1 %v367_v1  ;;  %v372_v6 = vld [vmem:[%s477_s1 + $0x58] sm:$0xff]   ;;  %v374_v8 = vld [vmem:[%s477_s1 + $0x60] sm:$0xff]   ;;  %v376_v10 = vld [vmem:[%s477_s1 + $0x68] sm:$0xff]  }
   0x4   :  { %324 = vmatprep.subr.bf16.mxu0 %v368_v2  ;;  %351 = vmatprep.subr.bf16.mxu1 %v368_v2  ;;  %v373_v7 = vld [vmem:[%s477_s1 + $0x18] sm:$0xff]   ;;  %v375_v9 = vld [vmem:[%s477_s1 + $0x20] sm:$0xff]   ;;  %v377_v13 = vld [vmem:[%s477_s1 + $0x28] sm:$0xff]  }
   0x5   :  { %v384_v11 = vld [vmem:[%s478_s0 + $0x4] ss:$8 sps:$4 sm:$0xff]   ;;  %v387_v12 = vld [vmem:[%s478_s0 + $0x14] ss:$8 sps:$4 sm:$0xff]   ;;  %v382_v18 = vld [vmem:[%s478_s0] ss:$8 sps:$4 sm:$0xff]  }
   0x6   :  { %v378_v14 = vld [vmem:[%s477_s1 + $0x70] sm:$0xff]   ;;  %211 = vmatprep.mubr.bf16.mxu0 %v384_v11  ;;  %219 = vmatprep.mubr.bf16.mxu1 %v387_v12  ;;  %v380_v16 = vld [vmem:[%s477_s1 + $0x78] sm:$0xff]   ;;  %v302_v23 = vld [vmem:[%s479_s2] ss:$0 sm:$0xff] }
   0x7   :  { %325 = vmatpush3.bf16.msra.mxu0 %v369_v3  ;;  %359 = vmatpush3.bf16.msra.mxu1 %v369_v3  ;;  %v379_v15 = vld [vmem:[%s477_s1 + $0x30] sm:$0xff]   ;;  %v381_v17 = vld [vmem:[%s477_s1 + $0x38] sm:$0xff]  }
   0x8   :  { %326 = vmatprep.subr.bf16.mxu0 %v370_v4  ;;  %352 = vmatprep.subr.bf16.mxu1 %v370_v4  ;;  %v385_v19 = vld [vmem:[%s478_s0 + $0x10] ss:$8 sps:$4 sm:$0xff]  }
   0xb   :  { %327 = vmatpush3.bf16.msra.mxu0 %v371_v5  ;;  %360 = vmatpush3.bf16.msra.mxu1 %v371_v5 }
   0xc   :  { %328 = vmatprep.subr.bf16.mxu0 %v372_v6  ;;  %353 = vmatprep.subr.bf16.mxu1 %v372_v6 }
   0xf   :  { %329 = vmatpush3.bf16.msra.mxu0 %v373_v7  ;;  %361 = vmatpush3.bf16.msra.mxu1 %v373_v7 }
  0x10   :  { %330 = vmatprep.subr.bf16.mxu0 %v374_v8  ;;  %354 = vmatprep.subr.bf16.mxu1 %v374_v8 }
  0x13   :  { %331 = vmatpush3.bf16.msra.mxu0 %v375_v9  ;;  %362 = vmatpush3.bf16.msra.mxu1 %v375_v9 }
  0x14   :  { %332 = vmatprep.subr.bf16.mxu0 %v376_v10  ;;  %355 = vmatprep.subr.bf16.mxu1 %v376_v10 }
  0x17   :  { %333 = vmatpush3.bf16.msra.mxu0 %v377_v13  ;;  %363 = vmatpush3.bf16.msra.mxu1 %v377_v13 }
  0x18   :  { %334 = vmatprep.subr.bf16.mxu0 %v378_v14  ;;  %356 = vmatprep.subr.bf16.mxu1 %v378_v14 }
  0x1b   :  { %335 = vmatpush3.bf16.msra.mxu0 %v379_v15  ;;  %364 = vmatpush3.bf16.msra.mxu1 %v379_v15 }
  0x1c   :  { %336 = vmatprep.subr.bf16.mxu0 %v380_v16  ;;  %357 = vmatprep.subr.bf16.mxu1 %v380_v16 }
  0x1f   :  { %337 = vmatpush3.bf16.msra.mxu0 %v381_v17  ;;  %365 = vmatpush3.bf16.msra.mxu1 %v381_v17 }
  0x22   :  { %212 = vmatmul.mubr.bf16.vlgmr.msra.gmra.mrb[0].mxu0 %v382_v18  ;;  %220 = vmatmul.mubr.bf16.vlgmr.msra.gmra.mrb[0].mxu1 %v385_v19 }
  0xf5   :  { %v338_v20 = vpop.f32.mrb[0].mxu0  ;;  %v344_v21 = vpop.f32.mrb[0].mxu1 }
  0xf6   :  { %v339_v22 = vpop.f32.mrb[1].mxu0  ;;  %v345_v24 = vpop.f32.mrb[1].mxu1 }
  0xf7   :  { %v340_v25 = vadd.f32 %v339_v22, %v338_v20  ;;  %v346_v26 = vadd.f32 %v345_v24, %v344_v21  ;;  %v341_v27 = vpop.f32.mrb[2].mxu0  ;;  %v347_v28 = vpop.f32.mrb[2].mxu1 }
  0xf8   :  { %v342_v29 = vpop.f32.mrb[3].mxu0  ;;  %v348_v30 = vpop.f32.mrb[3].mxu1 }
  0xf9   :  { %v250_v31 = vadd.f32 %v340_v25, %v302_v23  ;;  %v252_v32 = vadd.f32 %v346_v26, %v302_v23  ;;  %v343_v33 = vadd.f32 %v342_v29, %v341_v27  ;;  %v349_v34 = vadd.f32 %v348_v30, %v347_v28 }
  0xfb   :  { %v251_v35 = vadd.f32 %v343_v33, %v302_v23  ;;  %v253_v36 = vadd.f32 %v349_v34, %v302_v23  ;;  %v254_v37 = vmax.f32 %v250_v31, 0.0  ;;  %v256_v38 = vmax.f32 %v252_v32, 0.0 }
  0xfd   :  { %v255_v39 = vmax.f32 %v251_v35, 0.0  ;;  %v257_v40 = vmax.f32 %v253_v36, 0.0 }
  0xff   :  { %v314_v41 = vpack.c.bf16 %v255_v39, %v254_v37  ;;  %v319_v42 = vpack.c.bf16 %v257_v40, %v256_v38 }
 0x101   :  { %315 = vst [vmem:[%s480_s3] sm:$0xff] %v314_v41   ;;  %321 = vst [vmem:[%s480_s3 + $0x8] sm:$0xff] %v319_v42  }

// kernel: _lambda_.42
= control target key start
LH: loop header
LB: loop body
LE: loop exit
PB: predicated region body
PF: predicated region fallthrough
CT: control target
= control target key end

     0   :  { %s335_s1 = inlined_call_operand.vmem [shape: bf16[128,128], index: 1, kind: input, shape index: {}]   ;;  %s336_s0 = inlined_call_operand.vmem [shape: bf16[32,128], index: 0, kind: input, shape index: {}]   ;;  %s337_s2 = inlined_call_operand.vmem [shape: f32[1,128], index: 2, kind: input, shape index: {}]   ;;  %s338_s3 = inlined_call_operand.vmem [shape: bf16[32,128], index: 3, kind: output, shape index: {}]  }
   0x1   :  { %v266_v0 = vld [vmem:[%s335_s1] sm:$0xff]   ;;  %v267_v1 = vld [vmem:[%s335_s1 + $0x8] sm:$0xff]   ;;  %v268_v2 = vld [vmem:[%s335_s1 + $0x10] sm:$0xff]  }
   0x2   :  { %246 = vmatprep.subr.bf16.mxu0 %v266_v0  ;;  %v269_v3 = vld [vmem:[%s335_s1 + $0x18] sm:$0xff]   ;;  %v274_v4 = vld [vmem:[%s336_s0] sm:$0xff]   ;;  %v271_v6 = vld [vmem:[%s335_s1 + $0x28] sm:$0xff]  }
   0x3   :  { %247 = vmatpush3.bf16.msra.mxu0 %v266_v0  ;;  %262 = vmatprep.mubr.bf16.mxu0 %v274_v4  ;;  %v270_v5 = vld [vmem:[%s335_s1 + $0x20] sm:$0xff]   ;;  %v272_v7 = vld [vmem:[%s335_s1 + $0x30] sm:$0xff]   ;;  %v273_v8 = vld [vmem:[%s335_s1 + $0x38] sm:$0xff]  }
   0x4   :  { %248 = vmatprep.subr.bf16.mxu0 %v267_v1  ;;  %v275_v9 = vld [vmem:[%s336_s0 + $0x8] sm:$0xff]   ;;  %v216_v11 = vld [vmem:[%s337_s2] ss:$0 sm:$0xff] }
   0x7   :  { %249 = vmatpush3.bf16.msra.mxu0 %v267_v1 }
   0x8   :  { %250 = vmatprep.subr.bf16.mxu0 %v268_v2 }
   0xb   :  { %251 = vmatpush3.bf16.msra.mxu0 %v268_v2 }
   0xc   :  { %252 = vmatprep.subr.bf16.mxu0 %v269_v3 }
   0xf   :  { %253 = vmatpush3.bf16.msra.mxu0 %v269_v3 }
  0x10   :  { %254 = vmatprep.subr.bf16.mxu0 %v270_v5 }
  0x13   :  { %255 = vmatpush3.bf16.msra.mxu0 %v270_v5 }
  0x14   :  { %256 = vmatprep.subr.bf16.mxu0 %v271_v6 }
  0x17   :  { %257 = vmatpush3.bf16.msra.mxu0 %v271_v6 }
  0x18   :  { %258 = vmatprep.subr.bf16.mxu0 %v272_v7 }
  0x1b   :  { %259 = vmatpush3.bf16.msra.mxu0 %v272_v7 }
  0x1c   :  { %260 = vmatprep.subr.bf16.mxu0 %v273_v8 }
  0x1f   :  { %261 = vmatpush3.bf16.msra.mxu0 %v273_v8 }
  0x22   :  { %263 = vmatmul.mubr.bf16.vlgmr.msra.gmra.mrb[0].mxu0 %v275_v9 }
  0xf5   :  { %v264_v10 = vpop.f32.mrb[0].mxu0 }
  0xf6   :  { %v141_v12 = vpop.f32.mrb[1].mxu0  ;;  %v180_v14 = vadd.f32 %v264_v10, %v216_v11 }
  0xf7   :  { %v265_v13 = vpop.f32.mrb[2].mxu0  ;;  %v178_v17 = vadd.f32 %v216_v11, %v141_v12 }
  0xf8   :  { %v181_v15 = vadd.f32 %v265_v13, %v216_v11  ;;  %v144_v16 = vpop.f32.mrb[3].mxu0 }
  0xf9   :  { %v179_v18 = vadd.f32 %v216_v11, %v144_v16 }
  0xfa   :  { %v233_v19 = vpack.c.bf16 %v181_v15, %v180_v14 }
  0xfb   :  { %v228_v20 = vpack.c.bf16 %v179_v18, %v178_v17 }
  0xfc   :  { %235 = vst [vmem:[%s338_s3 + $0x8] sm:$0xff] %v233_v19  }
  0xfd   :  { %229 = vst [vmem:[%s338_s3] sm:$0xff] %v228_v20  }

// kernel: _lambda_.43
= control target key start
LH: loop header
LB: loop body
LE: loop exit
PB: predicated region body
PF: predicated region fallthrough
CT: control target
= control target key end

     0   :  { %s374_s1 = inlined_call_operand.vmem [shape: bf16[128,128], index: 1, kind: input, shape index: {}]   ;;  %s375_s0 = inlined_call_operand.vmem [shape: bf16[32,128], index: 0, kind: input, shape index: {}]   ;;  %s376_s3 = inlined_call_operand.vmem [shape: bf16[32,128], index: 3, kind: input, shape index: {}]   ;;  %s377_s2 = inlined_call_operand.vmem [shape: f32[1,128], index: 2, kind: input, shape index: {}]   ;;  %s378_s4 = inlined_call_operand.vmem [shape: bf16[32,128], index: 4, kind: output, shape index: {}]  }
   0x1   :  { %v294_v0 = vld [vmem:[%s374_s1] sm:$0xff]   ;;  %v295_v1 = vld [vmem:[%s374_s1 + $0x8] sm:$0xff]   ;;  %v296_v2 = vld [vmem:[%s374_s1 + $0x10] sm:$0xff]  }
   0x2   :  { %274 = vmatprep.subr.bf16.mxu0 %v294_v0  ;;  %v297_v3 = vld [vmem:[%s374_s1 + $0x18] sm:$0xff]   ;;  %v302_v4 = vld [vmem:[%s375_s0] sm:$0xff]   ;;  %v299_v6 = vld [vmem:[%s374_s1 + $0x28] sm:$0xff]  }
   0x3   :  { %275 = vmatpush3.bf16.msra.mxu0 %v294_v0  ;;  %290 = vmatprep.mubr.bf16.mxu0 %v302_v4  ;;  %v298_v5 = vld [vmem:[%s374_s1 + $0x20] sm:$0xff]   ;;  %v300_v7 = vld [vmem:[%s374_s1 + $0x30] sm:$0xff]   ;;  %v301_v8 = vld [vmem:[%s374_s1 + $0x38] sm:$0xff]  }
   0x4   :  { %276 = vmatprep.subr.bf16.mxu0 %v295_v1  ;;  %v303_v9 = vld [vmem:[%s375_s0 + $0x8] sm:$0xff]   ;;  %v245_v11 = vld [vmem:[%s376_s3] sm:$0xff]  }
   0x5   :  { %v262_v10 = vld [vmem:[%s376_s3 + $0x8] sm:$0xff]   ;;  %v235_v12 = vld [vmem:[%s377_s2] ss:$0 sm:$0xff]  ;;  %v246_v15 = vunpack.c.l.bf16 %v245_v11  ;;  %v247_v21 = vunpack.c.h.bf16 %v245_v11 }
   0x6   :  { %v250_v13 = vunpack.c.l.bf16 %v262_v10  ;;  %v251_v18 = vunpack.c.h.bf16 %v262_v10 }
   0x7   :  { %277 = vmatpush3.bf16.msra.mxu0 %v295_v1 }
   0x8   :  { %278 = vmatprep.subr.bf16.mxu0 %v296_v2 }
   0xb   :  { %279 = vmatpush3.bf16.msra.mxu0 %v296_v2 }
   0xc   :  { %280 = vmatprep.subr.bf16.mxu0 %v297_v3 }
   0xf   :  { %281 = vmatpush3.bf16.msra.mxu0 %v297_v3 }
  0x10   :  { %282 = vmatprep.subr.bf16.mxu0 %v298_v5 }
  0x13   :  { %283 = vmatpush3.bf16.msra.mxu0 %v298_v5 }
  0x14   :  { %284 = vmatprep.subr.bf16.mxu0 %v299_v6 }
  0x17   :  { %285 = vmatpush3.bf16.msra.mxu0 %v299_v6 }
  0x18   :  { %286 = vmatprep.subr.bf16.mxu0 %v300_v7 }
  0x1b   :  { %287 = vmatpush3.bf16.msra.mxu0 %v300_v7 }
  0x1c   :  { %288 = vmatprep.subr.bf16.mxu0 %v301_v8 }
  0x1f   :  { %289 = vmatpush3.bf16.msra.mxu0 %v301_v8 }
  0x22   :  { %291 = vmatmul.mubr.bf16.vlgmr.msra.gmra.mrb[0].mxu0 %v303_v9 }
  0xf5   :  { %v292_v14 = vpop.f32.mrb[0].mxu0 }
  0xf6   :  { %v183_v16 = vadd.f32 %v292_v14, %v235_v12  ;;  %v144_v17 = vpop.f32.mrb[1].mxu0 }
  0xf7   :  { %v181_v19 = vadd.f32 %v235_v12, %v144_v17  ;;  %v293_v20 = vpop.f32.mrb[2].mxu0 }
  0xf8   :  { %v195_v22 = vadd.f32 %v250_v13, %v183_v16  ;;  %v184_v23 = vadd.f32 %v293_v20, %v235_v12  ;;  %v147_v24 = vpop.f32.mrb[3].mxu0 }
  0xf9   :  { %v193_v25 = vadd.f32 %v246_v15, %v181_v19  ;;  %v182_v26 = vadd.f32 %v235_v12, %v147_v24 }
  0xfa   :  { %v196_v27 = vadd.f32 %v251_v18, %v184_v23  ;;  %v199_v29 = vmax.f32 %v195_v22, 0.0 }
  0xfb   :  { %v194_v28 = vadd.f32 %v247_v21, %v182_v26  ;;  %v197_v31 = vmax.f32 %v193_v25, 0.0 }
  0xfc   :  { %v200_v30 = vmax.f32 %v196_v27, 0.0 }
  0xfd   :  { %v198_v32 = vmax.f32 %v194_v28, 0.0 }
  0xfe   :  { %v260_v33 = vpack.c.bf16 %v200_v30, %v199_v29 }
  0xff   :  { %v255_v34 = vpack.c.bf16 %v198_v32, %v197_v31 }
 0x100   :  { %263 = vst [vmem:[%s378_s4 + $0x8] sm:$0xff] %v260_v33  }
 0x101   :  { %256 = vst [vmem:[%s378_s4] sm:$0xff] %v255_v34  }

// kernel: _lambda_.44
= control target key start
LH: loop header
LB: loop body
LE: loop exit
PB: predicated region body
PF: predicated region fallthrough
CT: control target
= control target key end

     0   :  { %s339_s1 = inlined_call_operand.vmem [shape: bf16[128,128], index: 1, kind: input, shape index: {}]   ;;  %s340_s0 = inlined_call_operand.vmem [shape: bf16[32,128], index: 0, kind: input, shape index: {}]   ;;  %s341_s2 = inlined_call_operand.vmem [shape: f32[1,128], index: 2, kind: input, shape index: {}]   ;;  %s342_s3 = inlined_call_operand.vmem [shape: bf16[32,128], index: 3, kind: output, shape index: {}]  }
   0x1   :  { %v270_v0 = vld [vmem:[%s339_s1] sm:$0xff]   ;;  %v271_v1 = vld [vmem:[%s339_s1 + $0x8] sm:$0xff]   ;;  %v272_v2 = vld [vmem:[%s339_s1 + $0x10] sm:$0xff]  }
   0x2   :  { %250 = vmatprep.subr.bf16.mxu0 %v270_v0  ;;  %v273_v3 = vld [vmem:[%s339_s1 + $0x18] sm:$0xff]   ;;  %v278_v4 = vld [vmem:[%s340_s0] sm:$0xff]   ;;  %v275_v6 = vld [vmem:[%s339_s1 + $0x28] sm:$0xff]  }
   0x3   :  { %251 = vmatpush3.bf16.msra.mxu0 %v270_v0  ;;  %266 = vmatprep.mubr.bf16.mxu0 %v278_v4  ;;  %v274_v5 = vld [vmem:[%s339_s1 + $0x20] sm:$0xff]   ;;  %v276_v7 = vld [vmem:[%s339_s1 + $0x30] sm:$0xff]   ;;  %v277_v8 = vld [vmem:[%s339_s1 + $0x38] sm:$0xff]  }
   0x4   :  { %252 = vmatprep.subr.bf16.mxu0 %v271_v1  ;;  %v279_v9 = vld [vmem:[%s340_s0 + $0x8] sm:$0xff]   ;;  %v220_v10 = vld [vmem:[%s341_s2] ss:$0 sm:$0xff] }
   0x7   :  { %253 = vmatpush3.bf16.msra.mxu0 %v271_v1 }
   0x8   :  { %254 = vmatprep.subr.bf16.mxu0 %v272_v2 }
   0xb   :  { %255 = vmatpush3.bf16.msra.mxu0 %v272_v2 }
   0xc   :  { %256 = vmatprep.subr.bf16.mxu0 %v273_v3 }
   0xf   :  { %257 = vmatpush3.bf16.msra.mxu0 %v273_v3 }
  0x10   :  { %258 = vmatprep.subr.bf16.mxu0 %v274_v5 }
  0x13   :  { %259 = vmatpush3.bf16.msra.mxu0 %v274_v5 }
  0x14   :  { %260 = vmatprep.subr.bf16.mxu0 %v275_v6 }
  0x17   :  { %261 = vmatpush3.bf16.msra.mxu0 %v275_v6 }
  0x18   :  { %262 = vmatprep.subr.bf16.mxu0 %v276_v7 }
  0x1b   :  { %263 = vmatpush3.bf16.msra.mxu0 %v276_v7 }
  0x1c   :  { %264 = vmatprep.subr.bf16.mxu0 %v277_v8 }
  0x1f   :  { %265 = vmatpush3.bf16.msra.mxu0 %v277_v8 }
  0x22   :  { %267 = vmatmul.mubr.bf16.vlgmr.msra.gmra.mrb[0].mxu0 %v279_v9 }
  0xf5   :  { %v268_v11 = vpop.f32.mrb[0].mxu0 }
  0xf6   :  { %v180_v12 = vadd.f32 %v268_v11, %v220_v10  ;;  %v141_v13 = vpop.f32.mrb[1].mxu0 }
  0xf7   :  { %v178_v14 = vadd.f32 %v220_v10, %v141_v13  ;;  %v269_v15 = vpop.f32.mrb[2].mxu0 }
  0xf8   :  { %v181_v16 = vadd.f32 %v269_v15, %v220_v10  ;;  %v144_v17 = vpop.f32.mrb[3].mxu0  ;;  %v184_v19 = vmax.f32 %v180_v12, 0.0 }
  0xf9   :  { %v179_v18 = vadd.f32 %v220_v10, %v144_v17  ;;  %v182_v21 = vmax.f32 %v178_v14, 0.0 }
  0xfa   :  { %v185_v20 = vmax.f32 %v181_v16, 0.0 }
  0xfb   :  { %v183_v22 = vmax.f32 %v179_v18, 0.0 }
  0xfc   :  { %v237_v23 = vpack.c.bf16 %v185_v20, %v184_v19 }
  0xfd   :  { %v232_v24 = vpack.c.bf16 %v183_v22, %v182_v21 }
  0xfe   :  { %239 = vst [vmem:[%s342_s3 + $0x8] sm:$0xff] %v237_v23  }
  0xff   :  { %233 = vst [vmem:[%s342_s3] sm:$0xff] %v232_v24  }

// kernel: _lambda_.48
= control target key start
LH: loop header
LB: loop body
LE: loop exit
PB: predicated region body
PF: predicated region fallthrough
CT: control target
= control target key end

     0   :  { %s739_s12 = smov 0   ;;  %s741_s13 = smov 0   ;;  %s827_s0 = inlined_call_operand.vmem [shape: bf16[16,384], index: 0, kind: input, shape index: {}]   ;;  %s828_s1 = inlined_call_operand.vmem [shape: bf16[384,128], index: 1, kind: input, shape index: {}]   ;;  %s829_s2 = inlined_call_operand.vmem [shape: f32[1,128], index: 2, kind: input, shape index: {}]   ;;  %s830_s3 = inlined_call_operand.vmem [shape: bf16[16,128], index: 3, kind: output, shape index: {}]  }
   0x1   :  { %s743_s14 = smov 0   ;;  %s745_s15 = smov 0  }
   0x2   :  { %s747_s16 = smov 0  }
   0x3 LB: > { %s25_s17 = sadd.s32 1, %s710_s15  ;;  %p48_p1 = scmp.ne.s32.totalorder %s702_s13, %s698_s12  ;;  %s714_s16 = sphi %s747_s16, %s13_s16   ;;  %s710_s15 = sphi %s745_s15, %s834_s15   ;;  %s706_s14 = sphi %s743_s14, %s833_s14   ;;  %s702_s13 = sphi %s741_s13, %s832_s13   ;;  %s698_s12 = sphi %s739_s12, %s831_s12  }
   0x4   : > { %p26_p0 = scmp.ge.s32.totalorder %s25_s17, 3  ;;  %p49_p2 = scmp.eq.s32.totalorder %s714_s16, 0 }
   0x5   : > { %s41_s19 = sadd.s32 1, %s702_s13  ;;  %p563_p5 = scmp.ge.s32.totalorder %s714_s16, 3 }
   0x6   : > { %s836_s17 = smov (%p26_p0, %s25_s17), 0  ;;  %p50_p3 = por %p49_p2, %p48_p1 }
   0x7   : > { %s37_s18 = ssub.s32 %s710_s15, %s836_s17  ;;  %162 = sbr.rel (%p563_p5) target bundleno = 21 (0x15), region = 20 }
   0x8   : > { %p39_p4 = scmp.eq.s32.totalorder %s37_s18, 0 }
   0xa   : > { %s774_s20 = scalar_select %p39_p4, %s702_s13, %s41_s19  }
   0xe   : > { %165 = sbr.rel (!%p50_p3) target bundleno = 21 (0x15), region = 24  ;;  %s167_s21 = sand.u32 (%p50_p3), 1, %s702_s13  }
   0xf   : > { %s565_s22 = sshll.u32 (%p50_p3), %s710_s15, 2  ;;  %s564_s23 = sshll.u32 (%p50_p3), %s167_s21, 3 }
  0x10   : > { %s174_s26 = scalar_lea.vmem (%p50_p3), %s827_s0, %s565_s22  ;;  %s169_s27 = scalar_lea.vmem (%p50_p3), [#allocation3], %s564_s23 }
  0x11   : > { %v190_v0 = vld [vmem:[%s174_s26] sm:$0xf] (%p50_p3)  ;;  %v192_v1 = vld [vmem:[%s174_s26 + $0xc] sm:$0xf] (%p50_p3) }
  0x12   : > { %191 = vst [vmem:[%s169_s27] sm:$0xf] (%p50_p3), %v190_v0  ;;  %193 = vst [vmem:[%s169_s27 + $0x4] sm:$0xf] (%p50_p3), %v192_v1 }
  0x15 PF: > { %p566_p6 = scmp.ge.s32.totalorder %s714_s16, 1  ;;  %p231_p7 = scmp.lt.s32.totalorder %s714_s16, 4 }
  0x17   : > { %p232_p8 = pnand %p566_p6, %p231_p7 }
  0x18   : > { %s238_s28 = sand.u32 (!%p232_p8), 1, %s698_s12   ;;  %s568_s29 = sshll.u32 (!%p232_p8), %s706_s14, 4 }
  0x19   : > { %235 = sbr.rel (%p232_p8) target bundleno = 303 (0x12f), region = 69  ;;  %s786_s30 = sshll.u32 (!%p232_p8), %s238_s28, 3 }
  0x1a   : > { %p277_p9 = scmp.lt.s32.totalorder (!%p232_p8), %s568_s29, 47  ;;  %s240_s8 = scalar_lea.vmem (!%p232_p8), [#allocation3], %s786_s30 }
  0x1b   : > { %p570_p10 = scmp.ne.s32.totalorder (!%p232_p8), %s706_s14, 0 }
  0x20   : > { %s838_s29 = smov (!%p277_p9, %s568_s29), 47  ;;  %301 = sbr.rel (%p570_p10) target bundleno = 39 (0x27), region = 77 }
  0x21   : > { %s569_s4 = sshll.u32 %s838_s29, 2  ;;  %v716_v2 = vmov (!%p570_p10), 0.0  }
  0x22   : > { %s791_s7 = scalar_lea.vmem %s828_s1, %s569_s4  ;;  %302 = vst [vmem:[#allocation2] sm:$0xff] (!%p570_p10), %v716_v2  ;;  %303 = vst [vmem:[#allocation2 + $0x8] sm:$0xff] (!%p570_p10), %v716_v2 }
  0x27 PF: > { %v667_v3 = vld [vmem:[%s791_s7] sm:$0xff]   ;;  %v717_v4 = vmov 0.0   ;;  %v668_v5 = vld [vmem:[%s791_s7 + $0x8] sm:$0xff]   ;;  %vm718_vm0 = vmmov 0   ;;  %v669_v6 = vld [vmem:[%s791_s7 + $0x10] sm:$0xff]   ;;  %p580_p11 = scmp.ne.s32.totalorder %s706_s14, 2 }
  0x28   : > { %604 = vmatprep.subr.bf16.mxu0 %v717_v4  ;;  %620 = vmatprep.mubr.msk.bf16.mxu0 %vm718_vm0, %v717_v4  ;;  %v670_v7 = vld [vmem:[%s791_s7 + $0x18] sm:$0xff]   ;;  %v671_v8 = vld [vmem:[%s791_s7 + $0x20] sm:$0xff]   ;;  %v672_v9 = vld [vmem:[%s791_s7 + $0x28] sm:$0xff]  }
  0x29   : > { %605 = vmatpush3.bf16.msra.mxu0 %v667_v3  ;;  %v673_v10 = vld [vmem:[%s791_s7 + $0x30] sm:$0xff]   ;;  %v674_v11 = vld [vmem:[%s791_s7 + $0x38] sm:$0xff]   ;;  %v304_v13 = vld [vmem:[#allocation2] sm:$0xff] }
  0x2a   : > { %606 = vmatprep.subr.bf16.mxu0 %v717_v4  ;;  %v675_v12 = vld [vmem:[%s240_s8] sm:$0xff]   ;;  %v305_v15 = vld [vmem:[#allocation2 + $0x8] sm:$0xff]  ;;  %v581_v23 = vld [vmem:[%s829_s2] ss:$0 sm:$0xff] (!%p580_p11) }
  0x2d   : > { %607 = vmatpush3.bf16.msra.mxu0 %v668_v5 }
  0x2e   : > { %608 = vmatprep.subr.bf16.mxu0 %v717_v4 }
  0x31   : > { %609 = vmatpush3.bf16.msra.mxu0 %v669_v6 }
  0x32   : > { %610 = vmatprep.subr.bf16.mxu0 %v717_v4 }
  0x35   : > { %611 = vmatpush3.bf16.msra.mxu0 %v670_v7 }
  0x36   : > { %612 = vmatprep.subr.bf16.mxu0 %v717_v4 }
  0x39   : > { %613 = vmatpush3.bf16.msra.mxu0 %v671_v8 }
  0x3a   : > { %614 = vmatprep.subr.bf16.mxu0 %v717_v4 }
  0x3d   : > { %615 = vmatpush3.bf16.msra.mxu0 %v672_v9 }
  0x3e   : > { %616 = vmatprep.subr.bf16.mxu0 %v717_v4 }
  0x41   : > { %617 = vmatpush3.bf16.msra.mxu0 %v673_v10 }
  0x42   : > { %618 = vmatprep.subr.bf16.mxu0 %v717_v4 }
  0x45   : > { %619 = vmatpush3.bf16.msra.mxu0 %v674_v11 }
  0x48   : > { %621 = vmatmul.mubr.bf16.vlgmr.msra.gmra.mrb[0].mxu0 %v675_v12 }
 0x11a   : > { %426 = sbr.rel (%p580_p11) target bundleno = 303 (0x12f), region = 81 }
 0x11b   : > { %v412_v14 = vpop.f32.mrb[0].mxu0 }
 0x11c   : > { %v419_v16 = vadd.f32 %v412_v14, %v304_v13  ;;  %v622_v17 = vpop.f32.mrb[1].mxu0 }
 0x11d   : > { %v415_v18 = vpop.f32.mrb[2].mxu0 }
 0x11e   : > { %421 = vst [vmem:[#allocation2] sm:$0xff] %v419_v16  ;;  %v420_v19 = vadd.f32 %v415_v18, %v305_v15  ;;  %v623_v20 = vpop.f32.mrb[3].mxu0 }
 0x120   : > { %422 = vst [vmem:[#allocation2 + $0x8] sm:$0xff] %v420_v19 }
 0x125   : > { %v427_v21 = vld [vmem:[#allocation2] sm:$0xff] }
 0x126   : > { %v436_v24 = vadd.f32 %v581_v23, %v427_v21 }
 0x127   : > { %v428_v22 = vld [vmem:[#allocation2 + $0x8] sm:$0xff] }
 0x128   : > { %v437_v25 = vadd.f32 %v581_v23, %v428_v22  ;;  %v438_v26 = vmax.f32 %v436_v24, 0.0 }
 0x12a   : > { %v439_v27 = vmax.f32 %v437_v25, 0.0 }
 0x12c   : > { %v593_v28 = vpack.c.bf16 %v439_v27, %v438_v26 }
 0x12e   : > { %594 = vst [vmem:[%s830_s3] sm:$0xff] %v593_v28  }
 0x12f PF: > { %s13_s16 = sadd.s32 1, %s714_s16   ;;  %s831_s12 = smov %s702_s13 }
 0x130   : > { %p10_p12 = scmp.ge.s32.totalorder %s13_s16, 5   ;;  %s832_s13 = smov %s774_s20 }
 0x131   : > { %s833_s14 = smov %s710_s15  ;;  %s834_s15 = smov %s836_s17 }
 0x132   :  { %12 = sbr.rel (!%p10_p12) target bundleno = 3 (0x3), region = 122 }

// kernel: _lambda_.49
= control target key start
LH: loop header
LB: loop body
LE: loop exit
PB: predicated region body
PF: predicated region fallthrough
CT: control target
= control target key end

     0   :  { %v227_v0 = vmov 0.0   ;;  %vm228_vm0 = vmmov 0   ;;  %s282_s1 = inlined_call_operand.vmem [shape: bf16[128,128], index: 1, kind: input, shape index: {}]   ;;  %s283_s0 = inlined_call_operand.vmem [shape: bf16[16,128], index: 0, kind: input, shape index: {}]   ;;  %s284_s2 = inlined_call_operand.vmem [shape: f32[1,128], index: 2, kind: input, shape index: {}]   ;;  %s285_s3 = inlined_call_operand.vmem [shape: bf16[16,128], index: 3, kind: output, shape index: {}]  }
   0x1   :  { %196 = vmatprep.subr.bf16.mxu0 %v227_v0  ;;  %v218_v1 = vld [vmem:[%s282_s1] sm:$0xff]   ;;  %212 = vmatprep.mubr.msk.bf16.mxu0 %vm228_vm0, %v227_v0  ;;  %v219_v2 = vld [vmem:[%s282_s1 + $0x8] sm:$0xff]   ;;  %v220_v3 = vld [vmem:[%s282_s1 + $0x10] sm:$0xff]  }
   0x2   :  { %197 = vmatpush3.bf16.msra.mxu0 %v218_v1  ;;  %v221_v4 = vld [vmem:[%s282_s1 + $0x18] sm:$0xff]   ;;  %v222_v5 = vld [vmem:[%s282_s1 + $0x20] sm:$0xff]   ;;  %v223_v6 = vld [vmem:[%s282_s1 + $0x28] sm:$0xff]  }
   0x3   :  { %198 = vmatprep.subr.bf16.mxu0 %v227_v0  ;;  %v224_v7 = vld [vmem:[%s282_s1 + $0x30] sm:$0xff]   ;;  %v225_v8 = vld [vmem:[%s282_s1 + $0x38] sm:$0xff]   ;;  %v226_v9 = vld [vmem:[%s283_s0] sm:$0xff]  }
   0x4   :  { %v177_v11 = vld [vmem:[%s284_s2] ss:$0 sm:$0xff] }
   0x6   :  { %199 = vmatpush3.bf16.msra.mxu0 %v219_v2 }
   0x7   :  { %200 = vmatprep.subr.bf16.mxu0 %v227_v0 }
   0xa   :  { %201 = vmatpush3.bf16.msra.mxu0 %v220_v3 }
   0xb   :  { %202 = vmatprep.subr.bf16.mxu0 %v227_v0 }
   0xe   :  { %203 = vmatpush3.bf16.msra.mxu0 %v221_v4 }
   0xf   :  { %204 = vmatprep.subr.bf16.mxu0 %v227_v0 }
  0x12   :  { %205 = vmatpush3.bf16.msra.mxu0 %v222_v5 }
  0x13   :  { %206 = vmatprep.subr.bf16.mxu0 %v227_v0 }
  0x16   :  { %207 = vmatpush3.bf16.msra.mxu0 %v223_v6 }
  0x17   :  { %208 = vmatprep.subr.bf16.mxu0 %v227_v0 }
  0x1a   :  { %209 = vmatpush3.bf16.msra.mxu0 %v224_v7 }
  0x1b   :  { %210 = vmatprep.subr.bf16.mxu0 %v227_v0 }
  0x1e   :  { %211 = vmatpush3.bf16.msra.mxu0 %v225_v8 }
  0x21   :  { %213 = vmatmul.mubr.bf16.vlgmr.msra.gmra.mrb[0].mxu0 %v226_v9 }
  0xf4   :  { %v129_v10 = vpop.f32.mrb[0].mxu0 }
  0xf5   :  { %v214_v12 = vpop.f32.mrb[1].mxu0  ;;  %v152_v14 = vadd.f32 %v177_v11, %v129_v10 }
  0xf6   :  { %v132_v13 = vpop.f32.mrb[2].mxu0 }
  0xf7   :  { %v153_v15 = vadd.f32 %v177_v11, %v132_v13  ;;  %v215_v16 = vpop.f32.mrb[3].mxu0 }
  0xf9   :  { %v185_v17 = vpack.c.bf16 %v153_v15, %v152_v14 }
  0xfb   :  { %186 = vst [vmem:[%s285_s3] sm:$0xff] %v185_v17  }

// kernel: _lambda_.50
= control target key start
LH: loop header
LB: loop body
LE: loop exit
PB: predicated region body
PF: predicated region fallthrough
CT: control target
= control target key end

     0   :  { %v242_v0 = vmov 0.0   ;;  %vm243_vm0 = vmmov 0   ;;  %s305_s1 = inlined_call_operand.vmem [shape: bf16[128,128], index: 1, kind: input, shape index: {}]   ;;  %s306_s0 = inlined_call_operand.vmem [shape: bf16[16,128], index: 0, kind: input, shape index: {}]   ;;  %s307_s3 = inlined_call_operand.vmem [shape: bf16[16,128], index: 3, kind: input, shape index: {}]   ;;  %s308_s2 = inlined_call_operand.vmem [shape: f32[1,128], index: 2, kind: input, shape index: {}]   ;;  %s309_s4 = inlined_call_operand.vmem [shape: bf16[16,128], index: 4, kind: output, shape index: {}]  }
   0x1   :  { %211 = vmatprep.subr.bf16.mxu0 %v242_v0  ;;  %v233_v1 = vld [vmem:[%s305_s1] sm:$0xff]   ;;  %227 = vmatprep.mubr.msk.bf16.mxu0 %vm243_vm0, %v242_v0  ;;  %v234_v2 = vld [vmem:[%s305_s1 + $0x8] sm:$0xff]   ;;  %v235_v3 = vld [vmem:[%s305_s1 + $0x10] sm:$0xff]  }
   0x2   :  { %212 = vmatpush3.bf16.msra.mxu0 %v233_v1  ;;  %v236_v4 = vld [vmem:[%s305_s1 + $0x18] sm:$0xff]   ;;  %v237_v5 = vld [vmem:[%s305_s1 + $0x20] sm:$0xff]   ;;  %v238_v6 = vld [vmem:[%s305_s1 + $0x28] sm:$0xff]  }
   0x3   :  { %213 = vmatprep.subr.bf16.mxu0 %v242_v0  ;;  %v239_v7 = vld [vmem:[%s305_s1 + $0x30] sm:$0xff]   ;;  %v240_v8 = vld [vmem:[%s305_s1 + $0x38] sm:$0xff]   ;;  %v241_v9 = vld [vmem:[%s306_s0] sm:$0xff]  }
   0x4   :  { %v194_v10 = vld [vmem:[%s307_s3] sm:$0xff]  }
   0x5   :  { %v188_v11 = vld [vmem:[%s308_s2] ss:$0 sm:$0xff]  ;;  %v195_v12 = vunpack.c.l.bf16 %v194_v10  ;;  %v196_v16 = vunpack.c.h.bf16 %v194_v10 }
   0x6   :  { %214 = vmatpush3.bf16.msra.mxu0 %v234_v2 }
   0x7   :  { %215 = vmatprep.subr.bf16.mxu0 %v242_v0 }
   0xa   :  { %216 = vmatpush3.bf16.msra.mxu0 %v235_v3 }
   0xb   :  { %217 = vmatprep.subr.bf16.mxu0 %v242_v0 }
   0xe   :  { %218 = vmatpush3.bf16.msra.mxu0 %v236_v4 }
   0xf   :  { %219 = vmatprep.subr.bf16.mxu0 %v242_v0 }
  0x12   :  { %220 = vmatpush3.bf16.msra.mxu0 %v237_v5 }
  0x13   :  { %221 = vmatprep.subr.bf16.mxu0 %v242_v0 }
  0x16   :  { %222 = vmatpush3.bf16.msra.mxu0 %v238_v6 }
  0x17   :  { %223 = vmatprep.subr.bf16.mxu0 %v242_v0 }
  0x1a   :  { %224 = vmatpush3.bf16.msra.mxu0 %v239_v7 }
  0x1b   :  { %225 = vmatprep.subr.bf16.mxu0 %v242_v0 }
  0x1e   :  { %226 = vmatpush3.bf16.msra.mxu0 %v240_v8 }
  0x21   :  { %228 = vmatmul.mubr.bf16.vlgmr.msra.gmra.mrb[0].mxu0 %v241_v9 }
  0xf4   :  { %v132_v13 = vpop.f32.mrb[0].mxu0 }
  0xf5   :  { %v155_v14 = vadd.f32 %v188_v11, %v132_v13  ;;  %v229_v15 = vpop.f32.mrb[1].mxu0 }
  0xf6   :  { %v135_v17 = vpop.f32.mrb[2].mxu0 }
  0xf7   :  { %v161_v18 = vadd.f32 %v195_v12, %v155_v14  ;;  %v156_v19 = vadd.f32 %v188_v11, %v135_v17  ;;  %v230_v20 = vpop.f32.mrb[3].mxu0 }
  0xf9   :  { %v162_v21 = vadd.f32 %v196_v16, %v156_v19  ;;  %v163_v22 = vmax.f32 %v161_v18, 0.0 }
  0xfb   :  { %v164_v23 = vmax.f32 %v162_v21, 0.0 }
  0xfd   :  { %v200_v24 = vpack.c.bf16 %v164_v23, %v163_v22 }
  0xff   :  { %201 = vst [vmem:[%s309_s4] sm:$0xff] %v200_v24  }

// kernel: _lambda_.51
= control target key start
LH: loop header
LB: loop body
LE: loop exit
PB: predicated region body
PF: predicated region fallthrough
CT: control target
= control target key end

     0   :  { %v229_v0 = vmov 0.0   ;;  %vm230_vm0 = vmmov 0   ;;  %s284_s1 = inlined_call_operand.vmem [shape: bf16[128,128], index: 1, kind: input, shape index: {}]   ;;  %s285_s0 = inlined_call_operand.vmem [shape: bf16[16,128], index: 0, kind: input, shape index: {}]   ;;  %s286_s2 = inlined_call_operand.vmem [shape: f32[1,128], index: 2, kind: input, shape index: {}]   ;;  %s287_s3 = inlined_call_operand.vmem [shape: bf16[16,128], index: 3, kind: output, shape index: {}]  }
   0x1   :  { %198 = vmatprep.subr.bf16.mxu0 %v229_v0  ;;  %v220_v1 = vld [vmem:[%s284_s1] sm:$0xff]   ;;  %214 = vmatprep.mubr.msk.bf16.mxu0 %vm230_vm0, %v229_v0  ;;  %v221_v2 = vld [vmem:[%s284_s1 + $0x8] sm:$0xff]   ;;  %v222_v3 = vld [vmem:[%s284_s1 + $0x10] sm:$0xff]  }
   0x2   :  { %199 = vmatpush3.bf16.msra.mxu0 %v220_v1  ;;  %v223_v4 = vld [vmem:[%s284_s1 + $0x18] sm:$0xff]   ;;  %v224_v5 = vld [vmem:[%s284_s1 + $0x20] sm:$0xff]   ;;  %v225_v6 = vld [vmem:[%s284_s1 + $0x28] sm:$0xff]  }
   0x3   :  { %200 = vmatprep.subr.bf16.mxu0 %v229_v0  ;;  %v226_v7 = vld [vmem:[%s284_s1 + $0x30] sm:$0xff]   ;;  %v227_v8 = vld [vmem:[%s284_s1 + $0x38] sm:$0xff]   ;;  %v228_v9 = vld [vmem:[%s285_s0] sm:$0xff]  }
   0x4   :  { %v179_v10 = vld [vmem:[%s286_s2] ss:$0 sm:$0xff] }
   0x6   :  { %201 = vmatpush3.bf16.msra.mxu0 %v221_v2 }
   0x7   :  { %202 = vmatprep.subr.bf16.mxu0 %v229_v0 }
   0xa   :  { %203 = vmatpush3.bf16.msra.mxu0 %v222_v3 }
   0xb   :  { %204 = vmatprep.subr.bf16.mxu0 %v229_v0 }
   0xe   :  { %205 = vmatpush3.bf16.msra.mxu0 %v223_v4 }
   0xf   :  { %206 = vmatprep.subr.bf16.mxu0 %v229_v0 }
  0x12   :  { %207 = vmatpush3.bf16.msra.mxu0 %v224_v5 }
  0x13   :  { %208 = vmatprep.subr.bf16.mxu0 %v229_v0 }
  0x16   :  { %209 = vmatpush3.bf16.msra.mxu0 %v225_v6 }
  0x17   :  { %210 = vmatprep.subr.bf16.mxu0 %v229_v0 }
  0x1a   :  { %211 = vmatpush3.bf16.msra.mxu0 %v226_v7 }
  0x1b   :  { %212 = vmatprep.subr.bf16.mxu0 %v229_v0 }
  0x1e   :  { %213 = vmatpush3.bf16.msra.mxu0 %v227_v8 }
  0x21   :  { %215 = vmatmul.mubr.bf16.vlgmr.msra.gmra.mrb[0].mxu0 %v228_v9 }
  0xf4   :  { %v129_v11 = vpop.f32.mrb[0].mxu0 }
  0xf5   :  { %v152_v12 = vadd.f32 %v179_v10, %v129_v11  ;;  %v216_v13 = vpop.f32.mrb[1].mxu0 }
  0xf6   :  { %v132_v14 = vpop.f32.mrb[2].mxu0 }
  0xf7   :  { %v153_v15 = vadd.f32 %v179_v10, %v132_v14  ;;  %v217_v16 = vpop.f32.mrb[3].mxu0  ;;  %v154_v17 = vmax.f32 %v152_v12, 0.0 }
  0xf9   :  { %v155_v18 = vmax.f32 %v153_v15, 0.0 }
  0xfb   :  { %v187_v19 = vpack.c.bf16 %v155_v18, %v154_v17 }
  0xfd   :  { %188 = vst [vmem:[%s287_s3] sm:$0xff] %v187_v19  }

// kernel: _lambda_.55
= control target key start
LH: loop header
LB: loop body
LE: loop exit
PB: predicated region body
PF: predicated region fallthrough
CT: control target
= control target key end

     0   :  { %s739_s12 = smov 0   ;;  %s741_s13 = smov 0   ;;  %s827_s0 = inlined_call_operand.vmem [shape: bf16[16,640], index: 0, kind: input, shape index: {}]   ;;  %s828_s1 = inlined_call_operand.vmem [shape: bf16[640,128], index: 1, kind: input, shape index: {}]   ;;  %s829_s2 = inlined_call_operand.vmem [shape: f32[1,128], index: 2, kind: input, shape index: {}]   ;;  %s830_s3 = inlined_call_operand.vmem [shape: bf16[16,128], index: 3, kind: output, shape index: {}]  }
   0x1   :  { %s743_s14 = smov 0   ;;  %s745_s15 = smov 0  }
   0x2   :  { %s747_s16 = smov 0  }
   0x3 LB: > { %s25_s17 = sadd.s32 1, %s710_s15  ;;  %p48_p1 = scmp.ne.s32.totalorder %s702_s13, %s698_s12  ;;  %s714_s16 = sphi %s747_s16, %s13_s16   ;;  %s710_s15 = sphi %s745_s15, %s834_s15   ;;  %s706_s14 = sphi %s743_s14, %s833_s14   ;;  %s702_s13 = sphi %s741_s13, %s832_s13   ;;  %s698_s12 = sphi %s739_s12, %s831_s12  }
   0x4   : > { %p26_p0 = scmp.ge.s32.totalorder %s25_s17, 5  ;;  %p49_p2 = scmp.eq.s32.totalorder %s714_s16, 0 }
   0x5   : > { %s41_s19 = sadd.s32 1, %s702_s13  ;;  %p563_p5 = scmp.ge.s32.totalorder %s714_s16, 5 }
   0x6   : > { %s836_s17 = smov (%p26_p0, %s25_s17), 0  ;;  %p50_p3 = por %p49_p2, %p48_p1 }
   0x7   : > { %s37_s18 = ssub.s32 %s710_s15, %s836_s17  ;;  %162 = sbr.rel (%p563_p5) target bundleno = 21 (0x15), region = 20 }
   0x8   : > { %p39_p4 = scmp.eq.s32.totalorder %s37_s18, 0 }
   0xa   : > { %s774_s20 = scalar_select %p39_p4, %s702_s13, %s41_s19  }
   0xe   : > { %165 = sbr.rel (!%p50_p3) target bundleno = 21 (0x15), region = 24  ;;  %s167_s21 = sand.u32 (%p50_p3), 1, %s702_s13  }
   0xf   : > { %s565_s22 = sshll.u32 (%p50_p3), %s710_s15, 2  ;;  %s564_s23 = sshll.u32 (%p50_p3), %s167_s21, 3 }
  0x10   : > { %s174_s26 = scalar_lea.vmem (%p50_p3), %s827_s0, %s565_s22  ;;  %s169_s27 = scalar_lea.vmem (%p50_p3), [#allocation3], %s564_s23 }
  0x11   : > { %v190_v0 = vld [vmem:[%s174_s26] sm:$0xf] (%p50_p3)  ;;  %v192_v1 = vld [vmem:[%s174_s26 + $0x14] sm:$0xf] (%p50_p3) }
  0x12   : > { %191 = vst [vmem:[%s169_s27] sm:$0xf] (%p50_p3), %v190_v0  ;;  %193 = vst [vmem:[%s169_s27 + $0x4] sm:$0xf] (%p50_p3), %v192_v1 }
  0x15 PF: > { %p566_p6 = scmp.ge.s32.totalorder %s714_s16, 1  ;;  %p231_p7 = scmp.lt.s32.totalorder %s714_s16, 6 }
  0x17   : > { %p232_p8 = pnand %p566_p6, %p231_p7 }
  0x18   : > { %s238_s28 = sand.u32 (!%p232_p8), 1, %s698_s12   ;;  %s568_s29 = sshll.u32 (!%p232_p8), %s706_s14, 4 }
  0x19   : > { %235 = sbr.rel (%p232_p8) target bundleno = 303 (0x12f), region = 69  ;;  %s786_s30 = sshll.u32 (!%p232_p8), %s238_s28, 3 }
  0x1a   : > { %p277_p9 = scmp.lt.s32.totalorder (!%p232_p8), %s568_s29, 79  ;;  %s240_s8 = scalar_lea.vmem (!%p232_p8), [#allocation3], %s786_s30 }
  0x1b   : > { %p570_p10 = scmp.ne.s32.totalorder (!%p232_p8), %s706_s14, 0 }
  0x20   : > { %s838_s29 = smov (!%p277_p9, %s568_s29), 79  ;;  %301 = sbr.rel (%p570_p10) target bundleno = 39 (0x27), region = 77 }
  0x21   : > { %s569_s4 = sshll.u32 %s838_s29, 2  ;;  %v716_v2 = vmov (!%p570_p10), 0.0  }
  0x22   : > { %s791_s7 = scalar_lea.vmem %s828_s1, %s569_s4  ;;  %302 = vst [vmem:[#allocation2] sm:$0xff] (!%p570_p10), %v716_v2  ;;  %303 = vst [vmem:[#allocation2 + $0x8] sm:$0xff] (!%p570_p10), %v716_v2 }
  0x27 PF: > { %v667_v3 = vld [vmem:[%s791_s7] sm:$0xff]   ;;  %v717_v4 = vmov 0.0   ;;  %v668_v5 = vld [vmem:[%s791_s7 + $0x8] sm:$0xff]   ;;  %vm718_vm0 = vmmov 0   ;;  %v669_v6 = vld [vmem:[%s791_s7 + $0x10] sm:$0xff]   ;;  %p580_p11 = scmp.ne.s32.totalorder %s706_s14, 4 }
  0x28   : > { %604 = vmatprep.subr.bf16.mxu0 %v717_v4  ;;  %620 = vmatprep.mubr.msk.bf16.mxu0 %vm718_vm0, %v717_v4  ;;  %v670_v7 = vld [vmem:[%s791_s7 + $0x18] sm:$0xff]   ;;  %v671_v8 = vld [vmem:[%s791_s7 + $0x20] sm:$0xff]   ;;  %v672_v9 = vld [vmem:[%s791_s7 + $0x28] sm:$0xff]  }
  0x29   : > { %605 = vmatpush3.bf16.msra.mxu0 %v667_v3  ;;  %v673_v10 = vld [vmem:[%s791_s7 + $0x30] sm:$0xff]   ;;  %v674_v11 = vld [vmem:[%s791_s7 + $0x38] sm:$0xff]   ;;  %v304_v13 = vld [vmem:[#allocation2] sm:$0xff] }
  0x2a   : > { %606 = vmatprep.subr.bf16.mxu0 %v717_v4  ;;  %v675_v12 = vld [vmem:[%s240_s8] sm:$0xff]   ;;  %v305_v15 = vld [vmem:[#allocation2 + $0x8] sm:$0xff]  ;;  %v581_v23 = vld [vmem:[%s829_s2] ss:$0 sm:$0xff] (!%p580_p11) }
  0x2d   : > { %607 = vmatpush3.bf16.msra.mxu0 %v668_v5 }
  0x2e   : > { %608 = vmatprep.subr.bf16.mxu0 %v717_v4 }
  0x31   : > { %609 = vmatpush3.bf16.msra.mxu0 %v669_v6 }
  0x32   : > { %610 = vmatprep.subr.bf16.mxu0 %v717_v4 }
  0x35   : > { %611 = vmatpush3.bf16.msra.mxu0 %v670_v7 }
  0x36   : > { %612 = vmatprep.subr.bf16.mxu0 %v717_v4 }
  0x39   : > { %613 = vmatpush3.bf16.msra.mxu0 %v671_v8 }
  0x3a   : > { %614 = vmatprep.subr.bf16.mxu0 %v717_v4 }
  0x3d   : > { %615 = vmatpush3.bf16.msra.mxu0 %v672_v9 }
  0x3e   : > { %616 = vmatprep.subr.bf16.mxu0 %v717_v4 }
  0x41   : > { %617 = vmatpush3.bf16.msra.mxu0 %v673_v10 }
  0x42   : > { %618 = vmatprep.subr.bf16.mxu0 %v717_v4 }
  0x45   : > { %619 = vmatpush3.bf16.msra.mxu0 %v674_v11 }
  0x48   : > { %621 = vmatmul.mubr.bf16.vlgmr.msra.gmra.mrb[0].mxu0 %v675_v12 }
 0x11a   : > { %426 = sbr.rel (%p580_p11) target bundleno = 303 (0x12f), region = 81 }
 0x11b   : > { %v412_v14 = vpop.f32.mrb[0].mxu0 }
 0x11c   : > { %v419_v16 = vadd.f32 %v412_v14, %v304_v13  ;;  %v622_v17 = vpop.f32.mrb[1].mxu0 }
 0x11d   : > { %v415_v18 = vpop.f32.mrb[2].mxu0 }
 0x11e   : > { %421 = vst [vmem:[#allocation2] sm:$0xff] %v419_v16  ;;  %v420_v19 = vadd.f32 %v415_v18, %v305_v15  ;;  %v623_v20 = vpop.f32.mrb[3].mxu0 }
 0x120   : > { %422 = vst [vmem:[#allocation2 + $0x8] sm:$0xff] %v420_v19 }
 0x125   : > { %v427_v21 = vld [vmem:[#allocation2] sm:$0xff] }
 0x126   : > { %v436_v24 = vadd.f32 %v581_v23, %v427_v21 }
 0x127   : > { %v428_v22 = vld [vmem:[#allocation2 + $0x8] sm:$0xff] }
 0x128   : > { %v437_v25 = vadd.f32 %v581_v23, %v428_v22  ;;  %v438_v26 = vmax.f32 %v436_v24, 0.0 }
 0x12a   : > { %v439_v27 = vmax.f32 %v437_v25, 0.0 }
 0x12c   : > { %v593_v28 = vpack.c.bf16 %v439_v27, %v438_v26 }
 0x12e   : > { %594 = vst [vmem:[%s830_s3] sm:$0xff] %v593_v28  }
 0x12f PF: > { %s13_s16 = sadd.s32 1, %s714_s16   ;;  %s831_s12 = smov %s702_s13 }
 0x130   : > { %p10_p12 = scmp.ge.s32.totalorder %s13_s16, 7   ;;  %s832_s13 = smov %s774_s20 }
 0x131   : > { %s833_s14 = smov %s710_s15  ;;  %s834_s15 = smov %s836_s17 }
 0x132   :  { %12 = sbr.rel (!%p10_p12) target bundleno = 3 (0x3), region = 122 }

// kernel: _lambda_.61
= control target key start
LH: loop header
LB: loop body
LE: loop exit
PB: predicated region body
PF: predicated region fallthrough
CT: control target
= control target key end

     0   :  { %v248_v3 = vmov 0.0|0.0   ;;  %vm249_vm0 = vmmov 0   ;;  %v250_v6 = vmov 0.0   ;;  %s341_s0 = inlined_call_operand.vmem [shape: bf16[1,2,128], index: 0, kind: input, shape index: {}]   ;;  %s342_s1 = inlined_call_operand.vmem [shape: f32[128,10], index: 1, kind: input, shape index: {}]   ;;  %s343_s2 = inlined_call_operand.vmem [shape: f32[1,10], index: 2, kind: input, shape index: {}]   ;;  %s344_s3 = inlined_call_operand.hbm [shape: f32[2,10], index: 3, kind: output, shape index: {}]  }
   0x1   :  { %v18_v0 = vld [vmem:[%s342_s1] sm:$0xff]  ;;  %v19_v1 = vld [vmem:[%s342_s1 + $0x8] sm:$0xff]  ;;  %v20_v2 = vld [vmem:[%s342_s1 + $0x10] sm:$0xff]  ;;  %192 = vmatprep.subr.bf16.mxu0 %v248_v3  ;;  %189 = vmatprep.mubr.msk.f32.mxu0 %vm249_vm0, %v250_v6 }
   0x2   :  { %v193_v4 = vpack.c.bf16 %v19_v1, %v18_v0  ;;  %v21_v5 = vld [vmem:[%s342_s1 + $0x18] sm:$0xff]  ;;  %v22_v8 = vld [vmem:[%s342_s1 + $0x20] sm:$0xff]  ;;  %v23_v9 = vld [vmem:[%s342_s1 + $0x28] sm:$0xff] }
   0x3   :  { %v196_v7 = vpack.c.bf16 %v21_v5, %v20_v2 }
   0x4   :  { %194 = vmatpush3.bf16.msra.mxu0 %v193_v4 }
   0x5   :  { %195 = vmatprep.subr.bf16.mxu0 %v248_v3 }
   0x6   :  { %8 = vsyncpa [#allocation3], 0  ;;  %v199_v10 = vpack.c.bf16 %v23_v9, %v22_v8  ;;  %v24_v11 = vld [vmem:[%s342_s1 + $0x30] sm:$0xff]  ;;  %v25_v12 = vld [vmem:[%s342_s1 + $0x38] sm:$0xff]  ;;  %vm111_vm1 = vcmask 74752  }
   0x7   :  { %v202_v13 = vpack.c.bf16 %v25_v12, %v24_v11  ;;  %v26_v14 = vld [vmem:[%s342_s1 + $0x40] sm:$0xff]  ;;  %v27_v15 = vld [vmem:[%s342_s1 + $0x48] sm:$0xff]  ;;  %v28_v17 = vld [vmem:[%s342_s1 + $0x50] sm:$0xff] }
   0x8   :  { %197 = vmatpush3.bf16.msra.mxu0 %v196_v7  ;;  %v205_v16 = vpack.c.bf16 %v27_v15, %v26_v14  ;;  %v29_v18 = vld [vmem:[%s342_s1 + $0x58] sm:$0xff]  ;;  %v30_v20 = vld [vmem:[%s342_s1 + $0x60] sm:$0xff]  ;;  %v31_v21 = vld [vmem:[%s342_s1 + $0x68] sm:$0xff] }
   0x9   :  { %198 = vmatprep.subr.bf16.mxu0 %v248_v3  ;;  %v208_v19 = vpack.c.bf16 %v29_v18, %v28_v17  ;;  %v211_v22 = vpack.c.bf16 %v31_v21, %v30_v20  ;;  %v32_v23 = vld [vmem:[%s342_s1 + $0x70] sm:$0xff]  ;;  %v33_v24 = vld [vmem:[%s342_s1 + $0x78] sm:$0xff]  ;;  %v15_v26 = vld [vmem:[%s341_s0] sm:$0x1]  ;;  %s251_s0 = smov [#allocation2]  }
   0xa   :  { %v214_v25 = vpack.c.bf16 %v33_v24, %v32_v23  ;;  %v16_v27 = vunpack.c.l.bf16 %v15_v26  ;;  %v139_v28 = vld [vmem:[%s343_s2] ss:$0 sm:$0xff]  ;;  %s131_s1 = sshll.u32 %s251_s0, 4  ;;  %s132_s1 = int_to_ptr.vmem [resolvable:$true] %s131_s1 }
   0xb   :  { %s224_s2 = scalar_lea.vmem %s132_s1, 32  ;;  %p229_p1 = scmp.lt.s32.totalorder %s132_s1, %s132_s1 }
   0xc   :  { %200 = vmatpush3.bf16.msra.mxu0 %v199_v10  ;;  %p225_p0 = scmp.ne.s32.totalorder %s132_s1, %s224_s2  ;;  %p230_p2 = scmp.lt.s32.totalorder %s224_s2, %s224_s2 }
   0xd   :  { %201 = vmatprep.subr.bf16.mxu0 %v248_v3 }
   0xe   :  { %p231_p3 = por %p230_p2, %p229_p1 }
  0x10   :  { %203 = vmatpush3.bf16.msra.mxu0 %v202_v13  ;;  %p232_p4 = pnand %p231_p3, %p225_p0 }
  0x11   :  { %204 = vmatprep.subr.bf16.mxu0 %v248_v3 }
  0x14   :  { %206 = vmatpush3.bf16.msra.mxu0 %v205_v16 }
  0x15   :  { %207 = vmatprep.subr.bf16.mxu0 %v248_v3 }
  0x18   :  { %209 = vmatpush3.bf16.msra.mxu0 %v208_v19 }
  0x19   :  { %210 = vmatprep.subr.bf16.mxu0 %v248_v3 }
  0x1c   :  { %212 = vmatpush3.bf16.msra.mxu0 %v211_v22 }
  0x1d   :  { %213 = vmatprep.subr.bf16.mxu0 %v248_v3 }
  0x20   :  { %215 = vmatpush3.bf16.msra.mxu0 %v214_v25 }
  0x23   :  { %190 = vmatmul.mubr.f32.vlgmr.msra.gmra.mrb[0].mxu0 %v16_v27 }
  0xf6   :  { %v107_v29 = vpop.f32.mrb[0].mxu0 }
  0xf7   :  { %v108_v30 = vadd.f32 %v139_v28, %v107_v29  ;;  %v191_v31 = vpop.f32.mrb[1].mxu0 }
  0xf9   :  { %v112_v32 = vsel %vm111_vm1, %v108_v30, -inf }
  0xfa   :  { %113 = vmax.xlane.f32.xlu0 %v112_v32 }
 0x187   :  { %v114_v33 = vpop.xlane.xlu0 %113 }
 0x188   :  { %v115_v34 = vsub.f32 %v108_v30, %v114_v33 }
 0x18a   :  { %v116_v35 = vmul.f32 1.442695, %v115_v34 }
 0x18c   :  { %220 = vpow2.f32 %v116_v35 }
 0x196   :  { %v221_v36 = vpop.eup %220 }
 0x197   :  { %v118_v37 = vsel %vm111_vm1, %v221_v36, 0.0 }
 0x198   :  { %119 = vadd.xlane.f32.xlu0 %v118_v37 }
 0x225   :  { %v120_v38 = vpop.xlane.xlu0 %119 }
 0x226   :  { %222 = vlog2.f32 %v120_v38 }
 0x230   :  { %v223_v39 = vpop.eup %222 }
 0x231   :  { %v122_v40 = vmul.f32 0.6931472, %v223_v39 }
 0x233   :  { %v123_v41 = vsub.f32 %v115_v34, %v122_v40 }
 0x235   :  { %124 = vst.msk [vmem:[#allocation2] sm:$0x3] %vm111_vm1, %v123_v41 }
 0x236   :  { %235 = shalt.err (!%p232_p4)
}
 0x237   :  { %s236_s23 = scalar_lea.hbm %s344_s3, 32 }
 0x238   :  { %p237_p5 = scmp.ne.s32.totalorder %s344_s3, %s236_s23  ;;  %p240_p6 = scmp.lt.u32.totalorder %s236_s23, %s344_s3 }
 0x23a   :  { %p242_p7 = pnand %p240_p6, %p237_p5 }
 0x23c   :  { %245 = shalt.err (!%p242_p7)
}
 0x23d   :  { %134 = dma.vmem_to_hbm [thread:$0]  %s132_s1, 32, %s344_s3, [#allocation3]  }
 0x23e   :  { %246 = dma.done.wait [#allocation3], 32  }
 0x23f   :  { %247 = vsyncadd [#allocation3], 4294967264 }
 0x240   :  { %138 = vsyncpa [#allocation3], 1 }

</bundles_post_ra>
